<compile_context>
chip_gen: v6e
topology: v6e:2x2x1
jax: 0.10.0
libtpu: 0.0.40
codegen_flags: <defaults>
</compile_context>

<pallas_src>
import functools

import jax
import jax.numpy as jnp
from jax.experimental import pallas as pl
from jax.experimental.pallas import tpu as pltpu

# prm constants (synthetic, deterministic)
HP, WP = 3, 3          # prm.REF_PPPAD
HIDDEN = 8             # prm.HIDDEN_CHANNELS
assert (WP - 1) // 2 - 1 == 0, "pad_wp = (WP-1)//2 - 1 must be 0 for this implementation"


# ------------------------------ Pallas kernel -------------------------------- #
def _calc_padding_kernel(x_ref,
                         lw1_ref, lb1_ref, lw2_ref, lb2_ref,
                         lw3t_ref, lw3b_ref, lb3t_ref, lb3b_ref,
                         vw1_ref, vb1_ref, vw2_ref, vb2_ref,
                         vw3l_ref, vw3r_ref, vb3l_ref, vb3r_ref,
                         o_ref, *, p, B, C, H, W):
    Hf, Wf = H + 2 * p, W + 2 * p
    lw = Wf - (WP - 1)          # lateral (top/bottom) conv output length
    lh = Hf - (WP - 1)          # vertical (left/right) conv output length
    Hd = lw3t_ref.shape[0]      # hidden channels per border

    # ---- init: only border strips (zeros) + interior (x); no double write ---- #
    o_ref[:, :, 0:p, :] = jnp.zeros((B, C, p, Wf), jnp.float32)
    o_ref[:, :, p + H:Hf, :] = jnp.zeros((B, C, p, Wf), jnp.float32)
    o_ref[:, :, p:p + H, 0:p] = jnp.zeros((B, C, H, p), jnp.float32)
    o_ref[:, :, p:p + H, p + W:Wf] = jnp.zeros((B, C, H, p), jnp.float32)
    o_ref[:, :, p:p + H, p:p + W] = x_ref[...]

    # ---- load the (tiny) fused weights once, outside the ring loop ---- #
    lw1, lb1, lw2, lb2 = lw1_ref[...], lb1_ref[...], lw2_ref[...], lb2_ref[...]
    lw3t, lw3b, lb3t, lb3b = lw3t_ref[...], lw3b_ref[...], lb3t_ref[...], lb3b_ref[...]
    vw1, vb1, vw2, vb2 = vw1_ref[...], vb1_ref[...], vw2_ref[...], vb2_ref[...]
    vw3l, vw3r, vb3l, vb3r = vw3l_ref[...], vw3r_ref[...], vb3l_ref[...], vb3r_ref[...]

    def lateral_strip(b, row_lo):
        # one load per (batch, strip): (C, HP, Wf); merge channels with one concat
        slab = o_ref[b, :, row_lo:row_lo + HP, :]                          # (C, HP, Wf)
        s2 = jnp.concatenate([slab[c] for c in range(C)], axis=0)         # (C*HP, Wf) rows c*HP + kh
        return [s2[:, t:t + lw] for t in range(WP)]                        # WP x (C*HP, lw), tap = kw

    def vertical_strip(b, col_lo):
        slab = o_ref[b, :, :, col_lo:col_lo + HP]                          # (C, Hf, HP)
        s2 = jnp.concatenate([slab[c] for c in range(C)], axis=1)         # (Hf, C*HP) cols c*HP + kw
        return [s2[t:t + lh, :] for t in range(WP)]                        # WP x (lh, C*HP), tap = kh

    # ---- sequential ring dependency (each ring reads the previous ring's writes) ---- #
    for i in range(p):
        # ----- fused top + bottom (lateral), one block-diagonal MLP chain ----- #
        row_top = p - i
        row_bot = p + H - HP + i
        cols = []
        for b in range(B):
            pieces = lateral_strip(b, row_top) + lateral_strip(b, row_bot)
            cols.append(jnp.concatenate(pieces, axis=0))                   # (2*9C, lw)
        X = jnp.concatenate(cols, axis=1)                                  # (2*9C, B*lw)
        y1 = jnp.maximum(jnp.dot(lw1, X, preferred_element_type=jnp.float32) + lb1, 0.0)
        y2 = jnp.maximum(jnp.dot(lw2, y1, preferred_element_type=jnp.float32) + lb2, 0.0)
        # layer 3 (1x8) on the VPU: broadcast MAC + cross-sublane reduce, per strip
        y_top = jnp.maximum(jnp.sum(y2[0:Hd, :] * lw3t, axis=0, keepdims=True) + lb3t, 0.0)
        y_bot = jnp.maximum(jnp.sum(y2[Hd:2 * Hd, :] * lw3b, axis=0, keepdims=True) + lb3b, 0.0)
        out_row_top = p - 1 - i
        out_row_bot = p + H + i
        for b in range(B):
            vt = y_top[:, b * lw:(b + 1) * lw]                             # (1, lw)
            o_ref[b:b + 1, :, out_row_top:out_row_top + 1, 1:Wf - 1] = jnp.broadcast_to(
                vt[None, None], (1, C, 1, lw))
            vb_ = y_bot[:, b * lw:(b + 1) * lw]
            o_ref[b:b + 1, :, out_row_bot:out_row_bot + 1, 1:Wf - 1] = jnp.broadcast_to(
                vb_[None, None], (1, C, 1, lw))

        # ----- fused left + right (vertical, transposed orientation) ----- #
        # reads the rows just written by this ring's laterals (trace order preserved)
        col_left = p - i
        col_right = p + W - HP + i
        rows = []
        for b in range(B):
            pieces = vertical_strip(b, col_left) + vertical_strip(b, col_right)
            rows.append(jnp.concatenate(pieces, axis=1))                   # (lh, 2*9C)
        Xv = jnp.concatenate(rows, axis=0)                                 # (B*lh, 2*9C)
        z1 = jnp.maximum(jnp.dot(Xv, vw1, preferred_element_type=jnp.float32) + vb1, 0.0)
        z2 = jnp.maximum(jnp.dot(z1, vw2, preferred_element_type=jnp.float32) + vb2, 0.0)
        y_left = jnp.maximum(jnp.sum(z2[:, 0:Hd] * vw3l, axis=1, keepdims=True) + vb3l, 0.0)
        y_right = jnp.maximum(jnp.sum(z2[:, Hd:2 * Hd] * vw3r, axis=1, keepdims=True) + vb3r, 0.0)
        out_col_left = p - 1 - i
        out_col_right = p + W + i
        # NOTE: these are 1-lane-wide masked column stores; bytes are tiny (review:
        # verify vst.msk count in the bundle before investing in a transposed copy).
        for b in range(B):
            vl = y_left[b * lh:(b + 1) * lh, :]                            # (lh, 1)
            o_ref[b:b + 1, :, 1:Hf - 1, out_col_left:out_col_left + 1] = jnp.broadcast_to(
                vl[None, None], (1, C, lh, 1))
            vr = y_right[b * lh:(b + 1) * lh, :]
            o_ref[b:b + 1, :, 1:Hf - 1, out_col_right:out_col_right + 1] = jnp.broadcast_to(
                vr[None, None], (1, C, lh, 1))


def calc_padding_forward(x, p, lat_params, ver_params):
    """x: (B, C, H, W) -> padded (B, C, H+2p, W+2p) via one Pallas kernel."""
    if p == 0:
        return x
    B, C, H, W = x.shape
    Hf, Wf = H + 2 * p, W + 2 * p
    kernel = functools.partial(_calc_padding_kernel, p=p, B=B, C=C, H=H, W=W)
    vmem = lambda: pl.BlockSpec(memory_space=pltpu.MemorySpace.VMEM)
    n_in = 1 + len(lat_params) + len(ver_params)
    out = pl.pallas_call(
        kernel,
        out_shape=jax.ShapeDtypeStruct((B, C, Hf, Wf), jnp.float32),
        in_specs=[vmem() for _ in range(n_in)],
        out_specs=vmem(),
    )(x, *lat_params, *ver_params)
    return out


# ------------------------- parameter setup (host glue) ----------------------- #
def init_conv_pppad(key, in_ch, hidden, kernel_size):
    """Shapes match nn.Conv2d of conv_pppad; deterministic synthetic values."""
    k1, k2, k3, k4, k5, k6 = jax.random.split(key, 6)
    kh, kw = kernel_size
    W1 = 0.2 * jax.random.normal(k1, (hidden, in_ch, kh, kw), jnp.float32)
    b1 = 0.1 * jax.random.normal(k2, (hidden,), jnp.float32)
    W2 = 0.2 * jax.random.normal(k3, (hidden, hidden, 1, 1), jnp.float32)
    b2 = 0.1 * jax.random.normal(k4, (hidden,), jnp.float32)
    W3 = 0.2 * jax.random.normal(k5, (1, hidden, 1, 1), jnp.float32)
    b3 = 0.1 * jax.random.normal(k6, (1,), jnp.float32)
    return W1, b1, W2, b2, W3, b3


def _block_diag2(a, b):
    """Exact-zero cross blocks (correctness requirement for the border fusion)."""
    za = jnp.zeros((a.shape[0], b.shape[1]), jnp.float32)
    zb = jnp.zeros((b.shape[0], a.shape[1]), jnp.float32)
    top = jnp.concatenate([a, za], axis=1)
    bot = jnp.concatenate([zb, b], axis=1)
    return jnp.concatenate([top, bot], axis=0)


def _pack_w1_lateral(W1):
    # im2col row order within a strip: k = kw*(C*HP) + c*HP + kh
    Hd = W1.shape[0]
    return jnp.transpose(W1, (0, 3, 1, 2)).reshape(Hd, -1).astype(jnp.float32)


def _pack_w1_vertical(W1):
    # im2col col order within a strip: m = kh*(C*HP) + c*HP + kw
    Hd = W1.shape[0]
    return jnp.transpose(W1, (0, 2, 1, 3)).reshape(Hd, -1).astype(jnp.float32)


def pack_lateral_pair(raw_top, raw_bottom):
    """Block-diagonal fusion of the top & bottom border MLPs (W @ X orientation)."""
    W1a, b1a, W2a, b2a, W3a, b3a = raw_top
    W1b, b1b, W2b, b2b, W3b, b3b = raw_bottom
    Hd = W1a.shape[0]
    f = jnp.float32
    w1 = _block_diag2(_pack_w1_lateral(W1a), _pack_w1_lateral(W1b))        # (2Hd, 2*9C)
    b1 = jnp.concatenate([b1a, b1b]).reshape(2 * Hd, 1).astype(f)
    w2 = _block_diag2(W2a[:, :, 0, 0].astype(f), W2b[:, :, 0, 0].astype(f))  # (2Hd, 2Hd)
    b2 = jnp.concatenate([b2a, b2b]).reshape(2 * Hd, 1).astype(f)
    w3a = W3a[0, :, 0, 0].reshape(Hd, 1).astype(f)
    w3b = W3b[0, :, 0, 0].reshape(Hd, 1).astype(f)
    return (w1, b1, w2, b2, w3a, w3b,
            b3a.reshape(1, 1).astype(f), b3b.reshape(1, 1).astype(f))


def pack_vertical_pair(raw_left, raw_right):
    """Block-diagonal fusion of left & right MLPs, pre-transposed (X @ W^T)."""
    W1a, b1a, W2a, b2a, W3a, b3a = raw_left
    W1b, b1b, W2b, b2b, W3b, b3b = raw_right
    Hd = W1a.shape[0]
    f = jnp.float32
    w1t = jnp.transpose(_block_diag2(_pack_w1_vertical(W1a),
                                     _pack_w1_vertical(W1b)))              # (2*9C, 2Hd)
    b1r = jnp.concatenate([b1a, b1b]).reshape(1, 2 * Hd).astype(f)
    w2t = jnp.transpose(_block_diag2(W2a[:, :, 0, 0].astype(f),
                                     W2b[:, :, 0, 0].astype(f)))           # (2Hd, 2Hd)
    b2r = jnp.concatenate([b2a, b2b]).reshape(1, 2 * Hd).astype(f)
    w3a = W3a[0, :, 0, 0].reshape(1, Hd).astype(f)
    w3b = W3b[0, :, 0, 0].reshape(1, Hd).astype(f)
    return (w1t, b1r, w2t, b2r, w3a, w3b,
            b3a.reshape(1, 1).astype(f), b3b.reshape(1, 1).astype(f))


def pack_params(raw_top, raw_bottom, raw_left, raw_right):
    return pack_lateral_pair(raw_top, raw_bottom), pack_vertical_pair(raw_left, raw_right)


# ----------------------------- pure-JAX reference ----------------------------- #
def _ref_conv_mlp(slab, W1, b1, W2, b2, W3, b3):
    dn = ('NCHW', 'OIHW', 'NCHW')
    y = jax.lax.conv_general_dilated(slab, W1, (1, 1), ((0, 0), (0, 0)),
                                     dimension_numbers=dn)
    y = jnp.maximum(y + b1[None, :, None, None], 0.0)
    y = jax.lax.conv_general_dilated(y, W2, (1, 1), ((0, 0), (0, 0)),
                                     dimension_numbers=dn)
    y = jnp.maximum(y + b2[None, :, None, None], 0.0)
    y = jax.lax.conv_general_dilated(y, W3, (1, 1), ((0, 0), (0, 0)),
                                     dimension_numbers=dn)
    y = jnp.maximum(y + b3[None, :, None, None], 0.0)
    return y


def ref_calc_padding(x, p, raw_top, raw_bottom, raw_left, raw_right):
    B, C, H, W = x.shape
    Hf, Wf = H + 2 * p, W + 2 * p
    xp = jnp.zeros((B, C, Hf, Wf), jnp.float32)
    xp = xp.at[:, :, p:H + p, p:W + p].set(x)
    for i in range(p):
        y = _ref_conv_mlp(xp[:, :, p - i:p + HP - i, :], *raw_top)
        xp = xp.at[:, :, p - 1 - i, 1:Wf - 1].set(y[:, 0, 0, :][:, None, :])
        y = _ref_conv_mlp(xp[:, :, p + H - HP + i:p + H + i, :], *raw_bottom)
        xp = xp.at[:, :, p + H + i, 1:Wf - 1].set(y[:, 0, 0, :][:, None, :])
        y = _ref_conv_mlp(xp[:, :, :, p - i:p + HP - i], *raw_left)
        xp = xp.at[:, :, 1:Hf - 1, p - 1 - i].set(y[:, 0, :, 0][:, None, :])
        y = _ref_conv_mlp(xp[:, :, :, p + W - HP + i:p + W + i], *raw_right)
        xp = xp.at[:, :, 1:Hf - 1, p + W + i].set(y[:, 0, :, 0][:, None, :])
    return xp


# ------------------------------------ main ------------------------------------ #
if __name__ == "__main__":
    key = jax.random.PRNGKey(0)
    kx, kt, kb, kl, kr = jax.random.split(key, 5)

    B, C, H, W = 2, 4, 16, 16
    p = 2
    x = jax.random.normal(kx, (B, C, H, W), jnp.float32)

    # lateral convs (top/bottom): kernel (HP, WP); vertical (left/right): kernel (WP, HP)
    raw_top = init_conv_pppad(kt, C, HIDDEN, (HP, WP))
    raw_bottom = init_conv_pppad(kb, C, HIDDEN, (HP, WP))
    raw_left = init_conv_pppad(kl, C, HIDDEN, (WP, HP))
    raw_right = init_conv_pppad(kr, C, HIDDEN, (WP, HP))

    lat_params, ver_params = pack_params(raw_top, raw_bottom, raw_left, raw_right)

    @jax.jit
    def fwd(x_, lat_, ver_):
        return calc_padding_forward(x_, p, lat_, ver_)

    out = jax.block_until_ready(fwd(x, lat_params, ver_params))
    assert out.shape == (B, C, H + 2 * p, W + 2 * p)

    ref = ref_calc_padding(x, p, raw_top, raw_bottom, raw_left, raw_right)
    if not jnp.allclose(out, ref, atol=5e-2, rtol=5e-2):
        raise AssertionError("Pallas output does not match JAX conv reference")

    print("KERNEL_OK")
</pallas_src>

<mosaic_0001>
module attributes {stable_mosaic.version = 11 : i64} {
  func.func @_calc_padding_kernel(%arg0: memref<2x4x16x16xf32, #tpu.memory_space<vmem>>, %arg1: memref<16x72xf32, #tpu.memory_space<vmem>>, %arg2: memref<16x1xf32, #tpu.memory_space<vmem>>, %arg3: memref<16x16xf32, #tpu.memory_space<vmem>>, %arg4: memref<16x1xf32, #tpu.memory_space<vmem>>, %arg5: memref<8x1xf32, #tpu.memory_space<vmem>>, %arg6: memref<8x1xf32, #tpu.memory_space<vmem>>, %arg7: memref<1x1xf32, #tpu.memory_space<vmem>>, %arg8: memref<1x1xf32, #tpu.memory_space<vmem>>, %arg9: memref<72x16xf32, #tpu.memory_space<vmem>>, %arg10: memref<1x16xf32, #tpu.memory_space<vmem>>, %arg11: memref<16x16xf32, #tpu.memory_space<vmem>>, %arg12: memref<1x16xf32, #tpu.memory_space<vmem>>, %arg13: memref<1x8xf32, #tpu.memory_space<vmem>>, %arg14: memref<1x8xf32, #tpu.memory_space<vmem>>, %arg15: memref<1x1xf32, #tpu.memory_space<vmem>>, %arg16: memref<1x1xf32, #tpu.memory_space<vmem>>, %arg17: memref<2x4x20x20xf32, #tpu.memory_space<vmem>>) attributes {dimension_semantics = [], scalar_prefetch = 0 : i64, scratch_operands = 0 : i64, tpu.core_type = #tpu.core_type<tc>} {
    %cst = arith.constant 0.000000e+00 : f32
    %0 = vector.broadcast %cst : f32 to vector<2x4x2x20xf32>
    %c0 = arith.constant 0 : index
    %c0_0 = arith.constant 0 : index
    %c0_1 = arith.constant 0 : index
    %c0_2 = arith.constant 0 : index
    %1 = vector.load %arg17[%c0, %c0_0, %c0_1, %c0_2] : memref<2x4x20x20xf32, #tpu.memory_space<vmem>>, vector<2x4x2x20xf32>
    tpu.vector_store %arg17[%c0, %c0_0, %c0_1, %c0_2], %0 {strides = array<i32>} : memref<2x4x20x20xf32, #tpu.memory_space<vmem>>, vector<2x4x2x20xf32>,
    %cst_3 = arith.constant 0.000000e+00 : f32
    %2 = vector.broadcast %cst_3 : f32 to vector<2x4x2x20xf32>
    %c0_4 = arith.constant 0 : index
    %c0_5 = arith.constant 0 : index
    %c18 = arith.constant 18 : index
    %c0_6 = arith.constant 0 : index
    %3 = vector.load %arg17[%c0_4, %c0_5, %c18, %c0_6] : memref<2x4x20x20xf32, #tpu.memory_space<vmem>>, vector<2x4x2x20xf32>
    tpu.vector_store %arg17[%c0_4, %c0_5, %c18, %c0_6], %2 {strides = array<i32>} : memref<2x4x20x20xf32, #tpu.memory_space<vmem>>, vector<2x4x2x20xf32>,
    %cst_7 = arith.constant 0.000000e+00 : f32
    %4 = vector.broadcast %cst_7 : f32 to vector<2x4x16x2xf32>
    %c0_8 = arith.constant 0 : index
    %c0_9 = arith.constant 0 : index
    %c2 = arith.constant 2 : index
    %c0_10 = arith.constant 0 : index
    %5 = vector.load %arg17[%c0_8, %c0_9, %c2, %c0_10] : memref<2x4x20x20xf32, #tpu.memory_space<vmem>>, vector<2x4x16x2xf32>
    tpu.vector_store %arg17[%c0_8, %c0_9, %c2, %c0_10], %4 {strides = array<i32>} : memref<2x4x20x20xf32, #tpu.memory_space<vmem>>, vector<2x4x16x2xf32>,
    %cst_11 = arith.constant 0.000000e+00 : f32
    %6 = vector.broadcast %cst_11 : f32 to vector<2x4x16x2xf32>
    %c0_12 = arith.constant 0 : index
    %c0_13 = arith.constant 0 : index
    %c2_14 = arith.constant 2 : index
    %c18_15 = arith.constant 18 : index
    %7 = vector.load %arg17[%c0_12, %c0_13, %c2_14, %c18_15] : memref<2x4x20x20xf32, #tpu.memory_space<vmem>>, vector<2x4x16x2xf32>
    tpu.vector_store %arg17[%c0_12, %c0_13, %c2_14, %c18_15], %6 {strides = array<i32>} : memref<2x4x20x20xf32, #tpu.memory_space<vmem>>, vector<2x4x16x2xf32>,
    %c0_16 = arith.constant 0 : index
    %c0_17 = arith.constant 0 : index
    %c0_18 = arith.constant 0 : index
    %c0_19 = arith.constant 0 : index
    %8 = vector.load %arg0[%c0_16, %c0_17, %c0_18, %c0_19] : memref<2x4x16x16xf32, #tpu.memory_space<vmem>>, vector<2x4x16x16xf32>
    %c0_20 = arith.constant 0 : index
    %c0_21 = arith.constant 0 : index
    %c2_22 = arith.constant 2 : index
    %c2_23 = arith.constant 2 : index
    %9 = vector.load %arg17[%c0_20, %c0_21, %c2_22, %c2_23] : memref<2x4x20x20xf32, #tpu.memory_space<vmem>>, vector<2x4x16x16xf32>
    tpu.vector_store %arg17[%c0_20, %c0_21, %c2_22, %c2_23], %8 {strides = array<i32>} : memref<2x4x20x20xf32, #tpu.memory_space<vmem>>, vector<2x4x16x16xf32>,
    %c0_24 = arith.constant 0 : index
    %c0_25 = arith.constant 0 : index
    %10 = vector.load %arg1[%c0_24, %c0_25] : memref<16x72xf32, #tpu.memory_space<vmem>>, vector<16x72xf32>
    %c0_26 = arith.constant 0 : index
    %c0_27 = arith.constant 0 : index
    %11 = vector.load %arg2[%c0_26, %c0_27] : memref<16x1xf32, #tpu.memory_space<vmem>>, vector<16x1xf32>
    %c0_28 = arith.constant 0 : index
    %c0_29 = arith.constant 0 : index
    %12 = vector.load %arg3[%c0_28, %c0_29] : memref<16x16xf32, #tpu.memory_space<vmem>>, vector<16x16xf32>
    %c0_30 = arith.constant 0 : index
    %c0_31 = arith.constant 0 : index
    %13 = vector.load %arg4[%c0_30, %c0_31] : memref<16x1xf32, #tpu.memory_space<vmem>>, vector<16x1xf32>
    %c0_32 = arith.constant 0 : index
    %c0_33 = arith.constant 0 : index
    %14 = vector.load %arg5[%c0_32, %c0_33] : memref<8x1xf32, #tpu.memory_space<vmem>>, vector<8x1xf32>
    %c0_34 = arith.constant 0 : index
    %c0_35 = arith.constant 0 : index
    %15 = vector.load %arg6[%c0_34, %c0_35] : memref<8x1xf32, #tpu.memory_space<vmem>>, vector<8x1xf32>
    %c0_36 = arith.constant 0 : index
    %c0_37 = arith.constant 0 : index
    %16 = vector.load %arg7[%c0_36, %c0_37] : memref<1x1xf32, #tpu.memory_space<vmem>>, vector<1x1xf32>
    %c0_38 = arith.constant 0 : index
    %c0_39 = arith.constant 0 : index
    %17 = vector.load %arg8[%c0_38, %c0_39] : memref<1x1xf32, #tpu.memory_space<vmem>>, vector<1x1xf32>
    %c0_40 = arith.constant 0 : index
    %c0_41 = arith.constant 0 : index
    %18 = vector.load %arg9[%c0_40, %c0_41] : memref<72x16xf32, #tpu.memory_space<vmem>>, vector<72x16xf32>
    %c0_42 = arith.constant 0 : index
    %c0_43 = arith.constant 0 : index
    %19 = vector.load %arg10[%c0_42, %c0_43] : memref<1x16xf32, #tpu.memory_space<vmem>>, vector<1x16xf32>
    %c0_44 = arith.constant 0 : index
    %c0_45 = arith.constant 0 : index
    %20 = vector.load %arg11[%c0_44, %c0_45] : memref<16x16xf32, #tpu.memory_space<vmem>>, vector<16x16xf32>
    %c0_46 = arith.constant 0 : index
    %c0_47 = arith.constant 0 : index
    %21 = vector.load %arg12[%c0_46, %c0_47] : memref<1x16xf32, #tpu.memory_space<vmem>>, vector<1x16xf32>
    %c0_48 = arith.constant 0 : index
    %c0_49 = arith.constant 0 : index
    %22 = vector.load %arg13[%c0_48, %c0_49] : memref<1x8xf32, #tpu.memory_space<vmem>>, vector<1x8xf32>
    %c0_50 = arith.constant 0 : index
    %c0_51 = arith.constant 0 : index
    %23 = vector.load %arg14[%c0_50, %c0_51] : memref<1x8xf32, #tpu.memory_space<vmem>>, vector<1x8xf32>
    %c0_52 = arith.constant 0 : index
    %c0_53 = arith.constant 0 : index
    %24 = vector.load %arg15[%c0_52, %c0_53] : memref<1x1xf32, #tpu.memory_space<vmem>>, vector<1x1xf32>
    %c0_54 = arith.constant 0 : index
    %c0_55 = arith.constant 0 : index
    %25 = vector.load %arg16[%c0_54, %c0_55] : memref<1x1xf32, #tpu.memory_space<vmem>>, vector<1x1xf32>
    %c0_56 = arith.constant 0 : index
    %c0_57 = arith.constant 0 : index
    %c2_58 = arith.constant 2 : index
    %c0_59 = arith.constant 0 : index
    %26 = vector.load %arg17[%c0_56, %c0_57, %c2_58, %c0_59] : memref<2x4x20x20xf32, #tpu.memory_space<vmem>>, vector<1x4x3x20xf32>
    %27 = vector.shape_cast %26 : vector<1x4x3x20xf32> to vector<4x3x20xf32>
    %28 = vector.extract_strided_slice %27 {offsets = [0, 0, 0], sizes = [1, 3, 20], strides = [1, 1, 1]} : vector<4x3x20xf32> to vector<1x3x20xf32>
    %29 = vector.shape_cast %28 : vector<1x3x20xf32> to vector<3x20xf32>
    %30 = vector.extract_strided_slice %27 {offsets = [1, 0, 0], sizes = [1, 3, 20], strides = [1, 1, 1]} : vector<4x3x20xf32> to vector<1x3x20xf32>
    %31 = vector.shape_cast %30 : vector<1x3x20xf32> to vector<3x20xf32>
    %32 = vector.extract_strided_slice %27 {offsets = [2, 0, 0], sizes = [1, 3, 20], strides = [1, 1, 1]} : vector<4x3x20xf32> to vector<1x3x20xf32>
    %33 = vector.shape_cast %32 : vector<1x3x20xf32> to vector<3x20xf32>
    %34 = vector.extract_strided_slice %27 {offsets = [3, 0, 0], sizes = [1, 3, 20], strides = [1, 1, 1]} : vector<4x3x20xf32> to vector<1x3x20xf32>
    %35 = vector.shape_cast %34 : vector<1x3x20xf32> to vector<3x20xf32>
    %36 = tpu.concatenate %29, %31, %33, %35 in 0 : vector<3x20xf32>, vector<3x20xf32>, vector<3x20xf32>, vector<3x20xf32> -> vector<12x20xf32>
    %37 = vector.extract_strided_slice %36 {offsets = [0, 0], sizes = [12, 18], strides = [1, 1]} : vector<12x20xf32> to vector<12x18xf32>
    %38 = vector.extract_strided_slice %36 {offsets = [0, 1], sizes = [12, 18], strides = [1, 1]} : vector<12x20xf32> to vector<12x18xf32>
    %39 = vector.extract_strided_slice %36 {offsets = [0, 2], sizes = [12, 18], strides = [1, 1]} : vector<12x20xf32> to vector<12x18xf32>
    %c0_60 = arith.constant 0 : index
    %c0_61 = arith.constant 0 : index
    %c15 = arith.constant 15 : index
    %c0_62 = arith.constant 0 : index
    %40 = vector.load %arg17[%c0_60, %c0_61, %c15, %c0_62] : memref<2x4x20x20xf32, #tpu.memory_space<vmem>>, vector<1x4x3x20xf32>
    %41 = vector.shape_cast %40 : vector<1x4x3x20xf32> to vector<4x3x20xf32>
    %42 = vector.extract_strided_slice %41 {offsets = [0, 0, 0], sizes = [1, 3, 20], strides = [1, 1, 1]} : vector<4x3x20xf32> to vector<1x3x20xf32>
    %43 = vector.shape_cast %42 : vector<1x3x20xf32> to vector<3x20xf32>
    %44 = vector.extract_strided_slice %41 {offsets = [1, 0, 0], sizes = [1, 3, 20], strides = [1, 1, 1]} : vector<4x3x20xf32> to vector<1x3x20xf32>
    %45 = vector.shape_cast %44 : vector<1x3x20xf32> to vector<3x20xf32>
    %46 = vector.extract_strided_slice %41 {offsets = [2, 0, 0], sizes = [1, 3, 20], strides = [1, 1, 1]} : vector<4x3x20xf32> to vector<1x3x20xf32>
    %47 = vector.shape_cast %46 : vector<1x3x20xf32> to vector<3x20xf32>
    %48 = vector.extract_strided_slice %41 {offsets = [3, 0, 0], sizes = [1, 3, 20], strides = [1, 1, 1]} : vector<4x3x20xf32> to vector<1x3x20xf32>
    %49 = vector.shape_cast %48 : vector<1x3x20xf32> to vector<3x20xf32>
    %50 = tpu.concatenate %43, %45, %47, %49 in 0 : vector<3x20xf32>, vector<3x20xf32>, vector<3x20xf32>, vector<3x20xf32> -> vector<12x20xf32>
    %51 = vector.extract_strided_slice %50 {offsets = [0, 0], sizes = [12, 18], strides = [1, 1]} : vector<12x20xf32> to vector<12x18xf32>
    %52 = vector.extract_strided_slice %50 {offsets = [0, 1], sizes = [12, 18], strides = [1, 1]} : vector<12x20xf32> to vector<12x18xf32>
    %53 = vector.extract_strided_slice %50 {offsets = [0, 2], sizes = [12, 18], strides = [1, 1]} : vector<12x20xf32> to vector<12x18xf32>
    %54 = tpu.concatenate %37, %38, %39, %51, %52, %53 in 0 : vector<12x18xf32>, vector<12x18xf32>, vector<12x18xf32>, vector<12x18xf32>, vector<12x18xf32>, vector<12x18xf32> -> vector<72x18xf32>
    %c1 = arith.constant 1 : index
    %c0_63 = arith.constant 0 : index
    %c2_64 = arith.constant 2 : index
    %c0_65 = arith.constant 0 : index
    %55 = vector.load %arg17[%c1, %c0_63, %c2_64, %c0_65] : memref<2x4x20x20xf32, #tpu.memory_space<vmem>>, vector<1x4x3x20xf32>
    %56 = vector.shape_cast %55 : vector<1x4x3x20xf32> to vector<4x3x20xf32>
    %57 = vector.extract_strided_slice %56 {offsets = [0, 0, 0], sizes = [1, 3, 20], strides = [1, 1, 1]} : vector<4x3x20xf32> to vector<1x3x20xf32>
    %58 = vector.shape_cast %57 : vector<1x3x20xf32> to vector<3x20xf32>
    %59 = vector.extract_strided_slice %56 {offsets = [1, 0, 0], sizes = [1, 3, 20], strides = [1, 1, 1]} : vector<4x3x20xf32> to vector<1x3x20xf32>
    %60 = vector.shape_cast %59 : vector<1x3x20xf32> to vector<3x20xf32>
    %61 = vector.extract_strided_slice %56 {offsets = [2, 0, 0], sizes = [1, 3, 20], strides = [1, 1, 1]} : vector<4x3x20xf32> to vector<1x3x20xf32>
    %62 = vector.shape_cast %61 : vector<1x3x20xf32> to vector<3x20xf32>
    %63 = vector.extract_strided_slice %56 {offsets = [3, 0, 0], sizes = [1, 3, 20], strides = [1, 1, 1]} : vector<4x3x20xf32> to vector<1x3x20xf32>
    %64 = vector.shape_cast %63 : vector<1x3x20xf32> to vector<3x20xf32>
    %65 = tpu.concatenate %58, %60, %62, %64 in 0 : vector<3x20xf32>, vector<3x20xf32>, vector<3x20xf32>, vector<3x20xf32> -> vector<12x20xf32>
    %66 = vector.extract_strided_slice %65 {offsets = [0, 0], sizes = [12, 18], strides = [1, 1]} : vector<12x20xf32> to vector<12x18xf32>
    %67 = vector.extract_strided_slice %65 {offsets = [0, 1], sizes = [12, 18], strides = [1, 1]} : vector<12x20xf32> to vector<12x18xf32>
    %68 = vector.extract_strided_slice %65 {offsets = [0, 2], sizes = [12, 18], strides = [1, 1]} : vector<12x20xf32> to vector<12x18xf32>
    %c1_66 = arith.constant 1 : index
    %c0_67 = arith.constant 0 : index
    %c15_68 = arith.constant 15 : index
    %c0_69 = arith.constant 0 : index
    %69 = vector.load %arg17[%c1_66, %c0_67, %c15_68, %c0_69] : memref<2x4x20x20xf32, #tpu.memory_space<vmem>>, vector<1x4x3x20xf32>
    %70 = vector.shape_cast %69 : vector<1x4x3x20xf32> to vector<4x3x20xf32>
    %71 = vector.extract_strided_slice %70 {offsets = [0, 0, 0], sizes = [1, 3, 20], strides = [1, 1, 1]} : vector<4x3x20xf32> to vector<1x3x20xf32>
    %72 = vector.shape_cast %71 : vector<1x3x20xf32> to vector<3x20xf32>
    %73 = vector.extract_strided_slice %70 {offsets = [1, 0, 0], sizes = [1, 3, 20], strides = [1, 1, 1]} : vector<4x3x20xf32> to vector<1x3x20xf32>
    %74 = vector.shape_cast %73 : vector<1x3x20xf32> to vector<3x20xf32>
    %75 = vector.extract_strided_slice %70 {offsets = [2, 0, 0], sizes = [1, 3, 20], strides = [1, 1, 1]} : vector<4x3x20xf32> to vector<1x3x20xf32>
    %76 = vector.shape_cast %75 : vector<1x3x20xf32> to vector<3x20xf32>
    %77 = vector.extract_strided_slice %70 {offsets = [3, 0, 0], sizes = [1, 3, 20], strides = [1, 1, 1]} : vector<4x3x20xf32> to vector<1x3x20xf32>
    %78 = vector.shape_cast %77 : vector<1x3x20xf32> to vector<3x20xf32>
    %79 = tpu.concatenate %72, %74, %76, %78 in 0 : vector<3x20xf32>, vector<3x20xf32>, vector<3x20xf32>, vector<3x20xf32> -> vector<12x20xf32>
    %80 = vector.extract_strided_slice %79 {offsets = [0, 0], sizes = [12, 18], strides = [1, 1]} : vector<12x20xf32> to vector<12x18xf32>
    %81 = vector.extract_strided_slice %79 {offsets = [0, 1], sizes = [12, 18], strides = [1, 1]} : vector<12x20xf32> to vector<12x18xf32>
    %82 = vector.extract_strided_slice %79 {offsets = [0, 2], sizes = [12, 18], strides = [1, 1]} : vector<12x20xf32> to vector<12x18xf32>
    %83 = tpu.concatenate %66, %67, %68, %80, %81, %82 in 0 : vector<12x18xf32>, vector<12x18xf32>, vector<12x18xf32>, vector<12x18xf32>, vector<12x18xf32>, vector<12x18xf32> -> vector<72x18xf32>
    %84 = tpu.concatenate %54, %83 in 1 : vector<72x18xf32>, vector<72x18xf32> -> vector<72x36xf32>
    %cst_70 = arith.constant dense<0.000000e+00> : vector<16x36xf32>
    %85 = tpu.matmul %10, %84, %cst_70 {dimension_numbers = #tpu.dot_dimension_numbers<[1], [0], [0], [1], [0, 0, 1, 1], [], []>} : vector<16x72xf32>, vector<72x36xf32>, vector<16x36xf32> -> vector<16x36xf32>
    %86 = vector.broadcast %11 : vector<16x1xf32> to vector<16x36xf32>
    %87 = arith.addf %85, %86 : vector<16x36xf32>
    %cst_71 = arith.constant 0.000000e+00 : f32
    %88 = vector.broadcast %cst_71 : f32 to vector<16x36xf32>
    %89 = arith.maximumf %87, %88 : vector<16x36xf32>
    %cst_72 = arith.constant dense<0.000000e+00> : vector<16x36xf32>
    %90 = tpu.matmul %12, %89, %cst_72 {dimension_numbers = #tpu.dot_dimension_numbers<[1], [0], [0], [1], [0, 0, 1, 1], [], []>} : vector<16x16xf32>, vector<16x36xf32>, vector<16x36xf32> -> vector<16x36xf32>
    %91 = vector.broadcast %13 : vector<16x1xf32> to vector<16x36xf32>
    %92 = arith.addf %90, %91 : vector<16x36xf32>
    %cst_73 = arith.constant 0.000000e+00 : f32
    %93 = vector.broadcast %cst_73 : f32 to vector<16x36xf32>
    %94 = arith.maximumf %92, %93 : vector<16x36xf32>
    %95 = vector.extract_strided_slice %94 {offsets = [0, 0], sizes = [8, 36], strides = [1, 1]} : vector<16x36xf32> to vector<8x36xf32>
    %96 = vector.broadcast %14 : vector<8x1xf32> to vector<8x36xf32>
    %97 = arith.mulf %95, %96 : vector<8x36xf32>
    %cst_74 = arith.constant dense<0.000000e+00> : vector<36xf32>
    %98 = vector.multi_reduction <add>, %97, %cst_74 [0] : vector<8x36xf32> to vector<36xf32>
    %99 = vector.shape_cast %98 : vector<36xf32> to vector<1x36xf32>
    %100 = vector.broadcast %16 : vector<1x1xf32> to vector<1x36xf32>
    %101 = arith.addf %99, %100 : vector<1x36xf32>
    %cst_75 = arith.constant 0.000000e+00 : f32
    %102 = vector.broadcast %cst_75 : f32 to vector<1x36xf32>
    %103 = arith.maximumf %101, %102 : vector<1x36xf32>
    %104 = vector.extract_strided_slice %94 {offsets = [8, 0], sizes = [8, 36], strides = [1, 1]} : vector<16x36xf32> to vector<8x36xf32>
    %105 = vector.broadcast %15 : vector<8x1xf32> to vector<8x36xf32>
    %106 = arith.mulf %104, %105 : vector<8x36xf32>
    %cst_76 = arith.constant dense<0.000000e+00> : vector<36xf32>
    %107 = vector.multi_reduction <add>, %106, %cst_76 [0] : vector<8x36xf32> to vector<36xf32>
    %108 = vector.shape_cast %107 : vector<36xf32> to vector<1x36xf32>
    %109 = vector.broadcast %17 : vector<1x1xf32> to vector<1x36xf32>
    %110 = arith.addf %108, %109 : vector<1x36xf32>
    %cst_77 = arith.constant 0.000000e+00 : f32
    %111 = vector.broadcast %cst_77 : f32 to vector<1x36xf32>
    %112 = arith.maximumf %110, %111 : vector<1x36xf32>
    %113 = vector.extract_strided_slice %103 {offsets = [0, 0], sizes = [1, 18], strides = [1, 1]} : vector<1x36xf32> to vector<1x18xf32>
    %114 = vector.shape_cast %113 : vector<1x18xf32> to vector<1x1x1x18xf32>
    %115 = vector.shape_cast %114 : vector<1x1x1x18xf32> to vector<1x1x1x18xf32>
    %116 = vector.broadcast %115 : vector<1x1x1x18xf32> to vector<1x4x1x18xf32>
    %c0_78 = arith.constant 0 : index
    %c0_79 = arith.constant 0 : index
    %c1_80 = arith.constant 1 : index
    %c1_81 = arith.constant 1 : index
    %117 = vector.load %arg17[%c0_78, %c0_79, %c1_80, %c1_81] : memref<2x4x20x20xf32, #tpu.memory_space<vmem>>, vector<1x4x1x18xf32>
    tpu.vector_store %arg17[%c0_78, %c0_79, %c1_80, %c1_81], %116 {strides = array<i32>} : memref<2x4x20x20xf32, #tpu.memory_space<vmem>>, vector<1x4x1x18xf32>,
    %118 = vector.extract_strided_slice %112 {offsets = [0, 0], sizes = [1, 18], strides = [1, 1]} : vector<1x36xf32> to vector<1x18xf32>
    %119 = vector.shape_cast %118 : vector<1x18xf32> to vector<1x1x1x18xf32>
    %120 = vector.shape_cast %119 : vector<1x1x1x18xf32> to vector<1x1x1x18xf32>
    %121 = vector.broadcast %120 : vector<1x1x1x18xf32> to vector<1x4x1x18xf32>
    %c0_82 = arith.constant 0 : index
    %c0_83 = arith.constant 0 : index
    %c18_84 = arith.constant 18 : index
    %c1_85 = arith.constant 1 : index
    %122 = vector.load %arg17[%c0_82, %c0_83, %c18_84, %c1_85] : memref<2x4x20x20xf32, #tpu.memory_space<vmem>>, vector<1x4x1x18xf32>
    tpu.vector_store %arg17[%c0_82, %c0_83, %c18_84, %c1_85], %121 {strides = array<i32>} : memref<2x4x20x20xf32, #tpu.memory_space<vmem>>, vector<1x4x1x18xf32>,
    %123 = vector.extract_strided_slice %103 {offsets = [0, 18], sizes = [1, 18], strides = [1, 1]} : vector<1x36xf32> to vector<1x18xf32>
    %124 = vector.shape_cast %123 : vector<1x18xf32> to vector<1x1x1x18xf32>
    %125 = vector.shape_cast %124 : vector<1x1x1x18xf32> to vector<1x1x1x18xf32>
    %126 = vector.broadcast %125 : vector<1x1x1x18xf32> to vector<1x4x1x18xf32>
    %c1_86 = arith.constant 1 : index
    %c0_87 = arith.constant 0 : index
    %c1_88 = arith.constant 1 : index
    %c1_89 = arith.constant 1 : index
    %127 = vector.load %arg17[%c1_86, %c0_87, %c1_88, %c1_89] : memref<2x4x20x20xf32, #tpu.memory_space<vmem>>, vector<1x4x1x18xf32>
    tpu.vector_store %arg17[%c1_86, %c0_87, %c1_88, %c1_89], %126 {strides = array<i32>} : memref<2x4x20x20xf32, #tpu.memory_space<vmem>>, vector<1x4x1x18xf32>,
    %128 = vector.extract_strided_slice %112 {offsets = [0, 18], sizes = [1, 18], strides = [1, 1]} : vector<1x36xf32> to vector<1x18xf32>
    %129 = vector.shape_cast %128 : vector<1x18xf32> to vector<1x1x1x18xf32>
    %130 = vector.shape_cast %129 : vector<1x1x1x18xf32> to vector<1x1x1x18xf32>
    %131 = vector.broadcast %130 : vector<1x1x1x18xf32> to vector<1x4x1x18xf32>
    %c1_90 = arith.constant 1 : index
    %c0_91 = arith.constant 0 : index
    %c18_92 = arith.constant 18 : index
    %c1_93 = arith.constant 1 : index
    %132 = vector.load %arg17[%c1_90, %c0_91, %c18_92, %c1_93] : memref<2x4x20x20xf32, #tpu.memory_space<vmem>>, vector<1x4x1x18xf32>
    tpu.vector_store %arg17[%c1_90, %c0_91, %c18_92, %c1_93], %131 {strides = array<i32>} : memref<2x4x20x20xf32, #tpu.memory_space<vmem>>, vector<1x4x1x18xf32>,
    %c0_94 = arith.constant 0 : index
    %c0_95 = arith.constant 0 : index
    %c0_96 = arith.constant 0 : index
    %c2_97 = arith.constant 2 : index
    %133 = vector.load %arg17[%c0_94, %c0_95, %c0_96, %c2_97] : memref<2x4x20x20xf32, #tpu.memory_space<vmem>>, vector<1x4x20x3xf32>
    %134 = vector.shape_cast %133 : vector<1x4x20x3xf32> to vector<4x20x3xf32>
    %135 = vector.extract_strided_slice %134 {offsets = [0, 0, 0], sizes = [1, 20, 3], strides = [1, 1, 1]} : vector<4x20x3xf32> to vector<1x20x3xf32>
    %136 = vector.shape_cast %135 : vector<1x20x3xf32> to vector<20x3xf32>
    %137 = vector.extract_strided_slice %134 {offsets = [1, 0, 0], sizes = [1, 20, 3], strides = [1, 1, 1]} : vector<4x20x3xf32> to vector<1x20x3xf32>
    %138 = vector.shape_cast %137 : vector<1x20x3xf32> to vector<20x3xf32>
    %139 = vector.extract_strided_slice %134 {offsets = [2, 0, 0], sizes = [1, 20, 3], strides = [1, 1, 1]} : vector<4x20x3xf32> to vector<1x20x3xf32>
    %140 = vector.shape_cast %139 : vector<1x20x3xf32> to vector<20x3xf32>
    %141 = vector.extract_strided_slice %134 {offsets = [3, 0, 0], sizes = [1, 20, 3], strides = [1, 1, 1]} : vector<4x20x3xf32> to vector<1x20x3xf32>
    %142 = vector.shape_cast %141 : vector<1x20x3xf32> to vector<20x3xf32>
    %143 = tpu.concatenate %136, %138, %140, %142 in 1 : vector<20x3xf32>, vector<20x3xf32>, vector<20x3xf32>, vector<20x3xf32> -> vector<20x12xf32>
    %144 = vector.extract_strided_slice %143 {offsets = [0, 0], sizes = [18, 12], strides = [1, 1]} : vector<20x12xf32> to vector<18x12xf32>
    %145 = vector.extract_strided_slice %143 {offsets = [1, 0], sizes = [18, 12], strides = [1, 1]} : vector<20x12xf32> to vector<18x12xf32>
    %146 = vector.extract_strided_slice %143 {offsets = [2, 0], sizes = [18, 12], strides = [1, 1]} : vector<20x12xf32> to vector<18x12xf32>
    %c0_98 = arith.constant 0 : index
    %c0_99 = arith.constant 0 : index
    %c0_100 = arith.constant 0 : index
    %c15_101 = arith.constant 15 : index
    %147 = vector.load %arg17[%c0_98, %c0_99, %c0_100, %c15_101] : memref<2x4x20x20xf32, #tpu.memory_space<vmem>>, vector<1x4x20x3xf32>
    %148 = vector.shape_cast %147 : vector<1x4x20x3xf32> to vector<4x20x3xf32>
    %149 = vector.extract_strided_slice %148 {offsets = [0, 0, 0], sizes = [1, 20, 3], strides = [1, 1, 1]} : vector<4x20x3xf32> to vector<1x20x3xf32>
    %150 = vector.shape_cast %149 : vector<1x20x3xf32> to vector<20x3xf32>
    %151 = vector.extract_strided_slice %148 {offsets = [1, 0, 0], sizes = [1, 20, 3], strides = [1, 1, 1]} : vector<4x20x3xf32> to vector<1x20x3xf32>
    %152 = vector.shape_cast %151 : vector<1x20x3xf32> to vector<20x3xf32>
    %153 = vector.extract_strided_slice %148 {offsets = [2, 0, 0], sizes = [1, 20, 3], strides = [1, 1, 1]} : vector<4x20x3xf32> to vector<1x20x3xf32>
    %154 = vector.shape_cast %153 : vector<1x20x3xf32> to vector<20x3xf32>
    %155 = vector.extract_strided_slice %148 {offsets = [3, 0, 0], sizes = [1, 20, 3], strides = [1, 1, 1]} : vector<4x20x3xf32> to vector<1x20x3xf32>
    %156 = vector.shape_cast %155 : vector<1x20x3xf32> to vector<20x3xf32>
    %157 = tpu.concatenate %150, %152, %154, %156 in 1 : vector<20x3xf32>, vector<20x3xf32>, vector<20x3xf32>, vector<20x3xf32> -> vector<20x12xf32>
    %158 = vector.extract_strided_slice %157 {offsets = [0, 0], sizes = [18, 12], strides = [1, 1]} : vector<20x12xf32> to vector<18x12xf32>
    %159 = vector.extract_strided_slice %157 {offsets = [1, 0], sizes = [18, 12], strides = [1, 1]} : vector<20x12xf32> to vector<18x12xf32>
    %160 = vector.extract_strided_slice %157 {offsets = [2, 0], sizes = [18, 12], strides = [1, 1]} : vector<20x12xf32> to vector<18x12xf32>
    %161 = tpu.concatenate %144, %145, %146, %158, %159, %160 in 1 : vector<18x12xf32>, vector<18x12xf32>, vector<18x12xf32>, vector<18x12xf32>, vector<18x12xf32>, vector<18x12xf32> -> vector<18x72xf32>
    %c1_102 = arith.constant 1 : index
    %c0_103 = arith.constant 0 : index
    %c0_104 = arith.constant 0 : index
    %c2_105 = arith.constant 2 : index
    %162 = vector.load %arg17[%c1_102, %c0_103, %c0_104, %c2_105] : memref<2x4x20x20xf32, #tpu.memory_space<vmem>>, vector<1x4x20x3xf32>
    %163 = vector.shape_cast %162 : vector<1x4x20x3xf32> to vector<4x20x3xf32>
    %164 = vector.extract_strided_slice %163 {offsets = [0, 0, 0], sizes = [1, 20, 3], strides = [1, 1, 1]} : vector<4x20x3xf32> to vector<1x20x3xf32>
    %165 = vector.shape_cast %164 : vector<1x20x3xf32> to vector<20x3xf32>
    %166 = vector.extract_strided_slice %163 {offsets = [1, 0, 0], sizes = [1, 20, 3], strides = [1, 1, 1]} : vector<4x20x3xf32> to vector<1x20x3xf32>
    %167 = vector.shape_cast %166 : vector<1x20x3xf32> to vector<20x3xf32>
    %168 = vector.extract_strided_slice %163 {offsets = [2, 0, 0], sizes = [1, 20, 3], strides = [1, 1, 1]} : vector<4x20x3xf32> to vector<1x20x3xf32>
    %169 = vector.shape_cast %168 : vector<1x20x3xf32> to vector<20x3xf32>
    %170 = vector.extract_strided_slice %163 {offsets = [3, 0, 0], sizes = [1, 20, 3], strides = [1, 1, 1]} : vector<4x20x3xf32> to vector<1x20x3xf32>
    %171 = vector.shape_cast %170 : vector<1x20x3xf32> to vector<20x3xf32>
    %172 = tpu.concatenate %165, %167, %169, %171 in 1 : vector<20x3xf32>, vector<20x3xf32>, vector<20x3xf32>, vector<20x3xf32> -> vector<20x12xf32>
    %173 = vector.extract_strided_slice %172 {offsets = [0, 0], sizes = [18, 12], strides = [1, 1]} : vector<20x12xf32> to vector<18x12xf32>
    %174 = vector.extract_strided_slice %172 {offsets = [1, 0], sizes = [18, 12], strides = [1, 1]} : vector<20x12xf32> to vector<18x12xf32>
    %175 = vector.extract_strided_slice %172 {offsets = [2, 0], sizes = [18, 12], strides = [1, 1]} : vector<20x12xf32> to vector<18x12xf32>
    %c1_106 = arith.constant 1 : index
    %c0_107 = arith.constant 0 : index
    %c0_108 = arith.constant 0 : index
    %c15_109 = arith.constant 15 : index
    %176 = vector.load %arg17[%c1_106, %c0_107, %c0_108, %c15_109] : memref<2x4x20x20xf32, #tpu.memory_space<vmem>>, vector<1x4x20x3xf32>
    %177 = vector.shape_cast %176 : vector<1x4x20x3xf32> to vector<4x20x3xf32>
    %178 = vector.extract_strided_slice %177 {offsets = [0, 0, 0], sizes = [1, 20, 3], strides = [1, 1, 1]} : vector<4x20x3xf32> to vector<1x20x3xf32>
    %179 = vector.shape_cast %178 : vector<1x20x3xf32> to vector<20x3xf32>
    %180 = vector.extract_strided_slice %177 {offsets = [1, 0, 0], sizes = [1, 20, 3], strides = [1, 1, 1]} : vector<4x20x3xf32> to vector<1x20x3xf32>
    %181 = vector.shape_cast %180 : vector<1x20x3xf32> to vector<20x3xf32>
    %182 = vector.extract_strided_slice %177 {offsets = [2, 0, 0], sizes = [1, 20, 3], strides = [1, 1, 1]} : vector<4x20x3xf32> to vector<1x20x3xf32>
    %183 = vector.shape_cast %182 : vector<1x20x3xf32> to vector<20x3xf32>
    %184 = vector.extract_strided_slice %177 {offsets = [3, 0, 0], sizes = [1, 20, 3], strides = [1, 1, 1]} : vector<4x20x3xf32> to vector<1x20x3xf32>
    %185 = vector.shape_cast %184 : vector<1x20x3xf32> to vector<20x3xf32>
    %186 = tpu.concatenate %179, %181, %183, %185 in 1 : vector<20x3xf32>, vector<20x3xf32>, vector<20x3xf32>, vector<20x3xf32> -> vector<20x12xf32>
    %187 = vector.extract_strided_slice %186 {offsets = [0, 0], sizes = [18, 12], strides = [1, 1]} : vector<20x12xf32> to vector<18x12xf32>
    %188 = vector.extract_strided_slice %186 {offsets = [1, 0], sizes = [18, 12], strides = [1, 1]} : vector<20x12xf32> to vector<18x12xf32>
    %189 = vector.extract_strided_slice %186 {offsets = [2, 0], sizes = [18, 12], strides = [1, 1]} : vector<20x12xf32> to vector<18x12xf32>
    %190 = tpu.concatenate %173, %174, %175, %187, %188, %189 in 1 : vector<18x12xf32>, vector<18x12xf32>, vector<18x12xf32>, vector<18x12xf32>, vector<18x12xf32>, vector<18x12xf32> -> vector<18x72xf32>
    %191 = tpu.concatenate %161, %190 in 0 : vector<18x72xf32>, vector<18x72xf32> -> vector<36x72xf32>
    %cst_110 = arith.constant dense<0.000000e+00> : vector<36x16xf32>
    %192 = tpu.matmul %191, %18, %cst_110 {dimension_numbers = #tpu.dot_dimension_numbers<[1], [0], [0], [1], [0, 0, 1, 1], [], []>} : vector<36x72xf32>, vector<72x16xf32>, vector<36x16xf32> -> vector<36x16xf32>
    %193 = vector.broadcast %19 : vector<1x16xf32> to vector<36x16xf32>
    %194 = arith.addf %192, %193 : vector<36x16xf32>
    %cst_111 = arith.constant 0.000000e+00 : f32
    %195 = vector.broadcast %cst_111 : f32 to vector<36x16xf32>
    %196 = arith.maximumf %194, %195 : vector<36x16xf32>
    %cst_112 = arith.constant dense<0.000000e+00> : vector<36x16xf32>
    %197 = tpu.matmul %196, %20, %cst_112 {dimension_numbers = #tpu.dot_dimension_numbers<[1], [0], [0], [1], [0, 0, 1, 1], [], []>} : vector<36x16xf32>, vector<16x16xf32>, vector<36x16xf32> -> vector<36x16xf32>
    %198 = vector.broadcast %21 : vector<1x16xf32> to vector<36x16xf32>
    %199 = arith.addf %197, %198 : vector<36x16xf32>
    %cst_113 = arith.constant 0.000000e+00 : f32
    %200 = vector.broadcast %cst_113 : f32 to vector<36x16xf32>
    %201 = arith.maximumf %199, %200 : vector<36x16xf32>
    %202 = vector.extract_strided_slice %201 {offsets = [0, 0], sizes = [36, 8], strides = [1, 1]} : vector<36x16xf32> to vector<36x8xf32>
    %203 = vector.broadcast %22 : vector<1x8xf32> to vector<36x8xf32>
    %204 = arith.mulf %202, %203 : vector<36x8xf32>
    %cst_114 = arith.constant dense<0.000000e+00> : vector<36xf32>
    %205 = vector.multi_reduction <add>, %204, %cst_114 [1] : vector<36x8xf32> to vector<36xf32>
    %206 = vector.shape_cast %205 : vector<36xf32> to vector<36x1xf32>
    %207 = vector.broadcast %24 : vector<1x1xf32> to vector<36x1xf32>
    %208 = arith.addf %206, %207 : vector<36x1xf32>
    %cst_115 = arith.constant 0.000000e+00 : f32
    %209 = vector.broadcast %cst_115 : f32 to vector<36x1xf32>
    %210 = arith.maximumf %208, %209 : vector<36x1xf32>
    %211 = vector.extract_strided_slice %201 {offsets = [0, 8], sizes = [36, 8], strides = [1, 1]} : vector<36x16xf32> to vector<36x8xf32>
    %212 = vector.broadcast %23 : vector<1x8xf32> to vector<36x8xf32>
    %213 = arith.mulf %211, %212 : vector<36x8xf32>
    %cst_116 = arith.constant dense<0.000000e+00> : vector<36xf32>
    %214 = vector.multi_reduction <add>, %213, %cst_116 [1] : vector<36x8xf32> to vector<36xf32>
    %215 = vector.shape_cast %214 : vector<36xf32> to vector<36x1xf32>
    %216 = vector.broadcast %25 : vector<1x1xf32> to vector<36x1xf32>
    %217 = arith.addf %215, %216 : vector<36x1xf32>
    %cst_117 = arith.constant 0.000000e+00 : f32
    %218 = vector.broadcast %cst_117 : f32 to vector<36x1xf32>
    %219 = arith.maximumf %217, %218 : vector<36x1xf32>
    %220 = vector.extract_strided_slice %210 {offsets = [0, 0], sizes = [18, 1], strides = [1, 1]} : vector<36x1xf32> to vector<18x1xf32>
    %221 = vector.shape_cast %220 : vector<18x1xf32> to vector<1x1x18x1xf32>
    %222 = vector.shape_cast %221 : vector<1x1x18x1xf32> to vector<1x1x18x1xf32>
    %223 = vector.broadcast %222 : vector<1x1x18x1xf32> to vector<1x4x18x1xf32>
    %c0_118 = arith.constant 0 : index
    %c0_119 = arith.constant 0 : index
    %c1_120 = arith.constant 1 : index
    %c1_121 = arith.constant 1 : index
    %224 = vector.load %arg17[%c0_118, %c0_119, %c1_120, %c1_121] : memref<2x4x20x20xf32, #tpu.memory_space<vmem>>, vector<1x4x18x1xf32>
    tpu.vector_store %arg17[%c0_118, %c0_119, %c1_120, %c1_121], %223 {strides = array<i32>} : memref<2x4x20x20xf32, #tpu.memory_space<vmem>>, vector<1x4x18x1xf32>,
    %225 = vector.extract_strided_slice %219 {offsets = [0, 0], sizes = [18, 1], strides = [1, 1]} : vector<36x1xf32> to vector<18x1xf32>
    %226 = vector.shape_cast %225 : vector<18x1xf32> to vector<1x1x18x1xf32>
    %227 = vector.shape_cast %226 : vector<1x1x18x1xf32> to vector<1x1x18x1xf32>
    %228 = vector.broadcast %227 : vector<1x1x18x1xf32> to vector<1x4x18x1xf32>
    %c0_122 = arith.constant 0 : index
    %c0_123 = arith.constant 0 : index
    %c1_124 = arith.constant 1 : index
    %c18_125 = arith.constant 18 : index
    %229 = vector.load %arg17[%c0_122, %c0_123, %c1_124, %c18_125] : memref<2x4x20x20xf32, #tpu.memory_space<vmem>>, vector<1x4x18x1xf32>
    tpu.vector_store %arg17[%c0_122, %c0_123, %c1_124, %c18_125], %228 {strides = array<i32>} : memref<2x4x20x20xf32, #tpu.memory_space<vmem>>, vector<1x4x18x1xf32>,
    %230 = vector.extract_strided_slice %210 {offsets = [18, 0], sizes = [18, 1], strides = [1, 1]} : vector<36x1xf32> to vector<18x1xf32>
    %231 = vector.shape_cast %230 : vector<18x1xf32> to vector<1x1x18x1xf32>
    %232 = vector.shape_cast %231 : vector<1x1x18x1xf32> to vector<1x1x18x1xf32>
    %233 = vector.broadcast %232 : vector<1x1x18x1xf32> to vector<1x4x18x1xf32>
    %c1_126 = arith.constant 1 : index
    %c0_127 = arith.constant 0 : index
    %c1_128 = arith.constant 1 : index
    %c1_129 = arith.constant 1 : index
    %234 = vector.load %arg17[%c1_126, %c0_127, %c1_128, %c1_129] : memref<2x4x20x20xf32, #tpu.memory_space<vmem>>, vector<1x4x18x1xf32>
    tpu.vector_store %arg17[%c1_126, %c0_127, %c1_128, %c1_129], %233 {strides = array<i32>} : memref<2x4x20x20xf32, #tpu.memory_space<vmem>>, vector<1x4x18x1xf32>,
    %235 = vector.extract_strided_slice %219 {offsets = [18, 0], sizes = [18, 1], strides = [1, 1]} : vector<36x1xf32> to vector<18x1xf32>
    %236 = vector.shape_cast %235 : vector<18x1xf32> to vector<1x1x18x1xf32>
    %237 = vector.shape_cast %236 : vector<1x1x18x1xf32> to vector<1x1x18x1xf32>
    %238 = vector.broadcast %237 : vector<1x1x18x1xf32> to vector<1x4x18x1xf32>
    %c1_130 = arith.constant 1 : index
    %c0_131 = arith.constant 0 : index
    %c1_132 = arith.constant 1 : index
    %c18_133 = arith.constant 18 : index
    %239 = vector.load %arg17[%c1_130, %c0_131, %c1_132, %c18_133] : memref<2x4x20x20xf32, #tpu.memory_space<vmem>>, vector<1x4x18x1xf32>
    tpu.vector_store %arg17[%c1_130, %c0_131, %c1_132, %c18_133], %238 {strides = array<i32>} : memref<2x4x20x20xf32, #tpu.memory_space<vmem>>, vector<1x4x18x1xf32>,
    %c0_134 = arith.constant 0 : index
    %c0_135 = arith.constant 0 : index
    %c1_136 = arith.constant 1 : index
    %c0_137 = arith.constant 0 : index
    %240 = vector.load %arg17[%c0_134, %c0_135, %c1_136, %c0_137] : memref<2x4x20x20xf32, #tpu.memory_space<vmem>>, vector<1x4x3x20xf32>
    %241 = vector.shape_cast %240 : vector<1x4x3x20xf32> to vector<4x3x20xf32>
    %242 = vector.extract_strided_slice %241 {offsets = [0, 0, 0], sizes = [1, 3, 20], strides = [1, 1, 1]} : vector<4x3x20xf32> to vector<1x3x20xf32>
    %243 = vector.shape_cast %242 : vector<1x3x20xf32> to vector<3x20xf32>
    %244 = vector.extract_strided_slice %241 {offsets = [1, 0, 0], sizes = [1, 3, 20], strides = [1, 1, 1]} : vector<4x3x20xf32> to vector<1x3x20xf32>
    %245 = vector.shape_cast %244 : vector<1x3x20xf32> to vector<3x20xf32>
    %246 = vector.extract_strided_slice %241 {offsets = [2, 0, 0], sizes = [1, 3, 20], strides = [1, 1, 1]} : vector<4x3x20xf32> to vector<1x3x20xf32>
    %247 = vector.shape_cast %246 : vector<1x3x20xf32> to vector<3x20xf32>
    %248 = vector.extract_strided_slice %241 {offsets = [3, 0, 0], sizes = [1, 3, 20], strides = [1, 1, 1]} : vector<4x3x20xf32> to vector<1x3x20xf32>
    %249 = vector.shape_cast %248 : vector<1x3x20xf32> to vector<3x20xf32>
    %250 = tpu.concatenate %243, %245, %247, %249 in 0 : vector<3x20xf32>, vector<3x20xf32>, vector<3x20xf32>, vector<3x20xf32> -> vector<12x20xf32>
    %251 = vector.extract_strided_slice %250 {offsets = [0, 0], sizes = [12, 18], strides = [1, 1]} : vector<12x20xf32> to vector<12x18xf32>
    %252 = vector.extract_strided_slice %250 {offsets = [0, 1], sizes = [12, 18], strides = [1, 1]} : vector<12x20xf32> to vector<12x18xf32>
    %253 = vector.extract_strided_slice %250 {offsets = [0, 2], sizes = [12, 18], strides = [1, 1]} : vector<12x20xf32> to vector<12x18xf32>
    %c0_138 = arith.constant 0 : index
    %c0_139 = arith.constant 0 : index
    %c16 = arith.constant 16 : index
    %c0_140 = arith.constant 0 : index
    %254 = vector.load %arg17[%c0_138, %c0_139, %c16, %c0_140] : memref<2x4x20x20xf32, #tpu.memory_space<vmem>>, vector<1x4x3x20xf32>
    %255 = vector.shape_cast %254 : vector<1x4x3x20xf32> to vector<4x3x20xf32>
    %256 = vector.extract_strided_slice %255 {offsets = [0, 0, 0], sizes = [1, 3, 20], strides = [1, 1, 1]} : vector<4x3x20xf32> to vector<1x3x20xf32>
    %257 = vector.shape_cast %256 : vector<1x3x20xf32> to vector<3x20xf32>
    %258 = vector.extract_strided_slice %255 {offsets = [1, 0, 0], sizes = [1, 3, 20], strides = [1, 1, 1]} : vector<4x3x20xf32> to vector<1x3x20xf32>
    %259 = vector.shape_cast %258 : vector<1x3x20xf32> to vector<3x20xf32>
    %260 = vector.extract_strided_slice %255 {offsets = [2, 0, 0], sizes = [1, 3, 20], strides = [1, 1, 1]} : vector<4x3x20xf32> to vector<1x3x20xf32>
    %261 = vector.shape_cast %260 : vector<1x3x20xf32> to vector<3x20xf32>
    %262 = vector.extract_strided_slice %255 {offsets = [3, 0, 0], sizes = [1, 3, 20], strides = [1, 1, 1]} : vector<4x3x20xf32> to vector<1x3x20xf32>
    %263 = vector.shape_cast %262 : vector<1x3x20xf32> to vector<3x20xf32>
    %264 = tpu.concatenate %257, %259, %261, %263 in 0 : vector<3x20xf32>, vector<3x20xf32>, vector<3x20xf32>, vector<3x20xf32> -> vector<12x20xf32>
    %265 = vector.extract_strided_slice %264 {offsets = [0, 0], sizes = [12, 18], strides = [1, 1]} : vector<12x20xf32> to vector<12x18xf32>
    %266 = vector.extract_strided_slice %264 {offsets = [0, 1], sizes = [12, 18], strides = [1, 1]} : vector<12x20xf32> to vector<12x18xf32>
    %267 = vector.extract_strided_slice %264 {offsets = [0, 2], sizes = [12, 18], strides = [1, 1]} : vector<12x20xf32> to vector<12x18xf32>
    %268 = tpu.concatenate %251, %252, %253, %265, %266, %267 in 0 : vector<12x18xf32>, vector<12x18xf32>, vector<12x18xf32>, vector<12x18xf32>, vector<12x18xf32>, vector<12x18xf32> -> vector<72x18xf32>
    %c1_141 = arith.constant 1 : index
    %c0_142 = arith.constant 0 : index
    %c1_143 = arith.constant 1 : index
    %c0_144 = arith.constant 0 : index
    %269 = vector.load %arg17[%c1_141, %c0_142, %c1_143, %c0_144] : memref<2x4x20x20xf32, #tpu.memory_space<vmem>>, vector<1x4x3x20xf32>
    %270 = vector.shape_cast %269 : vector<1x4x3x20xf32> to vector<4x3x20xf32>
    %271 = vector.extract_strided_slice %270 {offsets = [0, 0, 0], sizes = [1, 3, 20], strides = [1, 1, 1]} : vector<4x3x20xf32> to vector<1x3x20xf32>
    %272 = vector.shape_cast %271 : vector<1x3x20xf32> to vector<3x20xf32>
    %273 = vector.extract_strided_slice %270 {offsets = [1, 0, 0], sizes = [1, 3, 20], strides = [1, 1, 1]} : vector<4x3x20xf32> to vector<1x3x20xf32>
    %274 = vector.shape_cast %273 : vector<1x3x20xf32> to vector<3x20xf32>
    %275 = vector.extract_strided_slice %270 {offsets = [2, 0, 0], sizes = [1, 3, 20], strides = [1, 1, 1]} : vector<4x3x20xf32> to vector<1x3x20xf32>
    %276 = vector.shape_cast %275 : vector<1x3x20xf32> to vector<3x20xf32>
    %277 = vector.extract_strided_slice %270 {offsets = [3, 0, 0], sizes = [1, 3, 20], strides = [1, 1, 1]} : vector<4x3x20xf32> to vector<1x3x20xf32>
    %278 = vector.shape_cast %277 : vector<1x3x20xf32> to vector<3x20xf32>
    %279 = tpu.concatenate %272, %274, %276, %278 in 0 : vector<3x20xf32>, vector<3x20xf32>, vector<3x20xf32>, vector<3x20xf32> -> vector<12x20xf32>
    %280 = vector.extract_strided_slice %279 {offsets = [0, 0], sizes = [12, 18], strides = [1, 1]} : vector<12x20xf32> to vector<12x18xf32>
    %281 = vector.extract_strided_slice %279 {offsets = [0, 1], sizes = [12, 18], strides = [1, 1]} : vector<12x20xf32> to vector<12x18xf32>
    %282 = vector.extract_strided_slice %279 {offsets = [0, 2], sizes = [12, 18], strides = [1, 1]} : vector<12x20xf32> to vector<12x18xf32>
    %c1_145 = arith.constant 1 : index
    %c0_146 = arith.constant 0 : index
    %c16_147 = arith.constant 16 : index
    %c0_148 = arith.constant 0 : index
    %283 = vector.load %arg17[%c1_145, %c0_146, %c16_147, %c0_148] : memref<2x4x20x20xf32, #tpu.memory_space<vmem>>, vector<1x4x3x20xf32>
    %284 = vector.shape_cast %283 : vector<1x4x3x20xf32> to vector<4x3x20xf32>
    %285 = vector.extract_strided_slice %284 {offsets = [0, 0, 0], sizes = [1, 3, 20], strides = [1, 1, 1]} : vector<4x3x20xf32> to vector<1x3x20xf32>
    %286 = vector.shape_cast %285 : vector<1x3x20xf32> to vector<3x20xf32>
    %287 = vector.extract_strided_slice %284 {offsets = [1, 0, 0], sizes = [1, 3, 20], strides = [1, 1, 1]} : vector<4x3x20xf32> to vector<1x3x20xf32>
    %288 = vector.shape_cast %287 : vector<1x3x20xf32> to vector<3x20xf32>
    %289 = vector.extract_strided_slice %284 {offsets = [2, 0, 0], sizes = [1, 3, 20], strides = [1, 1, 1]} : vector<4x3x20xf32> to vector<1x3x20xf32>
    %290 = vector.shape_cast %289 : vector<1x3x20xf32> to vector<3x20xf32>
    %291 = vector.extract_strided_slice %284 {offsets = [3, 0, 0], sizes = [1, 3, 20], strides = [1, 1, 1]} : vector<4x3x20xf32> to vector<1x3x20xf32>
    %292 = vector.shape_cast %291 : vector<1x3x20xf32> to vector<3x20xf32>
    %293 = tpu.concatenate %286, %288, %290, %292 in 0 : vector<3x20xf32>, vector<3x20xf32>, vector<3x20xf32>, vector<3x20xf32> -> vector<12x20xf32>
    %294 = vector.extract_strided_slice %293 {offsets = [0, 0], sizes = [12, 18], strides = [1, 1]} : vector<12x20xf32> to vector<12x18xf32>
    %295 = vector.extract_strided_slice %293 {offsets = [0, 1], sizes = [12, 18], strides = [1, 1]} : vector<12x20xf32> to vector<12x18xf32>
    %296 = vector.extract_strided_slice %293 {offsets = [0, 2], sizes = [12, 18], strides = [1, 1]} : vector<12x20xf32> to vector<12x18xf32>
    %297 = tpu.concatenate %280, %281, %282, %294, %295, %296 in 0 : vector<12x18xf32>, vector<12x18xf32>, vector<12x18xf32>, vector<12x18xf32>, vector<12x18xf32>, vector<12x18xf32> -> vector<72x18xf32>
    %298 = tpu.concatenate %268, %297 in 1 : vector<72x18xf32>, vector<72x18xf32> -> vector<72x36xf32>
    %cst_149 = arith.constant dense<0.000000e+00> : vector<16x36xf32>
    %299 = tpu.matmul %10, %298, %cst_149 {dimension_numbers = #tpu.dot_dimension_numbers<[1], [0], [0], [1], [0, 0, 1, 1], [], []>} : vector<16x72xf32>, vector<72x36xf32>, vector<16x36xf32> -> vector<16x36xf32>
    %300 = vector.broadcast %11 : vector<16x1xf32> to vector<16x36xf32>
    %301 = arith.addf %299, %300 : vector<16x36xf32>
    %cst_150 = arith.constant 0.000000e+00 : f32
    %302 = vector.broadcast %cst_150 : f32 to vector<16x36xf32>
    %303 = arith.maximumf %301, %302 : vector<16x36xf32>
    %cst_151 = arith.constant dense<0.000000e+00> : vector<16x36xf32>
    %304 = tpu.matmul %12, %303, %cst_151 {dimension_numbers = #tpu.dot_dimension_numbers<[1], [0], [0], [1], [0, 0, 1, 1], [], []>} : vector<16x16xf32>, vector<16x36xf32>, vector<16x36xf32> -> vector<16x36xf32>
    %305 = vector.broadcast %13 : vector<16x1xf32> to vector<16x36xf32>
    %306 = arith.addf %304, %305 : vector<16x36xf32>
    %cst_152 = arith.constant 0.000000e+00 : f32
    %307 = vector.broadcast %cst_152 : f32 to vector<16x36xf32>
    %308 = arith.maximumf %306, %307 : vector<16x36xf32>
    %309 = vector.extract_strided_slice %308 {offsets = [0, 0], sizes = [8, 36], strides = [1, 1]} : vector<16x36xf32> to vector<8x36xf32>
    %310 = vector.broadcast %14 : vector<8x1xf32> to vector<8x36xf32>
    %311 = arith.mulf %309, %310 : vector<8x36xf32>
    %cst_153 = arith.constant dense<0.000000e+00> : vector<36xf32>
    %312 = vector.multi_reduction <add>, %311, %cst_153 [0] : vector<8x36xf32> to vector<36xf32>
    %313 = vector.shape_cast %312 : vector<36xf32> to vector<1x36xf32>
    %314 = vector.broadcast %16 : vector<1x1xf32> to vector<1x36xf32>
    %315 = arith.addf %313, %314 : vector<1x36xf32>
    %cst_154 = arith.constant 0.000000e+00 : f32
    %316 = vector.broadcast %cst_154 : f32 to vector<1x36xf32>
    %317 = arith.maximumf %315, %316 : vector<1x36xf32>
    %318 = vector.extract_strided_slice %308 {offsets = [8, 0], sizes = [8, 36], strides = [1, 1]} : vector<16x36xf32> to vector<8x36xf32>
    %319 = vector.broadcast %15 : vector<8x1xf32> to vector<8x36xf32>
    %320 = arith.mulf %318, %319 : vector<8x36xf32>
    %cst_155 = arith.constant dense<0.000000e+00> : vector<36xf32>
    %321 = vector.multi_reduction <add>, %320, %cst_155 [0] : vector<8x36xf32> to vector<36xf32>
    %322 = vector.shape_cast %321 : vector<36xf32> to vector<1x36xf32>
    %323 = vector.broadcast %17 : vector<1x1xf32> to vector<1x36xf32>
    %324 = arith.addf %322, %323 : vector<1x36xf32>
    %cst_156 = arith.constant 0.000000e+00 : f32
    %325 = vector.broadcast %cst_156 : f32 to vector<1x36xf32>
    %326 = arith.maximumf %324, %325 : vector<1x36xf32>
    %327 = vector.extract_strided_slice %317 {offsets = [0, 0], sizes = [1, 18], strides = [1, 1]} : vector<1x36xf32> to vector<1x18xf32>
    %328 = vector.shape_cast %327 : vector<1x18xf32> to vector<1x1x1x18xf32>
    %329 = vector.shape_cast %328 : vector<1x1x1x18xf32> to vector<1x1x1x18xf32>
    %330 = vector.broadcast %329 : vector<1x1x1x18xf32> to vector<1x4x1x18xf32>
    %c0_157 = arith.constant 0 : index
    %c0_158 = arith.constant 0 : index
    %c0_159 = arith.constant 0 : index
    %c1_160 = arith.constant 1 : index
    %331 = vector.load %arg17[%c0_157, %c0_158, %c0_159, %c1_160] : memref<2x4x20x20xf32, #tpu.memory_space<vmem>>, vector<1x4x1x18xf32>
    tpu.vector_store %arg17[%c0_157, %c0_158, %c0_159, %c1_160], %330 {strides = array<i32>} : memref<2x4x20x20xf32, #tpu.memory_space<vmem>>, vector<1x4x1x18xf32>,
    %332 = vector.extract_strided_slice %326 {offsets = [0, 0], sizes = [1, 18], strides = [1, 1]} : vector<1x36xf32> to vector<1x18xf32>
    %333 = vector.shape_cast %332 : vector<1x18xf32> to vector<1x1x1x18xf32>
    %334 = vector.shape_cast %333 : vector<1x1x1x18xf32> to vector<1x1x1x18xf32>
    %335 = vector.broadcast %334 : vector<1x1x1x18xf32> to vector<1x4x1x18xf32>
    %c0_161 = arith.constant 0 : index
    %c0_162 = arith.constant 0 : index
    %c19 = arith.constant 19 : index
    %c1_163 = arith.constant 1 : index
    %336 = vector.load %arg17[%c0_161, %c0_162, %c19, %c1_163] : memref<2x4x20x20xf32, #tpu.memory_space<vmem>>, vector<1x4x1x18xf32>
    tpu.vector_store %arg17[%c0_161, %c0_162, %c19, %c1_163], %335 {strides = array<i32>} : memref<2x4x20x20xf32, #tpu.memory_space<vmem>>, vector<1x4x1x18xf32>,
    %337 = vector.extract_strided_slice %317 {offsets = [0, 18], sizes = [1, 18], strides = [1, 1]} : vector<1x36xf32> to vector<1x18xf32>
    %338 = vector.shape_cast %337 : vector<1x18xf32> to vector<1x1x1x18xf32>
    %339 = vector.shape_cast %338 : vector<1x1x1x18xf32> to vector<1x1x1x18xf32>
    %340 = vector.broadcast %339 : vector<1x1x1x18xf32> to vector<1x4x1x18xf32>
    %c1_164 = arith.constant 1 : index
    %c0_165 = arith.constant 0 : index
    %c0_166 = arith.constant 0 : index
    %c1_167 = arith.constant 1 : index
    %341 = vector.load %arg17[%c1_164, %c0_165, %c0_166, %c1_167] : memref<2x4x20x20xf32, #tpu.memory_space<vmem>>, vector<1x4x1x18xf32>
    tpu.vector_store %arg17[%c1_164, %c0_165, %c0_166, %c1_167], %340 {strides = array<i32>} : memref<2x4x20x20xf32, #tpu.memory_space<vmem>>, vector<1x4x1x18xf32>,
    %342 = vector.extract_strided_slice %326 {offsets = [0, 18], sizes = [1, 18], strides = [1, 1]} : vector<1x36xf32> to vector<1x18xf32>
    %343 = vector.shape_cast %342 : vector<1x18xf32> to vector<1x1x1x18xf32>
    %344 = vector.shape_cast %343 : vector<1x1x1x18xf32> to vector<1x1x1x18xf32>
    %345 = vector.broadcast %344 : vector<1x1x1x18xf32> to vector<1x4x1x18xf32>
    %c1_168 = arith.constant 1 : index
    %c0_169 = arith.constant 0 : index
    %c19_170 = arith.constant 19 : index
    %c1_171 = arith.constant 1 : index
    %346 = vector.load %arg17[%c1_168, %c0_169, %c19_170, %c1_171] : memref<2x4x20x20xf32, #tpu.memory_space<vmem>>, vector<1x4x1x18xf32>
    tpu.vector_store %arg17[%c1_168, %c0_169, %c19_170, %c1_171], %345 {strides = array<i32>} : memref<2x4x20x20xf32, #tpu.memory_space<vmem>>, vector<1x4x1x18xf32>,
    %c0_172 = arith.constant 0 : index
    %c0_173 = arith.constant 0 : index
    %c0_174 = arith.constant 0 : index
    %c1_175 = arith.constant 1 : index
    %347 = vector.load %arg17[%c0_172, %c0_173, %c0_174, %c1_175] : memref<2x4x20x20xf32, #tpu.memory_space<vmem>>, vector<1x4x20x3xf32>
    %348 = vector.shape_cast %347 : vector<1x4x20x3xf32> to vector<4x20x3xf32>
    %349 = vector.extract_strided_slice %348 {offsets = [0, 0, 0], sizes = [1, 20, 3], strides = [1, 1, 1]} : vector<4x20x3xf32> to vector<1x20x3xf32>
    %350 = vector.shape_cast %349 : vector<1x20x3xf32> to vector<20x3xf32>
    %351 = vector.extract_strided_slice %348 {offsets = [1, 0, 0], sizes = [1, 20, 3], strides = [1, 1, 1]} : vector<4x20x3xf32> to vector<1x20x3xf32>
    %352 = vector.shape_cast %351 : vector<1x20x3xf32> to vector<20x3xf32>
    %353 = vector.extract_strided_slice %348 {offsets = [2, 0, 0], sizes = [1, 20, 3], strides = [1, 1, 1]} : vector<4x20x3xf32> to vector<1x20x3xf32>
    %354 = vector.shape_cast %353 : vector<1x20x3xf32> to vector<20x3xf32>
    %355 = vector.extract_strided_slice %348 {offsets = [3, 0, 0], sizes = [1, 20, 3], strides = [1, 1, 1]} : vector<4x20x3xf32> to vector<1x20x3xf32>
    %356 = vector.shape_cast %355 : vector<1x20x3xf32> to vector<20x3xf32>
    %357 = tpu.concatenate %350, %352, %354, %356 in 1 : vector<20x3xf32>, vector<20x3xf32>, vector<20x3xf32>, vector<20x3xf32> -> vector<20x12xf32>
    %358 = vector.extract_strided_slice %357 {offsets = [0, 0], sizes = [18, 12], strides = [1, 1]} : vector<20x12xf32> to vector<18x12xf32>
    %359 = vector.extract_strided_slice %357 {offsets = [1, 0], sizes = [18, 12], strides = [1, 1]} : vector<20x12xf32> to vector<18x12xf32>
    %360 = vector.extract_strided_slice %357 {offsets = [2, 0], sizes = [18, 12], strides = [1, 1]} : vector<20x12xf32> to vector<18x12xf32>
    %c0_176 = arith.constant 0 : index
    %c0_177 = arith.constant 0 : index
    %c0_178 = arith.constant 0 : index
    %c16_179 = arith.constant 16 : index
    %361 = vector.load %arg17[%c0_176, %c0_177, %c0_178, %c16_179] : memref<2x4x20x20xf32, #tpu.memory_space<vmem>>, vector<1x4x20x3xf32>
    %362 = vector.shape_cast %361 : vector<1x4x20x3xf32> to vector<4x20x3xf32>
    %363 = vector.extract_strided_slice %362 {offsets = [0, 0, 0], sizes = [1, 20, 3], strides = [1, 1, 1]} : vector<4x20x3xf32> to vector<1x20x3xf32>
    %364 = vector.shape_cast %363 : vector<1x20x3xf32> to vector<20x3xf32>
    %365 = vector.extract_strided_slice %362 {offsets = [1, 0, 0], sizes = [1, 20, 3], strides = [1, 1, 1]} : vector<4x20x3xf32> to vector<1x20x3xf32>
    %366 = vector.shape_cast %365 : vector<1x20x3xf32> to vector<20x3xf32>
    %367 = vector.extract_strided_slice %362 {offsets = [2, 0, 0], sizes = [1, 20, 3], strides = [1, 1, 1]} : vector<4x20x3xf32> to vector<1x20x3xf32>
    %368 = vector.shape_cast %367 : vector<1x20x3xf32> to vector<20x3xf32>
    %369 = vector.extract_strided_slice %362 {offsets = [3, 0, 0], sizes = [1, 20, 3], strides = [1, 1, 1]} : vector<4x20x3xf32> to vector<1x20x3xf32>
    %370 = vector.shape_cast %369 : vector<1x20x3xf32> to vector<20x3xf32>
    %371 = tpu.concatenate %364, %366, %368, %370 in 1 : vector<20x3xf32>, vector<20x3xf32>, vector<20x3xf32>, vector<20x3xf32> -> vector<20x12xf32>
    %372 = vector.extract_strided_slice %371 {offsets = [0, 0], sizes = [18, 12], strides = [1, 1]} : vector<20x12xf32> to vector<18x12xf32>
    %373 = vector.extract_strided_slice %371 {offsets = [1, 0], sizes = [18, 12], strides = [1, 1]} : vector<20x12xf32> to vector<18x12xf32>
    %374 = vector.extract_strided_slice %371 {offsets = [2, 0], sizes = [18, 12], strides = [1, 1]} : vector<20x12xf32> to vector<18x12xf32>
    %375 = tpu.concatenate %358, %359, %360, %372, %373, %374 in 1 : vector<18x12xf32>, vector<18x12xf32>, vector<18x12xf32>, vector<18x12xf32>, vector<18x12xf32>, vector<18x12xf32> -> vector<18x72xf32>
    %c1_180 = arith.constant 1 : index
    %c0_181 = arith.constant 0 : index
    %c0_182 = arith.constant 0 : index
    %c1_183 = arith.constant 1 : index
    %376 = vector.load %arg17[%c1_180, %c0_181, %c0_182, %c1_183] : memref<2x4x20x20xf32, #tpu.memory_space<vmem>>, vector<1x4x20x3xf32>
    %377 = vector.shape_cast %376 : vector<1x4x20x3xf32> to vector<4x20x3xf32>
    %378 = vector.extract_strided_slice %377 {offsets = [0, 0, 0], sizes = [1, 20, 3], strides = [1, 1, 1]} : vector<4x20x3xf32> to vector<1x20x3xf32>
    %379 = vector.shape_cast %378 : vector<1x20x3xf32> to vector<20x3xf32>
    %380 = vector.extract_strided_slice %377 {offsets = [1, 0, 0], sizes = [1, 20, 3], strides = [1, 1, 1]} : vector<4x20x3xf32> to vector<1x20x3xf32>
    %381 = vector.shape_cast %380 : vector<1x20x3xf32> to vector<20x3xf32>
    %382 = vector.extract_strided_slice %377 {offsets = [2, 0, 0], sizes = [1, 20, 3], strides = [1, 1, 1]} : vector<4x20x3xf32> to vector<1x20x3xf32>
    %383 = vector.shape_cast %382 : vector<1x20x3xf32> to vector<20x3xf32>
    %384 = vector.extract_strided_slice %377 {offsets = [3, 0, 0], sizes = [1, 20, 3], strides = [1, 1, 1]} : vector<4x20x3xf32> to vector<1x20x3xf32>
    %385 = vector.shape_cast %384 : vector<1x20x3xf32> to vector<20x3xf32>
    %386 = tpu.concatenate %379, %381, %383, %385 in 1 : vector<20x3xf32>, vector<20x3xf32>, vector<20x3xf32>, vector<20x3xf32> -> vector<20x12xf32>
    %387 = vector.extract_strided_slice %386 {offsets = [0, 0], sizes = [18, 12], strides = [1, 1]} : vector<20x12xf32> to vector<18x12xf32>
    %388 = vector.extract_strided_slice %386 {offsets = [1, 0], sizes = [18, 12], strides = [1, 1]} : vector<20x12xf32> to vector<18x12xf32>
    %389 = vector.extract_strided_slice %386 {offsets = [2, 0], sizes = [18, 12], strides = [1, 1]} : vector<20x12xf32> to vector<18x12xf32>
    %c1_184 = arith.constant 1 : index
    %c0_185 = arith.constant 0 : index
    %c0_186 = arith.constant 0 : index
    %c16_187 = arith.constant 16 : index
    %390 = vector.load %arg17[%c1_184, %c0_185, %c0_186, %c16_187] : memref<2x4x20x20xf32, #tpu.memory_space<vmem>>, vector<1x4x20x3xf32>
    %391 = vector.shape_cast %390 : vector<1x4x20x3xf32> to vector<4x20x3xf32>
    %392 = vector.extract_strided_slice %391 {offsets = [0, 0, 0], sizes = [1, 20, 3], strides = [1, 1, 1]} : vector<4x20x3xf32> to vector<1x20x3xf32>
    %393 = vector.shape_cast %392 : vector<1x20x3xf32> to vector<20x3xf32>
    %394 = vector.extract_strided_slice %391 {offsets = [1, 0, 0], sizes = [1, 20, 3], strides = [1, 1, 1]} : vector<4x20x3xf32> to vector<1x20x3xf32>
    %395 = vector.shape_cast %394 : vector<1x20x3xf32> to vector<20x3xf32>
    %396 = vector.extract_strided_slice %391 {offsets = [2, 0, 0], sizes = [1, 20, 3], strides = [1, 1, 1]} : vector<4x20x3xf32> to vector<1x20x3xf32>
    %397 = vector.shape_cast %396 : vector<1x20x3xf32> to vector<20x3xf32>
    %398 = vector.extract_strided_slice %391 {offsets = [3, 0, 0], sizes = [1, 20, 3], strides = [1, 1, 1]} : vector<4x20x3xf32> to vector<1x20x3xf32>
    %399 = vector.shape_cast %398 : vector<1x20x3xf32> to vector<20x3xf32>
    %400 = tpu.concatenate %393, %395, %397, %399 in 1 : vector<20x3xf32>, vector<20x3xf32>, vector<20x3xf32>, vector<20x3xf32> -> vector<20x12xf32>
    %401 = vector.extract_strided_slice %400 {offsets = [0, 0], sizes = [18, 12], strides = [1, 1]} : vector<20x12xf32> to vector<18x12xf32>
    %402 = vector.extract_strided_slice %400 {offsets = [1, 0], sizes = [18, 12], strides = [1, 1]} : vector<20x12xf32> to vector<18x12xf32>
    %403 = vector.extract_strided_slice %400 {offsets = [2, 0], sizes = [18, 12], strides = [1, 1]} : vector<20x12xf32> to vector<18x12xf32>
    %404 = tpu.concatenate %387, %388, %389, %401, %402, %403 in 1 : vector<18x12xf32>, vector<18x12xf32>, vector<18x12xf32>, vector<18x12xf32>, vector<18x12xf32>, vector<18x12xf32> -> vector<18x72xf32>
    %405 = tpu.concatenate %375, %404 in 0 : vector<18x72xf32>, vector<18x72xf32> -> vector<36x72xf32>
    %cst_188 = arith.constant dense<0.000000e+00> : vector<36x16xf32>
    %406 = tpu.matmul %405, %18, %cst_188 {dimension_numbers = #tpu.dot_dimension_numbers<[1], [0], [0], [1], [0, 0, 1, 1], [], []>} : vector<36x72xf32>, vector<72x16xf32>, vector<36x16xf32> -> vector<36x16xf32>
    %407 = vector.broadcast %19 : vector<1x16xf32> to vector<36x16xf32>
    %408 = arith.addf %406, %407 : vector<36x16xf32>
    %cst_189 = arith.constant 0.000000e+00 : f32
    %409 = vector.broadcast %cst_189 : f32 to vector<36x16xf32>
    %410 = arith.maximumf %408, %409 : vector<36x16xf32>
    %cst_190 = arith.constant dense<0.000000e+00> : vector<36x16xf32>
    %411 = tpu.matmul %410, %20, %cst_190 {dimension_numbers = #tpu.dot_dimension_numbers<[1], [0], [0], [1], [0, 0, 1, 1], [], []>} : vector<36x16xf32>, vector<16x16xf32>, vector<36x16xf32> -> vector<36x16xf32>
    %412 = vector.broadcast %21 : vector<1x16xf32> to vector<36x16xf32>
    %413 = arith.addf %411, %412 : vector<36x16xf32>
    %cst_191 = arith.constant 0.000000e+00 : f32
    %414 = vector.broadcast %cst_191 : f32 to vector<36x16xf32>
    %415 = arith.maximumf %413, %414 : vector<36x16xf32>
    %416 = vector.extract_strided_slice %415 {offsets = [0, 0], sizes = [36, 8], strides = [1, 1]} : vector<36x16xf32> to vector<36x8xf32>
    %417 = vector.broadcast %22 : vector<1x8xf32> to vector<36x8xf32>
    %418 = arith.mulf %416, %417 : vector<36x8xf32>
    %cst_192 = arith.constant dense<0.000000e+00> : vector<36xf32>
    %419 = vector.multi_reduction <add>, %418, %cst_192 [1] : vector<36x8xf32> to vector<36xf32>
    %420 = vector.shape_cast %419 : vector<36xf32> to vector<36x1xf32>
    %421 = vector.broadcast %24 : vector<1x1xf32> to vector<36x1xf32>
    %422 = arith.addf %420, %421 : vector<36x1xf32>
    %cst_193 = arith.constant 0.000000e+00 : f32
    %423 = vector.broadcast %cst_193 : f32 to vector<36x1xf32>
    %424 = arith.maximumf %422, %423 : vector<36x1xf32>
    %425 = vector.extract_strided_slice %415 {offsets = [0, 8], sizes = [36, 8], strides = [1, 1]} : vector<36x16xf32> to vector<36x8xf32>
    %426 = vector.broadcast %23 : vector<1x8xf32> to vector<36x8xf32>
    %427 = arith.mulf %425, %426 : vector<36x8xf32>
    %cst_194 = arith.constant dense<0.000000e+00> : vector<36xf32>
    %428 = vector.multi_reduction <add>, %427, %cst_194 [1] : vector<36x8xf32> to vector<36xf32>
    %429 = vector.shape_cast %428 : vector<36xf32> to vector<36x1xf32>
    %430 = vector.broadcast %25 : vector<1x1xf32> to vector<36x1xf32>
    %431 = arith.addf %429, %430 : vector<36x1xf32>
    %cst_195 = arith.constant 0.000000e+00 : f32
    %432 = vector.broadcast %cst_195 : f32 to vector<36x1xf32>
    %433 = arith.maximumf %431, %432 : vector<36x1xf32>
    %434 = vector.extract_strided_slice %424 {offsets = [0, 0], sizes = [18, 1], strides = [1, 1]} : vector<36x1xf32> to vector<18x1xf32>
    %435 = vector.shape_cast %434 : vector<18x1xf32> to vector<1x1x18x1xf32>
    %436 = vector.shape_cast %435 : vector<1x1x18x1xf32> to vector<1x1x18x1xf32>
    %437 = vector.broadcast %436 : vector<1x1x18x1xf32> to vector<1x4x18x1xf32>
    %c0_196 = arith.constant 0 : index
    %c0_197 = arith.constant 0 : index
    %c1_198 = arith.constant 1 : index
    %c0_199 = arith.constant 0 : index
    %438 = vector.load %arg17[%c0_196, %c0_197, %c1_198, %c0_199] : memref<2x4x20x20xf32, #tpu.memory_space<vmem>>, vector<1x4x18x1xf32>
    tpu.vector_store %arg17[%c0_196, %c0_197, %c1_198, %c0_199], %437 {strides = array<i32>} : memref<2x4x20x20xf32, #tpu.memory_space<vmem>>, vector<1x4x18x1xf32>,
    %439 = vector.extract_strided_slice %433 {offsets = [0, 0], sizes = [18, 1], strides = [1, 1]} : vector<36x1xf32> to vector<18x1xf32>
    %440 = vector.shape_cast %439 : vector<18x1xf32> to vector<1x1x18x1xf32>
    %441 = vector.shape_cast %440 : vector<1x1x18x1xf32> to vector<1x1x18x1xf32>
    %442 = vector.broadcast %441 : vector<1x1x18x1xf32> to vector<1x4x18x1xf32>
    %c0_200 = arith.constant 0 : index
    %c0_201 = arith.constant 0 : index
    %c1_202 = arith.constant 1 : index
    %c19_203 = arith.constant 19 : index
    %443 = vector.load %arg17[%c0_200, %c0_201, %c1_202, %c19_203] : memref<2x4x20x20xf32, #tpu.memory_space<vmem>>, vector<1x4x18x1xf32>
    tpu.vector_store %arg17[%c0_200, %c0_201, %c1_202, %c19_203], %442 {strides = array<i32>} : memref<2x4x20x20xf32, #tpu.memory_space<vmem>>, vector<1x4x18x1xf32>,
    %444 = vector.extract_strided_slice %424 {offsets = [18, 0], sizes = [18, 1], strides = [1, 1]} : vector<36x1xf32> to vector<18x1xf32>
    %445 = vector.shape_cast %444 : vector<18x1xf32> to vector<1x1x18x1xf32>
    %446 = vector.shape_cast %445 : vector<1x1x18x1xf32> to vector<1x1x18x1xf32>
    %447 = vector.broadcast %446 : vector<1x1x18x1xf32> to vector<1x4x18x1xf32>
    %c1_204 = arith.constant 1 : index
    %c0_205 = arith.constant 0 : index
    %c1_206 = arith.constant 1 : index
    %c0_207 = arith.constant 0 : index
    %448 = vector.load %arg17[%c1_204, %c0_205, %c1_206, %c0_207] : memref<2x4x20x20xf32, #tpu.memory_space<vmem>>, vector<1x4x18x1xf32>
    tpu.vector_store %arg17[%c1_204, %c0_205, %c1_206, %c0_207], %447 {strides = array<i32>} : memref<2x4x20x20xf32, #tpu.memory_space<vmem>>, vector<1x4x18x1xf32>,
    %449 = vector.extract_strided_slice %433 {offsets = [18, 0], sizes = [18, 1], strides = [1, 1]} : vector<36x1xf32> to vector<18x1xf32>
    %450 = vector.shape_cast %449 : vector<18x1xf32> to vector<1x1x18x1xf32>
    %451 = vector.shape_cast %450 : vector<1x1x18x1xf32> to vector<1x1x18x1xf32>
    %452 = vector.broadcast %451 : vector<1x1x18x1xf32> to vector<1x4x18x1xf32>
    %c1_208 = arith.constant 1 : index
    %c0_209 = arith.constant 0 : index
    %c1_210 = arith.constant 1 : index
    %c19_211 = arith.constant 19 : index
    %453 = vector.load %arg17[%c1_208, %c0_209, %c1_210, %c19_211] : memref<2x4x20x20xf32, #tpu.memory_space<vmem>>, vector<1x4x18x1xf32>
    tpu.vector_store %arg17[%c1_208, %c0_209, %c1_210, %c19_211], %452 {strides = array<i32>} : memref<2x4x20x20xf32, #tpu.memory_space<vmem>>, vector<1x4x18x1xf32>,
    return
  }
}

</mosaic_0001>

<bundles_post_ra>
// kernel: fwd.1
= control target key start
LH: loop header
LB: loop body
LE: loop exit
PB: predicated region body
PF: predicated region fallthrough
CT: control target
= control target key end

     0   :  { %s5479_s0 = inlined_call_operand.vmem [shape: f32[2,4,16,16], index: 0, kind: input, shape index: {}]   ;;  %s5480_s1 = inlined_call_operand.hbm [shape: f32[16,72], index: 1, kind: input, shape index: {}]   ;;  %s5481_s2 = inlined_call_operand.vmem [shape: f32[16,1], index: 2, kind: input, shape index: {}]   ;;  %s5482_s3 = inlined_call_operand.hbm [shape: f32[16,16], index: 3, kind: input, shape index: {}]   ;;  %s5483_s4 = inlined_call_operand.vmem [shape: f32[16,1], index: 4, kind: input, shape index: {}]   ;;  %s5484_s5 = inlined_call_operand.vmem [shape: f32[8,1], index: 5, kind: input, shape index: {}]   ;;  %s5485_s6 = inlined_call_operand.vmem [shape: f32[8,1], index: 6, kind: input, shape index: {}]   ;;  %s5486_s7 = inlined_call_operand.<no memory space> [shape: f32[1,1], index: 7, kind: input, shape index: {}]   ;;  %s5487_s9 = inlined_call_operand.vmem [shape: f32[72,16], index: 9, kind: input, shape index: {}]   ;;  %s5488_s10 = inlined_call_operand.vmem [shape: f32[1,16], index: 10, kind: input, shape index: {}]   ;;  %s5489_s11 = inlined_call_operand.vmem [shape: f32[16,16], index: 11, kind: input, shape index: {}]   ;;  %s5490_s12 = inlined_call_operand.vmem [shape: f32[1,16], index: 12, kind: input, shape index: {}]   ;;  %s5491_s13 = inlined_call_operand.vmem [shape: f32[1,8], index: 13, kind: input, shape index: {}]   ;;  %s5492_s14 = inlined_call_operand.vmem [shape: f32[1,8], index: 14, kind: input, shape index: {}]   ;;  %s5493_s17 = inlined_call_operand.vmem [shape: f32[2,4,20,20], index: 17, kind: output, shape index: {}]   ;;  %s5494_s8 = inlined_call_operand.<no memory space> [shape: f32[1,1], index: 8, kind: input, shape index: {}]   ;;  %s5495_s15 = inlined_call_operand.<no memory space> [shape: f32[1,1], index: 15, kind: input, shape index: {}]   ;;  %s5496_s16 = inlined_call_operand.<no memory space> [shape: f32[1,1], index: 16, kind: input, shape index: {}]  }
   0x1   :  { %5507 = sst [smem:[#allocation12_spill]] %s5479_s0  ;;  %v22_v0 = vstv %s5486_s7  ;;  %v24_v1 = vstv %s5494_s8  ;;  %v26_v2 = vstv %s5495_s15  ;;  %v28_v3 = vstv %s5496_s16 }
   0x2   :  { %5508 = sst [smem:[#allocation13_spill]] %s5480_s1  ;;  %23 = vst [vmem:[#allocation2] sm:$0x1] %v22_v0  ;;  %25 = vst [vmem:[#allocation3] sm:$0x1] %v24_v1 }
   0x3   :  { %27 = vst [vmem:[#allocation4] sm:$0x1] %v26_v2  ;;  %29 = vst [vmem:[#allocation5] sm:$0x1] %v28_v3 }
   0x4   :  { %30 = vsyncpa [#allocation7], 0 }
   0x5   :  { %31 = vsyncpa [#allocation9], 0  ;;  %s3198_s18 = smov [#allocation6]  }
   0x6   :  { %s39_s7 = sshll.u32 %s3198_s18, 4  ;;  %s40_s7 = int_to_ptr.vmem [resolvable:$true] %s39_s7 }
   0x7   :  { %s3162_s19 = scalar_lea.vmem %s40_s7, 256  ;;  %p3167_p1 = scmp.lt.s32.totalorder %s40_s7, %s40_s7 }
   0x8   :  { %p3163_p0 = scmp.ne.s32.totalorder %s40_s7, %s3162_s19  ;;  %p3168_p2 = scmp.lt.s32.totalorder %s3162_s19, %s3162_s19 }
   0xa   :  { %p3169_p3 = por %p3168_p2, %p3167_p1 }
   0xc   :  { %p3170_p4 = pnand %p3169_p3, %p3163_p0 }
   0xe   :  { %3173 = shalt.err (!%p3170_p4)
}
   0xf   :  { %s3199_s8 = smov 128   ;;  %s3200_s15 = smov 8  }
  0x10   :  { %s5509_s20 = sld [smem:[#allocation13_spill]]  ;;  %s3201_s21 = smov [#allocation8]  }
  0x11   :  { %s53_s22 = sshll.u32 %s3201_s21, 4  ;;  %s54_s22 = int_to_ptr.vmem [resolvable:$true] %s53_s22 }
  0x12   :  { %s3182_s23 = scalar_lea.vmem %s54_s22, 256  ;;  %p3187_p6 = scmp.lt.s32.totalorder %s54_s22, %s54_s22 }
  0x13   :  { %p3183_p5 = scmp.ne.s32.totalorder %s54_s22, %s3182_s23  ;;  %p3188_p7 = scmp.lt.s32.totalorder %s3182_s23, %s3182_s23 }
  0x15   :  { %p3189_p8 = por %p3188_p7, %p3187_p6 }
  0x16   :  { %45 = dma.hbm_to_vmem [thread:$0]  %s5509_s20, 256, %s40_s7, [#allocation7], %s3199_s8, %s3199_s8, %s3200_s15  }
  0x17   :  { %p3190_p9 = pnand %p3189_p8, %p3183_p5 }
  0x19   :  { %3193 = shalt.err (!%p3190_p9)
}
  0x1a   :  { %59 = dma.hbm_to_vmem [thread:$0]  %s5482_s3, 256, %s54_s22, [#allocation9], %s3199_s8, %s3199_s8, %s3200_s15  }
  0x1b   :  { %3194 = dma.done.wait [#allocation7], 256  }
  0x1c   :  { %3195 = vsyncadd [#allocation7], 4294967040 }
  0x1d   :  { %3196 = dma.done.wait [#allocation9], 256  }
  0x1e   :  { %3197 = vsyncadd [#allocation9], 4294967040  ;;  %vm109_vm0 = vcmask 15360   ;;  %vm126_vm1 = vcmask 162960   ;;  %v3202_v4 = vmov 0.0   ;;  %s5510_s19 = sld [smem:[#allocation12_spill]] }
  0x1f   :  { %125 = vst.msk [vmem:[%s5493_s17 + $0xb2] sm:$0xff] %vm109_vm0, %v3202_v4  ;;  %110 = vst.msk [vmem:[%s5493_s17 + $0x2] sm:$0xff] %vm109_vm0, %v3202_v4  ;;  %2980 = vmatprep.subr.mxu1 %v3202_v4  ;;  %s3203_s1 = smov 2   ;;  %vm223_vm2 = vcmask 146448   ;;  %vm282_vm3 = vcmask 1042432   ;;  %vm286_vm4 = vcmask 1040384  }
  0x20   :  { %111 = vst.msk [vmem:[%s5493_s17 + $0xa] sm:$0xff] %vm109_vm0, %v3202_v4  ;;  %112 = vst.msk [vmem:[%s5493_s17 + $0x1a] sm:$0xff] %vm109_vm0, %v3202_v4  ;;  %vm284_vm5 = vcmask 1045504   ;;  %vm306_vm6 = vcmask 1043456   ;;  %s3204_s16 = smov 127   ;;  %s3205_s28 = smov 126  }
  0x21   :  { %113 = vst.msk [vmem:[%s5493_s17 + $0x22] sm:$0xff] %vm109_vm0, %v3202_v4  ;;  %114 = vst.msk [vmem:[%s5493_s17 + $0x32] sm:$0xff] %vm109_vm0, %v3202_v4  ;;  %s3207_s24 = smov 18   ;;  %vm461_vm7 = vcmask 588800   ;;  %s3208_s27 = smov 122   ;;  %vm441_vm8 = vcmask 146432  }
  0x22   :  { %115 = vst.msk [vmem:[%s5493_s17 + $0x3a] sm:$0xff] %vm109_vm0, %v3202_v4  ;;  %116 = vst.msk [vmem:[%s5493_s17 + $0x4a] sm:$0xff] %vm109_vm0, %v3202_v4  ;;  %s3209_s30 = smov 1   ;;  %s3211_s21 = smov 4   ;;  %vm555_vm9 = vcmask 130048   ;;  %vm92_vm10 = vcmask 156672  }
  0x23   :  { %117 = vst.msk [vmem:[%s5493_s17 + $0x52] sm:$0xff] %vm109_vm0, %v3202_v4  ;;  %118 = vst.msk [vmem:[%s5493_s17 + $0x62] sm:$0xff] %vm109_vm0, %v3202_v4  ;;  %s3212_s22 = smov 116   ;;  %vm645_vm11 = vcmask 293888   ;;  %s3214_s3 = smov 111   ;;  %vm692_vm12 = vcmask 147464  }
  0x24   :  { %119 = vst.msk [vmem:[%s5493_s17 + $0x6a] sm:$0xff] %vm109_vm0, %v3202_v4  ;;  %120 = vst.msk [vmem:[%s5493_s17 + $0x7a] sm:$0xff] %vm109_vm0, %v3202_v4  ;;  %v158_v5 = vld [vmem:[%s5510_s19 + $0x78] sm:$0xff]  ;;  %v156_v7 = vld [vmem:[%s5510_s19 + $0x68] sm:$0xff]  ;;  %vm779_vm13 = vcmask 23552   ;;  %vm5500_vm14 = vcmask 48128  }
  0x25   :  { %121 = vst.msk [vmem:[%s5493_s17 + $0x82] sm:$0xff] %vm109_vm0, %v3202_v4  ;;  %122 = vst.msk [vmem:[%s5493_s17 + $0x92] sm:$0xff] %vm109_vm0, %v3202_v4  ;;  %v154_v6 = vld [vmem:[%s5510_s19 + $0x58] sm:$0xff]  ;;  %205 = vrot.lane.b32.xlu1 %v158_v5, %s3203_s1  ;;  %vm5499_vm15 = vcmask 72704   ;;  %s3222_s7 = smov 120   ;;  %s3224_s18 = smov 121  }
  0x26   :  { %123 = vst.msk [vmem:[%s5493_s17 + $0x9a] sm:$0xff] %vm109_vm0, %v3202_v4  ;;  %124 = vst.msk [vmem:[%s5493_s17 + $0xaa] sm:$0xff] %vm109_vm0, %v3202_v4  ;;  %197 = vrot.lane.b32.xlu0 %v154_v6, %s3203_s1  ;;  %v152_v8 = vld [vmem:[%s5510_s19 + $0x48] sm:$0xff]  ;;  %v3206_v6 = vmov 0   ;;  %vm5498_vm0 = vcmask 1046528  }
  0x27   :  { %142 = vst.msk [vmem:[%s5493_s17 + $0xb2] sm:$0xff] %vm126_vm1, %v3202_v4  ;;  %138 = vst.msk [vmem:[%s5493_s17 + $0x82] sm:$0xff] %vm126_vm1, %v3202_v4  ;;  %v155_v9 = vld [vmem:[%s5510_s19 + $0x60] sm:$0xff]  ;;  %v157_v10 = vld [vmem:[%s5510_s19 + $0x70] sm:$0xff]  ;;  %3144 = vset.pattern.permute.xlu0 %v3206_v6  ;;  %3143 = vset.pattern.permute.xlu1 %v3206_v6 }
  0x28   :  { %127 = vst.msk [vmem:[%s5493_s17 + $0x2] sm:$0xff] %vm126_vm1, %v3202_v4  ;;  %128 = vst.msk [vmem:[%s5493_s17 + $0xa] sm:$0xff] %vm126_vm1, %v3202_v4  ;;  %v153_v11 = vld [vmem:[%s5510_s19 + $0x50] sm:$0xff]  ;;  %v151_v12 = vld [vmem:[%s5510_s19 + $0x40] sm:$0xff] }
  0x29   :  { %129 = vst.msk [vmem:[%s5493_s17 + $0x1a] sm:$0xff] %vm126_vm1, %v3202_v4  ;;  %130 = vst.msk [vmem:[%s5493_s17 + $0x22] sm:$0xff] %vm126_vm1, %v3202_v4  ;;  %193 = vrot.lane.b32.xlu1 %v152_v8, %s3203_s1  ;;  %v148_v13 = vld [vmem:[%s5510_s19 + $0x28] sm:$0xff] }
  0x2a   :  { %131 = vst.msk [vmem:[%s5493_s17 + $0x32] sm:$0xff] %vm126_vm1, %v3202_v4  ;;  %132 = vst.msk [vmem:[%s5493_s17 + $0x3a] sm:$0xff] %vm126_vm1, %v3202_v4  ;;  %201 = vrot.lane.b32.xlu0 %v156_v7, %s3203_s1  ;;  %v146_v14 = vld [vmem:[%s5510_s19 + $0x18] sm:$0xff] }
  0x2b   :  { %133 = vst.msk [vmem:[%s5493_s17 + $0x4a] sm:$0xff] %vm126_vm1, %v3202_v4  ;;  %134 = vst.msk [vmem:[%s5493_s17 + $0x52] sm:$0xff] %vm126_vm1, %v3202_v4  ;;  %v144_v15 = vld [vmem:[%s5510_s19 + $0x8] sm:$0xff]  ;;  %v150_v16 = vld [vmem:[%s5510_s19 + $0x38] sm:$0xff] }
  0x2c   :  { %135 = vst.msk [vmem:[%s5493_s17 + $0x62] sm:$0xff] %vm126_vm1, %v3202_v4  ;;  %136 = vst.msk [vmem:[%s5493_s17 + $0x6a] sm:$0xff] %vm126_vm1, %v3202_v4  ;;  %v147_v17 = vld [vmem:[%s5510_s19 + $0x20] sm:$0xff]  ;;  %v149_v18 = vld [vmem:[%s5510_s19 + $0x30] sm:$0xff] }
  0x2d   :  { %137 = vst.msk [vmem:[%s5493_s17 + $0x7a] sm:$0xff] %vm126_vm1, %v3202_v4  ;;  %139 = vst.msk [vmem:[%s5493_s17 + $0x92] sm:$0xff] %vm126_vm1, %v3202_v4  ;;  %203 = vrot.lane.b32.xlu1 %v157_v10, %s3203_s1  ;;  %v145_v19 = vld [vmem:[%s5510_s19 + $0x10] sm:$0xff] }
  0x2e   :  { %140 = vst.msk [vmem:[%s5493_s17 + $0x9a] sm:$0xff] %vm126_vm1, %v3202_v4  ;;  %141 = vst.msk [vmem:[%s5493_s17 + $0xaa] sm:$0xff] %vm126_vm1, %v3202_v4  ;;  %199 = vrot.lane.b32.xlu0 %v155_v9, %s3203_s1  ;;  %v143_v20 = vld [vmem:[%s5510_s19] sm:$0xff]  ;;  %s3210_s19 = smov 113   ;;  %vm3221_vm1 = vmmov 0  }
  0x2f   :  { %101 = vst.msk [vmem:[%s5493_s17 + $0x12] sm:$0x3] %vm92_vm10, %v3202_v4  ;;  %102 = vst.msk [vmem:[%s5493_s17 + $0x2a] sm:$0x3] %vm92_vm10, %v3202_v4  ;;  %2998 = vmatprep.mubr.msk.f32.mxu1 %vm3221_vm1, %v3202_v4 }
  0x30   :  { %103 = vst.msk [vmem:[%s5493_s17 + $0x42] sm:$0x3] %vm92_vm10, %v3202_v4  ;;  %104 = vst.msk [vmem:[%s5493_s17 + $0x5a] sm:$0x3] %vm92_vm10, %v3202_v4 }
  0x31   :  { %191 = vrot.lane.b32.xlu1 %v151_v12, %s3203_s1  ;;  %93 = vst.msk [vmem:[%s5493_s17] sm:$0x3] %vm92_vm10, %v3202_v4  ;;  %94 = vst.msk [vmem:[%s5493_s17 + $0x18] sm:$0x3] %vm92_vm10, %v3202_v4 }
  0x32   :  { %195 = vrot.lane.b32.xlu0 %v153_v11, %s3203_s1  ;;  %95 = vst.msk [vmem:[%s5493_s17 + $0x30] sm:$0x3] %vm92_vm10, %v3202_v4  ;;  %96 = vst.msk [vmem:[%s5493_s17 + $0x48] sm:$0x3] %vm92_vm10, %v3202_v4 }
  0x33   :  { %97 = vst.msk [vmem:[%s5493_s17 + $0x60] sm:$0x3] %vm92_vm10, %v3202_v4  ;;  %98 = vst.msk [vmem:[%s5493_s17 + $0x78] sm:$0x3] %vm92_vm10, %v3202_v4 }
  0x34   :  { %99 = vst.msk [vmem:[%s5493_s17 + $0x90] sm:$0x3] %vm92_vm10, %v3202_v4  ;;  %100 = vst.msk [vmem:[%s5493_s17 + $0xa8] sm:$0x3] %vm92_vm10, %v3202_v4 }
  0x35   :  { %185 = vrot.lane.b32.xlu1 %v148_v13, %s3203_s1  ;;  %105 = vst.msk [vmem:[%s5493_s17 + $0x72] sm:$0x3] %vm92_vm10, %v3202_v4  ;;  %106 = vst.msk [vmem:[%s5493_s17 + $0x8a] sm:$0x3] %vm92_vm10, %v3202_v4 }
  0x36   :  { %181 = vrot.lane.b32.xlu0 %v146_v14, %s3203_s1  ;;  %107 = vst.msk [vmem:[%s5493_s17 + $0xa2] sm:$0x3] %vm92_vm10, %v3202_v4  ;;  %108 = vst.msk [vmem:[%s5493_s17 + $0xba] sm:$0x3] %vm92_vm10, %v3202_v4  ;;  %vm5505_vm10 = vcmask 195584  }
  0x39   :  { %177 = vrot.lane.b32.xlu1 %v144_v15, %s3203_s1 }
  0x3a   :  { %189 = vrot.lane.b32.xlu0 %v150_v16, %s3203_s1 }
  0x3d   :  { %187 = vrot.lane.b32.xlu1 %v149_v18, %s3203_s1 }
  0x3e   :  { %183 = vrot.lane.b32.xlu0 %v147_v17, %s3203_s1 }
  0x41   :  { %175 = vrot.lane.b32.xlu1 %v143_v20, %s3203_s1 }
  0x42   :  { %179 = vrot.lane.b32.xlu0 %v145_v19, %s3203_s1 }
  0x97   :  { %v206_v21 = vpop.permute.xlu1 %205 }
  0x98   :  { %v198_v22 = vpop.permute.xlu0 %197  ;;  %239 = vst.msk [vmem:[%s5493_s17 + $0xb2] sm:$0xff] %vm223_vm2, %v206_v21 }
  0x99   :  { %235 = vst.msk [vmem:[%s5493_s17 + $0x82] sm:$0xff] %vm223_vm2, %v198_v22 }
  0x9b   :  { %v194_v24 = vpop.permute.xlu1 %193 }
  0x9c   :  { %v202_v23 = vpop.permute.xlu0 %201  ;;  %233 = vst.msk [vmem:[%s5493_s17 + $0x6a] sm:$0xff] %vm223_vm2, %v194_v24 }
  0x9d   :  { %237 = vst.msk [vmem:[%s5493_s17 + $0x9a] sm:$0xff] %vm223_vm2, %v202_v23 }
  0x9f   :  { %v204_v26 = vpop.permute.xlu1 %203  ;;  %v2749_v28 = vld [vmem:[%s5493_s17 + $0xb7] sm:$0x7] }
  0xa0   :  { %v200_v25 = vpop.permute.xlu0 %199  ;;  %v2747_v27 = vld [vmem:[%s5493_s17 + $0x87] sm:$0x7]  ;;  %238 = vst.msk [vmem:[%s5493_s17 + $0xaa] sm:$0xff] %vm223_vm2, %v204_v26  ;;  %v372_v35 = vrot.slane %v2749_v28, 7 }
  0xa1   :  { %236 = vst.msk [vmem:[%s5493_s17 + $0x92] sm:$0xff] %vm223_vm2, %v200_v25  ;;  %v366_v29 = vrot.slane %v2747_v27, 5 }
  0xa3   :  { %v192_v31 = vpop.permute.xlu1 %191  ;;  %v2746_v33 = vld [vmem:[%s5493_s17 + $0x6f] sm:$0x7] }
  0xa4   :  { %v196_v30 = vpop.permute.xlu0 %195  ;;  %v2748_v32 = vld [vmem:[%s5493_s17 + $0x9f] sm:$0x7]  ;;  %232 = vst.msk [vmem:[%s5493_s17 + $0x62] sm:$0xff] %vm223_vm2, %v192_v31  ;;  %v374_v36 = vsel %vm282_vm3, %v2746_v33, %v366_v29 }
  0xa5   :  { %234 = vst.msk [vmem:[%s5493_s17 + $0x7a] sm:$0xff] %vm223_vm2, %v196_v30  ;;  %v369_v34 = vrot.slane %v2748_v32, 2 }
  0xa7   :  { %v376_v37 = vsel %vm286_vm4, %v369_v34, %v372_v35  ;;  %v375_v38 = vsel %vm284_vm5, %v374_v36, %v369_v34  ;;  %v186_v39 = vpop.permute.xlu1 %185  ;;  %v2745_v44 = vld [vmem:[%s5493_s17 + $0xaa] sm:$0x7] }
  0xa8   :  { %400 = vrot.lane.b32.xlu1 %v376_v37, %s3204_s16  ;;  %v395_v40 = vrot.slane %v376_v37, 4  ;;  %v182_v41 = vpop.permute.xlu0 %181  ;;  %v3612_v42 = vrot.slane %v375_v38, 4  ;;  %v2744_v43 = vld [vmem:[%s5493_s17 + $0x92] sm:$0x7]  ;;  %229 = vst.msk [vmem:[%s5493_s17 + $0x3a] sm:$0xff] %vm223_vm2, %v186_v39  ;;  %v356_v45 = vrot.slane %v2745_v44, 7 }
  0xa9   :  { %227 = vst.msk [vmem:[%s5493_s17 + $0x22] sm:$0xff] %vm223_vm2, %v182_v41  ;;  %v353_v47 = vrot.slane %v2744_v43, 2  ;;  %v240_v35 = vld [vmem:[#allocation6] sm:$0xff]  ;;  %v250_v44 = vld [vmem:[#allocation2] sm:$0x1] }
  0xaa   :  { %v396_v46 = vsel %vm306_vm6, %v3612_v42, %v395_v40  ;;  %2970 = vmatprep.mubr.msk.f32.mxu0 %vm461_vm7, %v240_v35  ;;  %v243_v39 = vld [vmem:[%s5481_s2 + $0x8] sm:$0xff]  ;;  %v242_v40 = vld [vmem:[%s5481_s2] sm:$0xff]  ;;  %s3213_s2 = smov 7  }
  0xab   :  { %405 = vrot.lane.b32.xlu0 %v396_v46, %s3205_s28  ;;  %v178_v48 = vpop.permute.xlu1 %177  ;;  %v2742_v50 = vld [vmem:[%s5493_s17 + $0x62] sm:$0x7]  ;;  %v3647_v53 = vsel %vm286_vm4, %v353_v47, %v356_v45  ;;  %v247_v43 = vld [vmem:[%s5483_s4 + $0x8] sm:$0xff] }
  0xac   :  { %398 = vrot.lane.b32.xlu1 %v375_v38, %s3204_s16  ;;  %v190_v49 = vpop.permute.xlu0 %189  ;;  %v2743_v51 = vld [vmem:[%s5493_s17 + $0x7a] sm:$0x7]  ;;  %225 = vst.msk [vmem:[%s5493_s17 + $0xa] sm:$0xff] %vm223_vm2, %v178_v48  ;;  %v380_v58 = vrot.slane %v3647_v53, 4  ;;  %v246_v41 = vld [vmem:[%s5483_s4] sm:$0xff] }
  0xad   :  { %231 = vst.msk [vmem:[%s5493_s17 + $0x52] sm:$0xff] %vm223_vm2, %v190_v49  ;;  %v350_v52 = vrot.slane %v2743_v51, 5  ;;  %v249_v45 = vld [vmem:[%s5485_s6] sm:$0xff]  ;;  %v2763_v48 = vld [vmem:[%s5493_s17 + $0x68] sm:$0xff]  ;;  %s3215_s6 = smov 119  }
  0xaf   :  { %403 = vrot.lane.b32.xlu0 %v3612_v42, %s3205_s28  ;;  %v358_v54 = vsel %vm282_vm3, %v2742_v50, %v350_v52  ;;  %v188_v57 = vpop.permute.xlu1 %187  ;;  %v290_v60 = vld [vmem:[%s5493_s17 + $0x3f] sm:$0x7] }
  0xb0   :  { %v3653_v55 = vsel %vm284_vm5, %v358_v54, %v353_v47  ;;  %v184_v56 = vpop.permute.xlu0 %183  ;;  %v289_v59 = vld [vmem:[%s5493_s17 + $0x27] sm:$0x7]  ;;  %230 = vst.msk [vmem:[%s5493_s17 + $0x4a] sm:$0xff] %vm223_vm2, %v188_v57  ;;  %v296_v63 = vrot.slane %v290_v60, 2  ;;  %v251_v47 = vld [vmem:[#allocation3] sm:$0x1] }
  0xb1   :  { %387 = vrot.lane.b32.xlu1 %v3653_v55, %s3205_s28  ;;  %228 = vst.msk [vmem:[%s5493_s17 + $0x32] sm:$0xff] %vm223_vm2, %v184_v56  ;;  %v379_v61 = vrot.slane %v3653_v55, 4  ;;  %v293_v62 = vrot.slane %v289_v59, 5  ;;  %v2766_v50 = vld [vmem:[%s5493_s17 + $0x80] sm:$0xff] }
  0xb3   :  { %389 = vrot.lane.b32.xlu0 %v3647_v53, %s3205_s28  ;;  %v381_v0 = vsel %vm306_vm6, %v379_v61, %v380_v58  ;;  %v288_v1 = vld [vmem:[%s5493_s17 + $0xf] sm:$0x7]  ;;  %v176_v5 = vpop.permute.xlu1 %175 }
  0xb4   :  { %v291_v2 = vld [vmem:[%s5493_s17 + $0x57] sm:$0x7]  ;;  %v180_v3 = vpop.permute.xlu0 %179  ;;  %v301_v7 = vsel %vm282_vm3, %v288_v1, %v293_v62  ;;  %224 = vst.msk [vmem:[%s5493_s17 + $0x2] sm:$0xff] %vm223_vm2, %v176_v5 }
  0xb5   :  { %382 = vrot.lane.b32.xlu1 %v379_v61, %s3204_s16  ;;  %v299_v8 = vrot.slane %v291_v2, 7  ;;  %226 = vst.msk [vmem:[%s5493_s17 + $0x1a] sm:$0xff] %vm223_vm2, %v180_v3  ;;  %v302_v9 = vsel %vm284_vm5, %v301_v7, %v296_v63  ;;  %vm5506_vm2 = vcmask 97280  }
  0xb6   :  { %v3694_v10 = vrot.slane %v302_v9, 4 }
  0xb7   :  { %384 = vrot.lane.b32.xlu0 %v381_v0, %s3204_s16  ;;  %v303_v11 = vsel %vm286_vm4, %v296_v63, %v299_v8  ;;  %v272_v13 = vld [vmem:[%s5493_s17 + $0x4a] sm:$0x7] }
  0xb8   :  { %v271_v12 = vld [vmem:[%s5493_s17 + $0x32] sm:$0x7]  ;;  %v280_v15 = vrot.slane %v272_v13, 7  ;;  %v325_v16 = vrot.slane %v303_v11, 4  ;;  %v3793_v52 = vld [vmem:[%s5493_s17 + $0x38] sm:$0xff] }
  0xb9   :  { %335 = vrot.lane.b32.xlu1 %v3694_v10, %s3205_s28  ;;  %v277_v14 = vrot.slane %v271_v12, 2 }
  0xba   :  { %v3714_v18 = vsel %vm306_vm6, %v3694_v10, %v325_v16 }
  0xbb   :  { %331 = vrot.lane.b32.xlu0 %v303_v11, %s3204_s16  ;;  %v3707_v17 = vsel %vm286_vm4, %v277_v14, %v280_v15  ;;  %v269_v23 = vld [vmem:[%s5493_s17 + $0x2] sm:$0x7]  ;;  %v720_v49 = vld [vmem:[%s5493_s17 + $0x8] sm:$0xff] }
  0xbc   :  { %v270_v19 = vld [vmem:[%s5493_s17 + $0x1a] sm:$0x7]  ;;  %v308_v30 = vrot.slane %v3707_v17, 4  ;;  %v723_v51 = vld [vmem:[%s5493_s17 + $0x20] sm:$0xff] }
  0xbd   :  { %329 = vrot.lane.b32.xlu1 %v302_v9, %s3204_s16  ;;  %v274_v21 = vrot.slane %v270_v19, 5 }
  0xbf   :  { %318 = vrot.lane.b32.xlu0 %v3707_v17, %s3205_s28  ;;  %v283_v25 = vsel %vm282_vm3, %v269_v23, %v274_v21  ;;  %v244_v21 = vld [vmem:[#allocation8] sm:$0xff] }
  0xc0   :  { %v3731_v28 = vsel %vm284_vm5, %v283_v25, %v277_v14 }
  0xc1   :  { %424 = vrot.lane.b32.xlu1 %v396_v46, %s3207_s24  ;;  %v307_v32 = vrot.slane %v3731_v28, 4  ;;  %v729_v46 = vld [vmem:[%s5493_s17 + $0x50] sm:$0xff] }
  0xc3   :  { %337 = vrot.lane.b32.xlu0 %v3714_v18, %s3205_s28  ;;  %v309_v34 = vsel %vm306_vm6, %v307_v32, %v308_v30 }
 0x11a   :  { %v401_v20 = vpop.permute.xlu1 %400 }
 0x11d   :  { %v406_v22 = vpop.permute.xlu0 %405 }
 0x11e   :  { %v399_v24 = vpop.permute.xlu1 %398  ;;  %430 = vrot.lane.b32.xlu1 %v406_v22, %s3207_s24 }
 0x11f   :  { %426 = vrot.lane.b32.xlu0 %v399_v24, %s3207_s24 }
 0x121   :  { %v404_v26 = vpop.permute.xlu0 %403 }
 0x122   :  { %v410_v27 = vsel %vm306_vm6, %v401_v20, %v404_v26  ;;  %v241_v20 = vld [vmem:[#allocation6 + $0x8] sm:$0xff] }
 0x123   :  { %428 = vrot.lane.b32.xlu0 %v410_v27, %s3207_s24  ;;  %v388_v33 = vpop.permute.xlu1 %387 }
 0x125   :  { %v390_v29 = vpop.permute.xlu0 %389 }
 0x126   :  { %v409_v31 = vsel %vm306_vm6, %v390_v29, %v3612_v42  ;;  %v248_v42 = vld [vmem:[%s5484_s5] sm:$0xff] }
 0x127   :  { %422 = vrot.lane.b32.xlu1 %v409_v31, %s3207_s24  ;;  %316 = vrot.lane.b32.xlu0 %v3731_v28, %s3205_s28  ;;  %v383_v37 = vpop.permute.xlu1 %382  ;;  %v245_v29 = vld [vmem:[#allocation8 + $0x8] sm:$0xff] }
 0x128   :  { %v408_v38 = vsel %vm306_vm6, %v3647_v53, %v383_v37 }
 0x129   :  { %v385_v36 = vpop.permute.xlu0 %384 }
 0x12b   :  { %420 = vrot.lane.b32.xlu1 %v388_v33, %s3207_s24  ;;  %312 = vrot.lane.b32.xlu0 %v309_v34, %s3204_s16  ;;  %v336_v53 = vpop.permute.xlu1 %335 }
 0x12d   :  { %v332_v54 = vpop.permute.xlu0 %331 }
 0x12e   :  { %v343_v62 = vsel %vm306_vm6, %v332_v54, %v336_v53 }
 0x12f   :  { %418 = vrot.lane.b32.xlu1 %v385_v36, %s3207_s24  ;;  %310 = vrot.lane.b32.xlu0 %v307_v32, %s3204_s16 }
 0x131   :  { %v319_v56 = vpop.permute.xlu0 %318 }
 0x132   :  { %v342_v6 = vsel %vm306_vm6, %v319_v56, %v3694_v10 }
 0x133   :  { %416 = vrot.lane.b32.xlu1 %v408_v38, %s3207_s24  ;;  %414 = vrot.lane.b32.xlu0 %v3653_v55, %s3207_s24  ;;  %v330_v55 = vpop.permute.xlu1 %329 }
 0x135   :  { %v338_v58 = vpop.permute.xlu0 %337 }
 0x137   :  { %458 = vperm.xlu1 %3143, %v243_v39   ;;  %453 = vperm.xlu0 %3144, %v242_v40   ;;  %v425_v57 = vpop.permute.xlu1 %424 }
 0x138   :  { %v447_v5 = vsel %vm441_vm8, %v3714_v18, %v425_v57 }
 0x13b   :  { %547 = vperm.xlu1 %3143, %v246_v41   ;;  %641 = vperm.xlu0 %3144, %v248_v42   ;;  %v658_v41 = vlaneseq }
 0x13f   :  { %552 = vperm.xlu1 %3143, %v247_v43   ;;  %655 = vperm.xlu0 %3144, %v250_v44  }
 0x143   :  { %666 = vperm.xlu1 %3143, %v249_v45   ;;  %820 = vrot.lane.b32.xlu0 %v729_v46, %s3208_s27 }
 0x147   :  { %679 = vperm.xlu1 %3143, %v251_v47   ;;  %944 = vrot.lane.b32.xlu0 %v2763_v48, %s3205_s28 }
 0x14b   :  { %736 = vrot.lane.b32.xlu1 %v720_v49, %s3205_s28  ;;  %956 = vrot.lane.b32.xlu0 %v2766_v50, %s3209_s30 }
 0x14f   :  { %748 = vrot.lane.b32.xlu1 %v723_v51, %s3209_s30  ;;  %998 = vrot.lane.b32.xlu0 %v2763_v48, %s3210_s19 }
 0x153   :  { %760 = vrot.lane.b32.xlu1 %v3793_v52, %s3211_s21  ;;  %1007 = vrot.lane.b32.xlu0 %v2766_v50, %s3212_s22 }
 0x157   :  { %772 = vrot.lane.b32.xlu1 %v729_v46, %s3213_s2  ;;  %v659_v46 = vshrl.u32 %v658_v41, 7 }
 0x15b   :  { %793 = vrot.lane.b32.xlu1 %v720_v49, %s3210_s19 }
 0x15f   :  { %802 = vrot.lane.b32.xlu1 %v723_v51, %s3212_s22  ;;  %v660_v51 = vsub.s32 0, %v659_v46 }
 0x190   :  { %v431_v59 = vpop.permute.xlu1 %430 }
 0x191   :  { %v427_v60 = vpop.permute.xlu0 %426  ;;  %v450_v61 = vsel %vm441_vm8, %v338_v58, %v431_v59 }
 0x192   :  { %2952 = vmatprep.subr.mxu0 %v450_v61  ;;  %v448_v1 = vsel %vm441_vm8, %v330_v55, %v427_v60 }
 0x193   :  { %2953 = vmatpush3.msra.mxu0 %v450_v61 }
 0x195   :  { %v429_v63 = vpop.permute.xlu0 %428 }
 0x196   :  { %v449_v0 = vsel %vm441_vm8, %v343_v62, %v429_v63 }
 0x197   :  { %2954 = vmatprep.subr.mxu0 %v449_v0 }
 0x198   :  { %2955 = vmatpush3.msra.mxu0 %v449_v0 }
 0x199   :  { %v423_v2 = vpop.permute.xlu1 %422  ;;  %2956 = vmatprep.subr.mxu0 %v448_v1  ;;  %v317_v3 = vpop.permute.xlu0 %316 }
 0x19a   :  { %2957 = vmatpush3.msra.mxu0 %v448_v1  ;;  %v446_v7 = vsel %vm441_vm8, %v342_v6, %v423_v2  ;;  %v2769_v6 = vld [vmem:[%s5493_s17 + $0x98] sm:$0xff] }
 0x19b   :  { %2958 = vmatprep.subr.mxu0 %v447_v5 }
 0x19c   :  { %2959 = vmatpush3.msra.mxu0 %v447_v5  ;;  %v2772_v5 = vld [vmem:[%s5493_s17 + $0xb0] sm:$0xff] }
 0x19d   :  { %v421_v8 = vpop.permute.xlu1 %420  ;;  %2960 = vmatprep.subr.mxu0 %v446_v7  ;;  %v313_v9 = vpop.permute.xlu0 %312 }
 0x19e   :  { %2961 = vmatpush3.msra.mxu0 %v446_v7  ;;  %v445_v11 = vsel %vm441_vm8, %v317_v3, %v421_v8 }
 0x19f   :  { %2962 = vmatprep.subr.mxu0 %v445_v11 }
 0x1a0   :  { %2963 = vmatpush3.msra.mxu0 %v445_v11 }
 0x1a1   :  { %v419_v12 = vpop.permute.xlu1 %418  ;;  %v311_v13 = vpop.permute.xlu0 %310 }
 0x1a2   :  { %v444_v14 = vsel %vm441_vm8, %v313_v9, %v419_v12  ;;  %v341_v10 = vsel %vm306_vm6, %v3707_v17, %v311_v13 }
 0x1a3   :  { %2964 = vmatprep.subr.mxu0 %v444_v14 }
 0x1a4   :  { %2965 = vmatpush3.msra.mxu0 %v444_v14 }
 0x1a5   :  { %v417_v15 = vpop.permute.xlu1 %416  ;;  %v415_v16 = vpop.permute.xlu0 %414 }
 0x1a6   :  { %v443_v18 = vsel %vm441_vm8, %v341_v10, %v417_v15  ;;  %v442_v19 = vsel %vm441_vm8, %v3731_v28, %v415_v16 }
 0x1a7   :  { %2966 = vmatprep.subr.mxu0 %v443_v18 }
 0x1a8   :  { %2967 = vmatpush3.msra.mxu0 %v443_v18 }
 0x1a9   :  { %2968 = vmatprep.subr.mxu0 %v442_v19 }
 0x1aa   :  { %2969 = vmatpush3.msra.mxu0 %v442_v19 }
 0x1ab   :  { %2971 = vmatmul.mubr.msk.f32.vlgmr.msra.gmra.mxu0 %vm461_vm7, %v241_v20 }
 0x1ac   :  { %2977 = vmatprep.mubr.msk.f32.mxu0 %vm555_vm9, %v244_v21 }
 0x1b2   :  { %v3819_v22 = vpop.permute.xlu1 %458  ;;  %v3822_v24 = vpop.permute.xlu0 %453 }
 0x1b6   :  { %v3907_v30 = vpop.permute.xlu1 %547  ;;  %v3916_v40 = vpop.permute.xlu0 %641 }
 0x1ba   :  { %v3909_v31 = vpop.permute.xlu1 %552  ;;  %v656_v61 = vpop.permute.xlu0 %655 }
 0x1bb   :  { %v3923_v62 = vrot.slane %v656_v61, %v660_v51 }
 0x1be   :  { %v3913_v37 = vpop.permute.xlu1 %666 }
 0x1c2   :  { %v680_v57 = vpop.permute.xlu1 %679 }
 0x1c3   :  { %v3921_v58 = vrot.slane %v680_v57, %v660_v51 }
 0x1c6   :  { %v3943_v7 = vpop.permute.xlu1 %736 }
 0x1ca   :  { %v3945_v8 = vpop.permute.xlu1 %748 }
 0x1ce   :  { %v3949_v9 = vpop.permute.xlu1 %760 }
 0x1d2   :  { %v3953_v12 = vpop.permute.xlu1 %772 }
 0x1d6   :  { %v3957_v14 = vpop.permute.xlu1 %793 }
 0x1da   :  { %v3961_v15 = vpop.permute.xlu1 %802 }
 0x1db   :  { %v828_v46 = vsel %vm779_vm13, %v3957_v14, %v3961_v15 }
 0x26b   :  { %v2972_v17 = vpop.f32.mrf.mxu0 }
 0x26c   :  { %v540_v23 = vadd.f32 %v2972_v17, %v3819_v22 }
 0x26d   :  { %v534_v25 = vpop.f32.mrf.mxu0 }
 0x26e   :  { %v544_v26 = vmax.f32 %v540_v23, 0.0  ;;  %v535_v27 = vadd.f32 %v534_v25, %v3822_v24 }
 0x270   :  { %v543_v28 = vmax.f32 %v535_v27, 0.0  ;;  %2973 = vmatprep.subr.mxu0 %v544_v26 }
 0x271   :  { %2974 = vmatpush3.msra.mxu0 %v544_v26 }
 0x272   :  { %2975 = vmatprep.subr.mxu0 %v543_v28 }
 0x273   :  { %2976 = vmatpush3.msra.mxu0 %v543_v28 }
 0x274   :  { %2978 = vmatmul.mubr.msk.f32.vlgmr.msra.gmra.mxu0 %vm555_vm9, %v245_v29  ;;  %3013 = vmatprep.subr.mxu0 %v3202_v4 }
 0x275   :  { %3017 = vmatprep.mubr.msk.f32.mxu0 %vm3221_vm1, %v3202_v4 }
 0x334   :  { %v2979_v32 = vpop.f32.mrf.mxu0 }
 0x335   :  { %v634_v33 = vadd.f32 %v2979_v32, %v3909_v31 }
 0x336   :  { %v628_v34 = vpop.f32.mrf.mxu0 }
 0x337   :  { %v638_v35 = vmax.f32 %v634_v33, 0.0  ;;  %v629_v36 = vadd.f32 %v628_v34, %v3907_v30 }
 0x339   :  { %v669_v38 = vmul.f32 %v3913_v37, %v638_v35  ;;  %v637_v39 = vmax.f32 %v629_v36, 0.0 }
 0x33b   :  { %v670_v42 = vsel %vm645_vm11, %v669_v38, 0.0  ;;  %v644_v43 = vmul.f32 %v3916_v40, %v637_v39 }
 0x33c   :  { %v671_v44 = vrot.slane %v670_v42, 4 }
 0x33d   :  { %v646_v45 = vsel %vm645_vm11, %v644_v43, 0.0 }
 0x33e   :  { %v672_v47 = vadd.f32 %v671_v44, %v670_v42  ;;  %v647_v48 = vrot.slane %v646_v45, 4 }
 0x340   :  { %v673_v49 = vrot.slane %v672_v47, 2  ;;  %v648_v50 = vadd.f32 %v647_v48, %v646_v45 }
 0x342   :  { %v674_v53 = vadd.f32 %v673_v49, %v672_v47  ;;  %v649_v54 = vrot.slane %v648_v50, 2 }
 0x344   :  { %v650_v55 = vadd.f32 %v649_v54, %v648_v50  ;;  %v675_v56 = vrot.slane %v674_v53, 1 }
 0x346   :  { %v676_v59 = vadd.f32 %v675_v56, %v674_v53  ;;  %v651_v60 = vrot.slane %v650_v55, 1 }
 0x348   :  { %v686_v63 = vadd.f32 %v3921_v58, %v676_v59  ;;  %v652_v0 = vadd.f32 %v651_v60, %v650_v55 }
 0x34a   :  { %v687_v1 = vmax.f32 %v686_v63, 0.0  ;;  %v662_v2 = vadd.f32 %v3923_v62, %v652_v0 }
 0x34c   :  { %698 = vrot.lane.b32.xlu1 %v687_v1, %s3209_s30  ;;  %v663_v3 = vmax.f32 %v662_v2, 0.0 }
 0x34e   :  { %689 = vrot.lane.b32.xlu0 %v663_v3, %s3209_s30 }
 0x350   :  { %712 = vrot.lane.b32.xlu1 %v687_v1, %s3214_s3 }
 0x352   :  { %705 = vrot.lane.b32.xlu0 %v663_v3, %s3214_s3 }
 0x354   :  { %811 = vrot.lane.b32.xlu1 %v3793_v52, %s3215_s6  ;;  %v3947_v52 = vpop.permute.xlu0 %820 }
 0x356   :  { %1025 = vrot.lane.b32.xlu0 %v2772_v5, %s3208_s27 }
 0x358   :  { %968 = vrot.lane.b32.xlu1 %v2769_v6, %s3211_s21  ;;  %v3951_v11 = vpop.permute.xlu0 %944 }
 0x35c   :  { %980 = vrot.lane.b32.xlu1 %v2772_v5, %s3213_s2  ;;  %v3955_v13 = vpop.permute.xlu0 %956 }
 0x360   :  { %1016 = vrot.lane.b32.xlu1 %v2769_v6, %s3215_s6  ;;  %v3959_v10 = vpop.permute.xlu0 %998 }
 0x364   :  { %v3963_v16 = vpop.permute.xlu0 %1007 }
 0x365   :  { %v1033_v49 = vsel %vm779_vm13, %v3959_v10, %v3963_v16 }
 0x3be   :  { %v699_v18 = vpop.permute.xlu1 %698 }
 0x3bf   :  { %701 = vst.msk [vmem:[%s5493_s17 + $0x12] sm:$0x1] %vm692_vm12, %v699_v18  ;;  %702 = vst.msk [vmem:[%s5493_s17 + $0x2a] sm:$0x1] %vm692_vm12, %v699_v18 }
 0x3c0   :  { %703 = vst.msk [vmem:[%s5493_s17 + $0x42] sm:$0x1] %vm692_vm12, %v699_v18  ;;  %704 = vst.msk [vmem:[%s5493_s17 + $0x5a] sm:$0x1] %vm692_vm12, %v699_v18  ;;  %v690_v19 = vpop.permute.xlu0 %689 }
 0x3c1   :  { %693 = vst.msk [vmem:[%s5493_s17 + $0x1] sm:$0x1] %vm692_vm12, %v690_v19  ;;  %694 = vst.msk [vmem:[%s5493_s17 + $0x19] sm:$0x1] %vm692_vm12, %v690_v19 }
 0x3c2   :  { %695 = vst.msk [vmem:[%s5493_s17 + $0x31] sm:$0x1] %vm692_vm12, %v690_v19  ;;  %696 = vst.msk [vmem:[%s5493_s17 + $0x49] sm:$0x1] %vm692_vm12, %v690_v19  ;;  %v713_v20 = vpop.permute.xlu1 %712 }
 0x3c3   :  { %2758 = vst.msk [vmem:[%s5493_s17 + $0x72] sm:$0x1] %vm692_vm12, %v713_v20  ;;  %2759 = vst.msk [vmem:[%s5493_s17 + $0x8a] sm:$0x1] %vm692_vm12, %v713_v20 }
 0x3c4   :  { %2760 = vst.msk [vmem:[%s5493_s17 + $0xa2] sm:$0x1] %vm692_vm12, %v713_v20  ;;  %2761 = vst.msk [vmem:[%s5493_s17 + $0xba] sm:$0x1] %vm692_vm12, %v713_v20  ;;  %v706_v21 = vpop.permute.xlu0 %705 }
 0x3c5   :  { %2754 = vst.msk [vmem:[%s5493_s17 + $0x61] sm:$0x1] %vm692_vm12, %v706_v21  ;;  %2755 = vst.msk [vmem:[%s5493_s17 + $0x79] sm:$0x1] %vm692_vm12, %v706_v21 }
 0x3c6   :  { %2756 = vst.msk [vmem:[%s5493_s17 + $0x91] sm:$0x1] %vm692_vm12, %v706_v21  ;;  %2757 = vst.msk [vmem:[%s5493_s17 + $0xa9] sm:$0x1] %vm692_vm12, %v706_v21  ;;  %v724_v17 = vld [vmem:[%s5493_s17 + $0x28] sm:$0xf]  ;;  %v812_v42 = vpop.permute.xlu1 %811 }
 0x3c7   :  { %v721_v23 = vld [vmem:[%s5493_s17 + $0x10] sm:$0xf]  ;;  %750 = vrot.lane.b32.xlu1 %v724_v17, %s3209_s30  ;;  %v730_v25 = vld [vmem:[%s5493_s17 + $0x58] sm:$0xf]  ;;  %v727_v26 = vld [vmem:[%s5493_s17 + $0x40] sm:$0xf]  ;;  %v831_v47 = vsel %vm5500_vm14, %v828_v46, %v812_v42 }
 0x3c8   :  { %738 = vrot.lane.b32.xlu0 %v721_v23, %s3205_s28  ;;  %v719_v34 = vld [vmem:[%s5493_s17] sm:$0xff]  ;;  %v722_v36 = vld [vmem:[%s5493_s17 + $0x18] sm:$0xff]  ;;  %v4118_v50 = vsel %vm5499_vm15, %v831_v47, %v3947_v52  ;;  %v1026_v53 = vpop.permute.xlu0 %1025 }
 0x3c9   :  { %v728_v33 = vld [vmem:[%s5493_s17 + $0x48] sm:$0xff]  ;;  %v725_v39 = vld [vmem:[%s5493_s17 + $0x30] sm:$0xff] }
 0x3ca   :  { %v2767_v27 = vld [vmem:[%s5493_s17 + $0x88] sm:$0xf]  ;;  %v2764_v28 = vld [vmem:[%s5493_s17 + $0x70] sm:$0xf]  ;;  %v969_v44 = vpop.permute.xlu1 %968 }
 0x3cb   :  { %774 = vrot.lane.b32.xlu1 %v730_v25, %s3213_s2  ;;  %v2773_v29 = vld [vmem:[%s5493_s17 + $0xb8] sm:$0xf]  ;;  %v2770_v32 = vld [vmem:[%s5493_s17 + $0xa0] sm:$0xf] }
 0x3cc   :  { %762 = vrot.lane.b32.xlu0 %v727_v26, %s3211_s21  ;;  %v2762_v35 = vld [vmem:[%s5493_s17 + $0x60] sm:$0xff]  ;;  %v2765_v38 = vld [vmem:[%s5493_s17 + $0x78] sm:$0xff] }
 0x3cd   :  { %v2771_v41 = vld [vmem:[%s5493_s17 + $0xa8] sm:$0xff]  ;;  %v2768_v43 = vld [vmem:[%s5493_s17 + $0x90] sm:$0xff] }
 0x3ce   :  { %v981_v45 = vpop.permute.xlu1 %980 }
 0x3cf   :  { %804 = vrot.lane.b32.xlu1 %v724_v17, %s3212_s22  ;;  %v988_v17 = vsel %vm779_vm13, %v3951_v11, %v3955_v13 }
 0x3d0   :  { %795 = vrot.lane.b32.xlu0 %v721_v23, %s3210_s19 }
 0x3d2   :  { %v1017_v48 = vpop.permute.xlu1 %1016 }
 0x3d3   :  { %822 = vrot.lane.b32.xlu1 %v730_v25, %s3208_s27  ;;  %v1036_v51 = vsel %vm5500_vm14, %v1033_v49, %v1017_v48  ;;  %v991_v25 = vsel %vm5500_vm14, %v988_v17, %v969_v44 }
 0x3d4   :  { %813 = vrot.lane.b32.xlu0 %v727_v26, %s3215_s6  ;;  %v4124_v54 = vsel %vm5499_vm15, %v1036_v51, %v1026_v53  ;;  %v881_v26 = vrot.slane %v4118_v50, 1 }
 0x3d7   :  { %958 = vrot.lane.b32.xlu1 %v2767_v27, %s3209_s30 }
 0x3d8   :  { %946 = vrot.lane.b32.xlu0 %v2764_v28, %s3205_s28 }
 0x3db   :  { %982 = vrot.lane.b32.xlu1 %v2773_v29, %s3213_s2 }
 0x3dc   :  { %970 = vrot.lane.b32.xlu0 %v2770_v32, %s3211_s21 }
 0x3df   :  { %1009 = vrot.lane.b32.xlu1 %v2767_v27, %s3212_s22 }
 0x3e0   :  { %1000 = vrot.lane.b32.xlu0 %v2764_v28, %s3210_s19  ;;  %v4161_v28 = vsel %vm5499_vm15, %v991_v25, %v981_v45 }
 0x3e3   :  { %818 = vrot.lane.b32.xlu1 %v728_v33, %s3208_s27 }
 0x3e4   :  { %734 = vrot.lane.b32.xlu0 %v719_v34, %s3205_s28 }
 0x3e7   :  { %942 = vrot.lane.b32.xlu1 %v2762_v35, %s3205_s28 }
 0x3e8   :  { %746 = vrot.lane.b32.xlu0 %v722_v36, %s3209_s30 }
 0x3eb   :  { %954 = vrot.lane.b32.xlu1 %v2765_v38, %s3209_s30 }
 0x3ec   :  { %758 = vrot.lane.b32.xlu0 %v725_v39, %s3211_s21 }
 0x3ef   :  { %996 = vrot.lane.b32.xlu1 %v2762_v35, %s3210_s19 }
 0x3f0   :  { %770 = vrot.lane.b32.xlu0 %v728_v33, %s3213_s2 }
 0x3f3   :  { %1005 = vrot.lane.b32.xlu1 %v2765_v38, %s3212_s22 }
 0x3f4   :  { %791 = vrot.lane.b32.xlu0 %v719_v34, %s3210_s19  ;;  %s3217_s19 = smov 24  }
 0x3f7   :  { %1023 = vrot.lane.b32.xlu1 %v2771_v41, %s3208_s27 }
 0x3f8   :  { %800 = vrot.lane.b32.xlu0 %v722_v36, %s3212_s22  ;;  %s3219_s22 = smov 60  }
 0x3fb   :  { %1027 = vrot.lane.b32.xlu1 %v2773_v29, %s3208_s27  ;;  %s3216_s27 = smov 36  }
 0x3fc   :  { %809 = vrot.lane.b32.xlu0 %v725_v39, %s3215_s6 }
 0x400   :  { %966 = vrot.lane.b32.xlu0 %v2768_v43, %s3211_s21  ;;  %s3218_s21 = smov 48  }
 0x404   :  { %978 = vrot.lane.b32.xlu0 %v2771_v41, %s3213_s2  ;;  %s3220_s2 = smov 12  }
 0x408   :  { %1014 = vrot.lane.b32.xlu0 %v2768_v43, %s3215_s6 }
 0x40c   :  { %1018 = vrot.lane.b32.xlu0 %v2770_v32, %s3215_s6  ;;  %v1045_v32 = vrot.slane %v4161_v28, 1 }
 0x410   :  { %873 = vrot.lane.b32.xlu0 %v4118_v50, %s3216_s27 }
 0x414   :  { %1077 = vrot.lane.b32.xlu0 %v4124_v54, %s3216_s27 }
 0x439   :  { %v751_v55 = vpop.permute.xlu1 %750 }
 0x43a   :  { %v739_v56 = vpop.permute.xlu0 %738 }
 0x43b   :  { %v782_v57 = vsel %vm779_vm13, %v739_v56, %v751_v55 }
 0x43d   :  { %v775_v59 = vpop.permute.xlu1 %774 }
 0x43e   :  { %v763_v60 = vpop.permute.xlu0 %762 }
 0x43f   :  { %v786_v61 = vsel %vm5500_vm14, %v782_v57, %v763_v60  ;;  %v781_v60 = vsel %vm779_vm13, %v3943_v7, %v3945_v8 }
 0x440   :  { %v4131_v63 = vsel %vm5499_vm15, %v786_v61, %v775_v59  ;;  %v4195_v59 = vld [vmem:[%s5487_s9 + $0x40] sm:$0xff] }
 0x441   :  { %v857_v0 = vrot.slane %v4131_v63, 2  ;;  %v805_v1 = vpop.permute.xlu1 %804  ;;  %v843_v55 = vrot.slane %v4131_v63, 1  ;;  %2981 = vmatpush3.msra.mxu1 %v4195_v59 }
 0x442   :  { %v796_v2 = vpop.permute.xlu0 %795  ;;  %2982 = vmatprep.subr.mxu1 %v3202_v4 }
 0x443   :  { %863 = vrot.lane.b32.xlu1 %v857_v0, %s3217_s19  ;;  %v829_v3 = vsel %vm779_vm13, %v796_v2, %v805_v1  ;;  %v4204_v1 = vld [vmem:[%s5487_s9 + $0x38] sm:$0xff]  ;;  %v785_v2 = vsel %vm5500_vm14, %v781_v60, %v3949_v9  ;;  %v4223_v9 = vld [vmem:[%s5487_s9 + $0x30] sm:$0xff] }
 0x444   :  { %2983 = vmatpush3.msra.mxu1 %v4204_v1 }
 0x445   :  { %v823_v5 = vpop.permute.xlu1 %822  ;;  %2984 = vmatprep.subr.mxu1 %v3202_v4 }
 0x446   :  { %v814_v6 = vpop.permute.xlu0 %813  ;;  %2985 = vmatpush3.msra.mxu1 %v4223_v9 }
 0x447   :  { %v832_v52 = vsel %vm5500_vm14, %v829_v3, %v814_v6  ;;  %v4212_v6 = vsel %vm5499_vm15, %v785_v2, %v3953_v12  ;;  %2986 = vmatprep.subr.mxu1 %v3202_v4 }
 0x448   :  { %v4140_v14 = vsel %vm5499_vm15, %v832_v52, %v823_v5  ;;  %v4228_v52 = vld [vmem:[%s5487_s9 + $0x28] sm:$0xff]  ;;  %v841_v12 = vrot.slane %v4212_v6, 1 }
 0x449   :  { %v883_v10 = vrot.slane %v4140_v14, 1  ;;  %875 = vrot.lane.b32.xlu0 %v4140_v14, %s3216_s27  ;;  %v959_v15 = vpop.permute.xlu1 %958  ;;  %v897_v18 = vrot.slane %v4140_v14, 2  ;;  %2987 = vmatpush3.msra.mxu1 %v4228_v52 }
 0x44a   :  { %v947_v16 = vpop.permute.xlu0 %946  ;;  %v844_v25 = vsel %vm5498_vm0, %v841_v12, %v843_v55  ;;  %2988 = vmatprep.subr.mxu1 %v3202_v4 }
 0x44b   :  { %889 = vrot.lane.b32.xlu1 %v883_v10, %s3218_s21  ;;  %v989_v19 = vsel %vm779_vm13, %v947_v16, %v959_v15  ;;  %v884_v29 = vsel %vm5498_vm0, %v881_v26, %v883_v10 }
 0x44d   :  { %v983_v20 = vpop.permute.xlu1 %982 }
 0x44e   :  { %v971_v21 = vpop.permute.xlu0 %970 }
 0x44f   :  { %v992_v23 = vsel %vm5500_vm14, %v989_v19, %v971_v21  ;;  %903 = vrot.lane.b32.xlu1 %v897_v18, %s3219_s22 }
 0x450   :  { %v4158_v27 = vsel %vm5499_vm15, %v992_v23, %v983_v20 }
 0x451   :  { %v1047_v11 = vrot.slane %v4158_v27, 1  ;;  %v1010_v33 = vpop.permute.xlu1 %1009 }
 0x452   :  { %v1001_v13 = vpop.permute.xlu0 %1000 }
 0x453   :  { %887 = vrot.lane.b32.xlu1 %v884_v29, %s3218_s21  ;;  %v1048_v35 = vsel %vm5498_vm0, %v1045_v32, %v1047_v11  ;;  %v1034_v10 = vsel %vm779_vm13, %v1001_v13, %v1010_v33  ;;  %v4251_v13 = vld [vmem:[%s5487_s9 + $0x20] sm:$0xff]  ;;  %v1085_v29 = vrot.slane %v4124_v54, 1 }
 0x454   :  { %2989 = vmatpush3.msra.mxu1 %v4251_v13 }
 0x455   :  { %v819_v38 = vpop.permute.xlu1 %818  ;;  %2990 = vmatprep.subr.mxu1 %v3202_v4 }
 0x456   :  { %v735_v34 = vpop.permute.xlu0 %734 }
 0x457   :  { %1051 = vrot.lane.b32.xlu1 %v1048_v35, %s3220_s2  ;;  %v855_v35 = vrot.slane %v4212_v6, 2 }
 0x459   :  { %v4175_v41 = vpop.permute.xlu1 %942 }
 0x45a   :  { %v747_v36 = vpop.permute.xlu0 %746 }
 0x45b   :  { %v780_v15 = vsel %vm779_vm13, %v735_v34, %v747_v36  ;;  %v4260_v34 = vld [vmem:[%s5487_s9 + $0x18] sm:$0xff] }
 0x45c   :  { %2991 = vmatpush3.msra.mxu1 %v4260_v34 }
 0x45d   :  { %v4177_v44 = vpop.permute.xlu1 %954  ;;  %2992 = vmatprep.subr.mxu1 %v3202_v4 }
 0x45e   :  { %v759_v39 = vpop.permute.xlu0 %758 }
 0x45f   :  { %v784_v19 = vsel %vm5500_vm14, %v780_v15, %v759_v39  ;;  %v858_v39 = vsel %vm284_vm5, %v855_v35, %v857_v0 }
 0x461   :  { %v997_v46 = vpop.permute.xlu1 %996 }
 0x462   :  { %v771_v42 = vpop.permute.xlu0 %770 }
 0x463   :  { %v4241_v17 = vsel %vm5499_vm15, %v784_v19, %v771_v42  ;;  %v4277_v42 = vld [vmem:[%s5487_s9 + $0x10] sm:$0xff] }
 0x464   :  { %v854_v36 = vrot.slane %v4241_v17, 2  ;;  %2993 = vmatpush3.msra.mxu1 %v4277_v42 }
 0x465   :  { %v1006_v56 = vpop.permute.xlu1 %1005  ;;  %2994 = vmatprep.subr.mxu1 %v3202_v4 }
 0x466   :  { %v792_v43 = vpop.permute.xlu0 %791  ;;  %v1032_v3 = vsel %vm779_vm13, %v997_v46, %v1006_v56  ;;  %v856_v46 = vsel %vm284_vm5, %v854_v36, %v855_v35  ;;  %v987_v56 = vsel %vm779_vm13, %v4175_v41, %v4177_v44 }
 0x469   :  { %v1024_v61 = vpop.permute.xlu1 %1023 }
 0x46a   :  { %v801_v45 = vpop.permute.xlu0 %800 }
 0x46b   :  { %v827_v47 = vsel %vm779_vm13, %v792_v43, %v801_v45  ;;  %v895_v43 = vrot.slane %v4118_v50, 2  ;;  %v4286_v45 = vld [vmem:[%s5487_s9 + $0x8] sm:$0xff] }
 0x46c   :  { %2995 = vmatpush3.msra.mxu1 %v4286_v45 }
 0x46d   :  { %v1028_v20 = vpop.permute.xlu1 %1027  ;;  %2996 = vmatprep.subr.mxu1 %v3202_v4 }
 0x46e   :  { %v810_v48 = vpop.permute.xlu0 %809 }
 0x46f   :  { %v830_v49 = vsel %vm5500_vm14, %v827_v47, %v810_v48  ;;  %v1061_v47 = vrot.slane %v4158_v27, 2  ;;  %v898_v48 = vsel %vm284_vm5, %v895_v43, %v897_v18 }
 0x470   :  { %v4182_v51 = vsel %vm5499_vm15, %v830_v49, %v819_v38  ;;  %v4300_v49 = vld [vmem:[%s5487_s9] sm:$0xff] }
 0x471   :  { %871 = vrot.lane.b32.xlu0 %v4182_v51, %s3216_s27  ;;  %v880_v0 = vrot.slane %v4182_v51, 1  ;;  %2997 = vmatpush3.msra.mxu1 %v4300_v49  ;;  %v894_v14 = vrot.slane %v4182_v51, 2 }
 0x472   :  { %v4186_v53 = vpop.permute.xlu0 %966 }
 0x473   :  { %v990_v18 = vsel %vm5500_vm14, %v987_v56, %v4186_v53  ;;  %v882_v60 = vsel %vm5498_vm0, %v880_v0, %v881_v26  ;;  %v896_v53 = vsel %vm284_vm5, %v894_v14, %v895_v43 }
 0x475   :  { %849 = vrot.lane.b32.xlu0 %v843_v55, %s3220_s2  ;;  %v1059_v55 = vrot.slane %v4161_v28, 2 }
 0x476   :  { %v4190_v57 = vpop.permute.xlu0 %978 }
 0x477   :  { %v4321_v41 = vsel %vm5499_vm15, %v990_v18, %v4190_v57  ;;  %v1062_v44 = vsel %vm284_vm5, %v1059_v55, %v1061_v47 }
 0x478   :  { %v1044_v51 = vrot.slane %v4321_v41, 1  ;;  %v1058_v26 = vrot.slane %v4321_v41, 2 }
 0x47a   :  { %v1015_v5 = vpop.permute.xlu0 %1014  ;;  %v1046_v57 = vsel %vm5498_vm0, %v1044_v51, %v1045_v32 }
 0x47b   :  { %v1035_v7 = vsel %vm5500_vm14, %v1032_v3, %v1015_v5  ;;  %v1099_v3 = vrot.slane %v4124_v54, 2 }
 0x47c   :  { %v4217_v8 = vsel %vm5499_vm15, %v1035_v7, %v1024_v61  ;;  %v840_v61 = vrot.slane %v4241_v17, 1  ;;  %v1060_v7 = vsel %vm284_vm5, %v1058_v26, %v1059_v55 }
 0x47d   :  { %1075 = vrot.lane.b32.xlu0 %v4217_v8, %s3216_s27  ;;  %v1098_v2 = vrot.slane %v4217_v8, 2  ;;  %v1084_v5 = vrot.slane %v4217_v8, 1 }
 0x47e   :  { %v1019_v16 = vpop.permute.xlu0 %1018  ;;  %v842_v50 = vsel %vm5498_vm0, %v840_v61, %v841_v12 }
 0x47f   :  { %v1037_v21 = vsel %vm5500_vm14, %v1034_v10, %v1019_v16  ;;  %v1100_v12 = vsel %vm284_vm5, %v1098_v2, %v1099_v3  ;;  %v1086_v10 = vsel %vm5498_vm0, %v1084_v5, %v1085_v29  ;;  %vm5501_vm14 = vcmask 1041408  }
 0x480   :  { %v4244_v23 = vsel %vm5499_vm15, %v1037_v21, %v1028_v20  ;;  %vm5502_vm15 = vcmask 490496  }
 0x481   :  { %v1087_v33 = vrot.slane %v4244_v23, 1  ;;  %847 = vrot.lane.b32.xlu0 %v844_v25, %s3220_s2  ;;  %v1101_v32 = vrot.slane %v4244_v23, 2 }
 0x483   :  { %v1088_v38 = vsel %vm5498_vm0, %v1085_v29, %v1087_v33  ;;  %v1102_v54 = vsel %vm284_vm5, %v1099_v3, %v1101_v32  ;;  %vm5504_vm0 = vcmask 392192  }
 0x484   :  { %1091 = vrot.lane.b32.xlu1 %v1088_v38, %s3218_s21 }
 0x485   :  { %861 = vrot.lane.b32.xlu0 %v858_v39, %s3217_s19 }
 0x488   :  { %859 = vrot.lane.b32.xlu1 %v856_v46, %s3217_s19 }
 0x489   :  { %901 = vrot.lane.b32.xlu0 %v898_v48, %s3219_s22 }
 0x48c   :  { %885 = vrot.lane.b32.xlu1 %v882_v60, %s3218_s21 }
 0x48d   :  { %1065 = vrot.lane.b32.xlu0 %v1062_v44, %s3217_s19 }
 0x490   :  { %899 = vrot.lane.b32.xlu1 %v896_v53, %s3219_s22 }
 0x491   :  { %845 = vrot.lane.b32.xlu0 %v842_v50, %s3220_s2 }
 0x494   :  { %1049 = vrot.lane.b32.xlu1 %v1046_v57, %s3220_s2 }
 0x495   :  { %1053 = vrot.lane.b32.xlu0 %v1047_v11, %s3220_s2  ;;  %v874_v11 = vpop.permute.xlu0 %873 }
 0x498   :  { %1063 = vrot.lane.b32.xlu1 %v1060_v7, %s3217_s19 }
 0x499   :  { %1103 = vrot.lane.b32.xlu0 %v1100_v12, %s3219_s22  ;;  %v1078_v15 = vpop.permute.xlu0 %1077 }
 0x49c   :  { %1089 = vrot.lane.b32.xlu1 %v1086_v10, %s3218_s21 }
 0x49d   :  { %1067 = vrot.lane.b32.xlu0 %v1061_v47, %s3217_s19 }
 0x4a0   :  { %1105 = vrot.lane.b32.xlu1 %v1102_v54, %s3219_s22 }
 0x4a1   :  { %1093 = vrot.lane.b32.xlu0 %v1087_v33, %s3218_s21 }
 0x4a4   :  { %1079 = vrot.lane.b32.xlu1 %v4244_v23, %s3216_s27 }
 0x4a8   :  { %1107 = vrot.lane.b32.xlu1 %v1101_v32, %s3219_s22 }
 0x4b5   :  { %v864_v8 = vpop.permute.xlu1 %863 }
 0x4bb   :  { %v876_v19 = vpop.permute.xlu0 %875 }
 0x4bd   :  { %v890_v16 = vpop.permute.xlu1 %889 }
 0x4c1   :  { %v904_v21 = vpop.permute.xlu1 %903 }
 0x4c5   :  { %v888_v29 = vpop.permute.xlu1 %887 }
 0x4c9   :  { %v1052_v36 = vpop.permute.xlu1 %1051 }
 0x4ca   :  { %v1113_v2 = vsel %vm5506_vm2, %v4161_v28, %v1052_v36 }
 0x4e3   :  { %v872_v20 = vpop.permute.xlu0 %871 }
 0x4e7   :  { %v850_v25 = vpop.permute.xlu0 %849 }
 0x4e8   :  { %v911_v60 = vsel %vm5506_vm2, %v4131_v63, %v850_v25 }
 0x4e9   :  { %v915_v26 = vsel %vm5505_vm10, %v911_v60, %v864_v8  ;;  %v2774_v60 = vld [vmem:[%s5488_s10] ss:$0 sm:$0xff] }
 0x4ea   :  { %v918_v5 = vsel %vm645_vm11, %v915_v26, %v876_v19 }
 0x4ef   :  { %v1076_v35 = vpop.permute.xlu0 %1075 }
 0x4f3   :  { %v848_v38 = vpop.permute.xlu0 %847 }
 0x4f4   :  { %v910_v47 = vsel %vm5506_vm2, %v4212_v6, %v848_v38 }
 0x4f6   :  { %v1092_v39 = vpop.permute.xlu1 %1091 }
 0x4f7   :  { %v862_v43 = vpop.permute.xlu0 %861 }
 0x4f8   :  { %v914_v55 = vsel %vm5505_vm10, %v910_v47, %v862_v43 }
 0x4f9   :  { %v917_v61 = vsel %vm645_vm11, %v914_v55, %v874_v11  ;;  %v922_v11 = vsel %vm5504_vm0, %v918_v5, %v890_v16  ;;  %v3145_v55 = vld [vmem:[#allocation6] sm:$0xff] }
 0x4fa   :  { %v860_v33 = vpop.permute.xlu1 %859 }
 0x4fb   :  { %v902_v0 = vpop.permute.xlu0 %901 }
 0x4fe   :  { %v886_v46 = vpop.permute.xlu1 %885 }
 0x4ff   :  { %v1066_v23 = vpop.permute.xlu0 %1065 }
 0x500   :  { %v1116_v12 = vsel %vm5505_vm10, %v1113_v2, %v1066_v23 }
 0x501   :  { %v1119_v54 = vsel %vm645_vm11, %v1116_v12, %v1078_v15 }
 0x502   :  { %v900_v48 = vpop.permute.xlu1 %899  ;;  %v1122_v25 = vsel %vm5504_vm0, %v1119_v54, %v1092_v39 }
 0x503   :  { %v846_v56 = vpop.permute.xlu0 %845 }
 0x504   :  { %v909_v14 = vsel %vm5506_vm2, %v4241_v17, %v846_v56  ;;  %v921_v17 = vsel %vm5504_vm0, %v917_v61, %v888_v29  ;;  %v926_v29 = vsel %vm5502_vm15, %v922_v11, %v904_v21  ;;  %v4414_v56 = vld [vmem:[%s5489_s11 + $0x8] sm:$0xff] }
 0x505   :  { %v913_v18 = vsel %vm5505_vm10, %v909_v14, %v860_v33  ;;  %v925_v7 = vsel %vm5502_vm15, %v921_v17, %v902_v0  ;;  %3014 = vmatpush3.msra.mxu0 %v4414_v56  ;;  %v4421_v14 = vld [vmem:[%s5489_s11] sm:$0xff] }
 0x506   :  { %v916_v44 = vsel %vm645_vm11, %v913_v18, %v872_v20  ;;  %v1050_v51 = vpop.permute.xlu1 %1049  ;;  %3015 = vmatprep.subr.mxu0 %v3202_v4  ;;  %v2788_v18 = vld [vmem:[%s5492_s14] ss:$0 sm:$0xff]  ;;  %s3225_s14 = smov 112  }
 0x507   :  { %v1054_v6 = vpop.permute.xlu0 %1053  ;;  %v920_v53 = vsel %vm5504_vm0, %v916_v44, %v886_v46  ;;  %v1112_v63 = vsel %vm5506_vm2, %v4321_v41, %v1050_v51  ;;  %3016 = vmatpush3.msra.mxu0 %v4421_v14  ;;  %1417 = vrot.lane.b32.xlu0 %v2788_v18, %s3200_s15 }
 0x508   :  { %v924_v50 = vsel %vm5502_vm15, %v920_v53, %v900_v48  ;;  %v1114_v15 = vsel %vm5506_vm2, %v4158_v27, %v1054_v6  ;;  %3060 = vmatprep.subr.mxu0 %v3202_v4  ;;  %vm1558_vm2 = vcmask 154770  }
 0x509   :  { %2999 = vmatmul.mubr.msk.f32.vlgmr.msra.gmra.mxu1 %vm461_vm7, %v924_v50 }
 0x50a   :  { %v1064_v57 = vpop.permute.xlu1 %1063  ;;  %3001 = vmatprep.mubr.msk.f32.mxu1 %vm3221_vm1, %v3202_v4 }
 0x50b   :  { %v1115_v3 = vsel %vm5505_vm10, %v1112_v63, %v1064_v57  ;;  %v1104_v32 = vpop.permute.xlu0 %1103 }
 0x50c   :  { %v1118_v41 = vsel %vm645_vm11, %v1115_v3, %v1076_v35 }
 0x50d   :  { %3002 = vmatmul.mubr.msk.f32.gmra.mxu1 %vm461_vm7, %v925_v7 }
 0x50e   :  { %v1090_v10 = vpop.permute.xlu1 %1089  ;;  %3004 = vmatprep.mubr.msk.f32.mxu1 %vm3221_vm1, %v3202_v4 }
 0x50f   :  { %v1121_v28 = vsel %vm5504_vm0, %v1118_v41, %v1090_v10  ;;  %v1068_v36 = vpop.permute.xlu0 %1067 }
 0x510   :  { %v1124_v8 = vsel %vm5502_vm15, %v1121_v28, %v1104_v32  ;;  %v1117_v16 = vsel %vm5505_vm10, %v1114_v15, %v1068_v36  ;;  %vm1517_vm10 = vcmask 148624  }
 0x511   :  { %v1131_v19 = vrot.slane %v1124_v8, 6 }
 0x512   :  { %v1106_v20 = vpop.permute.xlu1 %1105 }
 0x513   :  { %v1125_v35 = vsel %vm5502_vm15, %v1122_v25, %v1106_v20  ;;  %v1137_v38 = vsel %vm5501_vm14, %v926_v29, %v1131_v19  ;;  %v1094_v0 = vpop.permute.xlu0 %1093 }
 0x514   :  { %v1132_v43 = vrot.slane %v1125_v35, 6  ;;  %3005 = vmatmul.mubr.msk.f32.gmra.mxu1 %vm461_vm7, %v1137_v38 }
 0x515   :  { %3007 = vmatprep.mubr.msk.f32.mxu1 %vm3221_vm1, %v3202_v4 }
 0x516   :  { %v1080_v33 = vpop.permute.xlu1 %1079  ;;  %v1133_v39 = vsel %vm5501_vm14, %v1131_v19, %v1132_v43 }
 0x517   :  { %v1120_v21 = vsel %vm645_vm11, %v1117_v16, %v1080_v33  ;;  %v4485_v33 = vld [vmem:[%s5491_s13] ss:$0 sm:$0xff] }
 0x518   :  { %3008 = vmatmul.mubr.msk.f32.gmra.mxu1 %vm461_vm7, %v1133_v39  ;;  %v1123_v23 = vsel %vm5504_vm0, %v1120_v21, %v1094_v0  ;;  %vm1536_vm0 = vcmask 15370  }
 0x519   :  { %3010 = vmatprep.mubr.msk.f32.mxu1 %vm3221_vm1, %v3202_v4 }
 0x51a   :  { %v1108_v46 = vpop.permute.xlu1 %1107 }
 0x51b   :  { %v1126_v27 = vsel %vm5502_vm15, %v1123_v23, %v1108_v46  ;;  %vm1379_vm15 = vcmask 64512  }
 0x51c   :  { %v1134_v47 = vrot.slane %v1126_v27, 6 }
 0x51e   :  { %v1135_v48 = vsel %vm5501_vm14, %v1132_v43, %v1134_v47  ;;  %vm5503_vm14 = vcmask 60416  }
 0x51f   :  { %3011 = vmatmul.mubr.msk.f32.gmra.mxu1 %vm461_vm7, %v1135_v48 }
 0x520   :  { %3050 = vmatprep.mubr.msk.f32.mxu1 %vm461_vm7, %v3145_v55 }
 0x579   :  { %v4471_v8 = vpop.permute.xlu0 %1417 }
 0x5c9   :  { %v1223_v61 = vpop.f32.mrf.mxu1 }
 0x5ca   :  { %v1224_v44 = vadd.f32 %v2774_v60, %v1223_v61 }
 0x5cb   :  { %v3000_v51 = vpop.f32.mrf.mxu1 }
 0x5cc   :  { %v1247_v6 = vmax.f32 %v1224_v44, 0.0 }
 0x5cd   :  { %v1228_v53 = vpop.f32.mrf.mxu1 }
 0x5ce   :  { %v1229_v50 = vadd.f32 %v2774_v60, %v1228_v53  ;;  %3018 = vmatmul.mubr.msk.f32.vlgmr.msra.gmra.mxu0 %vm555_vm9, %v1247_v6 }
 0x5cf   :  { %v3003_v26 = vpop.f32.mrf.mxu1  ;;  %3020 = vmatprep.mubr.msk.f32.mxu0 %vm3221_vm1, %v3202_v4  ;;  %3061 = vmatpush3.msra.mxu0 %v4195_v59 }
 0x5d0   :  { %v1248_v17 = vmax.f32 %v1229_v50, 0.0  ;;  %3062 = vmatprep.subr.mxu0 %v3202_v4 }
 0x5d1   :  { %3063 = vmatpush3.msra.mxu0 %v4204_v1 }
 0x5d2   :  { %3021 = vmatmul.mubr.msk.f32.gmra.mxu0 %vm555_vm9, %v1248_v17  ;;  %3064 = vmatprep.subr.mxu0 %v3202_v4 }
 0x5d3   :  { %3023 = vmatprep.mubr.msk.f32.mxu0 %vm3221_vm1, %v3202_v4  ;;  %3065 = vmatpush3.msra.mxu0 %v4223_v9 }
 0x5d4   :  { %v1233_v63 = vpop.f32.mrf.mxu1  ;;  %3066 = vmatprep.subr.mxu0 %v3202_v4 }
 0x5d5   :  { %v1234_v57 = vadd.f32 %v2774_v60, %v1233_v63  ;;  %3067 = vmatpush3.msra.mxu0 %v4228_v52  ;;  %v4501_v63 = vld [vmem:[#allocation5] ss:$0 sm:$0xff] }
 0x5d6   :  { %v3006_v59 = vpop.f32.mrf.mxu1  ;;  %3068 = vmatprep.subr.mxu0 %v3202_v4 }
 0x5d7   :  { %v1249_v2 = vmax.f32 %v1234_v57, 0.0  ;;  %3069 = vmatpush3.msra.mxu0 %v4251_v13 }
 0x5d8   :  { %v1238_v1 = vpop.f32.mrf.mxu1  ;;  %3070 = vmatprep.subr.mxu0 %v3202_v4 }
 0x5d9   :  { %v1239_v3 = vadd.f32 %v2774_v60, %v1238_v1  ;;  %3024 = vmatmul.mubr.msk.f32.gmra.mxu0 %vm555_vm9, %v1249_v2  ;;  %v4504_v1 = vld [vmem:[#allocation4] ss:$0 sm:$0xff] }
 0x5da   :  { %v3009_v5 = vpop.f32.mrf.mxu1  ;;  %3026 = vmatprep.mubr.msk.f32.mxu0 %vm3221_vm1, %v3202_v4  ;;  %3071 = vmatpush3.msra.mxu0 %v4260_v34 }
 0x5db   :  { %v1250_v9 = vmax.f32 %v1239_v3, 0.0  ;;  %3072 = vmatprep.subr.mxu0 %v3202_v4 }
 0x5dc   :  { %3073 = vmatpush3.msra.mxu0 %v4277_v42 }
 0x5dd   :  { %3027 = vmatmul.mubr.msk.f32.gmra.mxu0 %vm555_vm9, %v1250_v9  ;;  %3074 = vmatprep.subr.mxu0 %v3202_v4 }
 0x5de   :  { %3029 = vmatprep.mubr.msk.f32.mxu0 %vm3221_vm1, %v3202_v4  ;;  %3075 = vmatpush3.msra.mxu0 %v4286_v45  ;;  %v4467_v45 = vld [vmem:[%s5490_s12] ss:$0 sm:$0xff] }
 0x5df   :  { %v1243_v52 = vpop.f32.mrf.mxu1  ;;  %3076 = vmatprep.subr.mxu0 %v3202_v4 }
 0x5e0   :  { %v1244_v13 = vadd.f32 %v2774_v60, %v1243_v52  ;;  %3077 = vmatpush3.msra.mxu0 %v4300_v49 }
 0x5e1   :  { %v3012_v34 = vpop.f32.mrf.mxu1 }
 0x5e2   :  { %v1251_v7 = vmax.f32 %v1244_v13, 0.0 }
 0x5e4   :  { %3030 = vmatmul.mubr.msk.f32.gmra.mxu0 %vm555_vm9, %v1251_v7 }
 0x5e5   :  { %3078 = vmatprep.mubr.msk.f32.mxu0 %vm3221_vm1, %v3202_v4 }
 0x68e   :  { %v1339_v42 = vpop.f32.mrf.mxu0 }
 0x68f   :  { %v1340_v27 = vadd.f32 %v4467_v45, %v1339_v42 }
 0x690   :  { %v3019_v12 = vpop.f32.mrf.mxu0 }
 0x691   :  { %v1363_v55 = vmax.f32 %v1340_v27, 0.0 }
 0x692   :  { %v1344_v32 = vpop.f32.mrf.mxu0 }
 0x693   :  { %v1345_v54 = vadd.f32 %v4467_v45, %v1344_v32  ;;  %v1374_v61 = vmul.f32 %v4485_v33, %v1363_v55  ;;  %v1420_v50 = vmul.f32 %v4471_v8, %v1363_v55 }
 0x694   :  { %v3022_v10 = vpop.f32.mrf.mxu0 }
 0x695   :  { %v1364_v20 = vmax.f32 %v1345_v54, 0.0  ;;  %v1380_v53 = vsel %vm1379_vm15, %v1374_v61, 0.0 }
 0x697   :  { %v1421_v36 = vmul.f32 %v4471_v8, %v1364_v20  ;;  %v1375_v47 = vmul.f32 %v4485_v33, %v1364_v20 }
 0x699   :  { %v1349_v41 = vpop.f32.mrf.mxu0  ;;  %v1383_v18 = vsel %vm1379_vm15, %v1375_v47, 0.0 }
 0x69a   :  { %v1350_v49 = vadd.f32 %v4467_v45, %v1349_v41 }
 0x69b   :  { %v3025_v28 = vpop.f32.mrf.mxu0 }
 0x69c   :  { %v1365_v11 = vmax.f32 %v1350_v49, 0.0 }
 0x69d   :  { %v4473_v19 = vpop.f32.mrf.mxu0 }
 0x69e   :  { %v1422_v25 = vmul.f32 %v4471_v8, %v1365_v11  ;;  %v1376_v21 = vmul.f32 %v4485_v33, %v1365_v11 }
 0x69f   :  { %v3028_v29 = vpop.f32.mrf.mxu0 }
 0x6a0   :  { %1434 = vrot.lane.b32.xlu0 %v1422_v25, %s3222_s7  ;;  %v1386_v46 = vsel %vm1379_vm15, %v1376_v21, 0.0 }
 0x6a4   :  { %v1359_v35 = vpop.f32.mrf.mxu0  ;;  %1432 = vrot.lane.b32.xlu0 %v1421_v36, %s3222_s7 }
 0x6a5   :  { %v1360_v38 = vadd.f32 %v4467_v45, %v1359_v35 }
 0x6a6   :  { %v3031_v43 = vpop.f32.mrf.mxu0 }
 0x6a7   :  { %v1367_v15 = vmax.f32 %v1360_v38, 0.0 }
 0x6a9   :  { %v1424_v16 = vmul.f32 %v4471_v8, %v1367_v15  ;;  %v1378_v39 = vmul.f32 %v4485_v33, %v1367_v15 }
 0x6ab   :  { %1438 = vrot.lane.b32.xlu1 %v1424_v16, %s3222_s7  ;;  %v1393_v0 = vsel %vm5503_vm14, %v1378_v39, 0.0 }
 0x6cf   :  { %1394 = vadd.xlane.f32.xlu1 %v1393_v0 }
 0x6d3   :  { %1387 = vadd.xlane.f32.xlu1 %v1386_v46 }
 0x712   :  { %v1435_v23 = vpop.permute.xlu0 %1434 }
 0x713   :  { %v1451_v48 = vsel %vm1379_vm15, %v1435_v23, 0.0 }
 0x714   :  { %1452 = vadd.xlane.f32.xlu1 %v1451_v48 }
 0x716   :  { %v1433_v60 = vpop.permute.xlu0 %1432 }
 0x717   :  { %v1448_v44 = vsel %vm1379_vm15, %v1433_v60, 0.0 }
 0x718   :  { %1384 = vadd.xlane.f32.xlu1 %v1383_v18 }
 0x71c   :  { %1449 = vadd.xlane.f32.xlu1 %v1448_v44 }
 0x71d   :  { %v1439_v51 = vpop.permute.xlu1 %1438 }
 0x71e   :  { %v1457_v6 = vsel %vm5503_vm14, %v1439_v51, 0.0  ;;  %vm1491_vm14 = vcmask 9224  }
 0x71f   :  { %1458 = vadd.xlane.f32.xlu0 %v1457_v6 }
 0x720   :  { %1381 = vadd.xlane.f32.xlu1 %v1380_v53 }
 0x735   :  { %1430 = vrot.lane.b32.xlu0 %v1420_v50, %s3222_s7 }
 0x758   :  { %v1395_v26 = vpop.xlane.xlu1 %1394 }
 0x759   :  { %v1406_v54 = vadd.f32 %v4504_v1, %v1395_v26 }
 0x75b   :  { %v1411_v11 = vmax.f32 %v1406_v54, 0.0 }
 0x75c   :  { %v1388_v17 = vpop.xlane.xlu1 %1387 }
 0x75d   :  { %v1404_v3 = vadd.f32 %v4504_v1, %v1388_v17 }
 0x75f   :  { %v1409_v34 = vmax.f32 %v1404_v3, 0.0 }
 0x79d   :  { %v1453_v57 = vpop.xlane.xlu1 %1452 }
 0x79e   :  { %v1468_v7 = vadd.f32 %v4501_v63, %v1453_v57 }
 0x7a0   :  { %v1473_v42 = vmax.f32 %v1468_v7, 0.0 }
 0x7a1   :  { %v1385_v13 = vpop.xlane.xlu1 %1384 }
 0x7a2   :  { %v1403_v12 = vadd.f32 %v4504_v1, %v1385_v13 }
 0x7a4   :  { %v1408_v10 = vmax.f32 %v1403_v12, 0.0 }
 0x7a5   :  { %v1450_v32 = vpop.xlane.xlu1 %1449 }
 0x7a6   :  { %v1467_v41 = vadd.f32 %v4501_v63, %v1450_v32 }
 0x7a8   :  { %v1459_v59 = vpop.xlane.xlu0 %1458  ;;  %v1472_v28 = vmax.f32 %v1467_v41, 0.0 }
 0x7a9   :  { %v1470_v2 = vadd.f32 %v4501_v63, %v1459_v59  ;;  %v1382_v49 = vpop.xlane.xlu1 %1381 }
 0x7aa   :  { %v1402_v20 = vadd.f32 %v4504_v1, %v1382_v49 }
 0x7ab   :  { %v1475_v5 = vmax.f32 %v1470_v2, 0.0 }
 0x7ac   :  { %v1431_v9 = vpop.permute.xlu0 %1430  ;;  %v1407_v25 = vmax.f32 %v1402_v20, 0.0 }
 0x7ad   :  { %1554 = vrot.lane.b32.xlu0 %v1475_v5, %s3207_s24  ;;  %v1445_v52 = vsel %vm1379_vm15, %v1431_v9, 0.0 }
 0x7ae   :  { %1446 = vadd.xlane.f32.xlu1 %v1445_v52 }
 0x7b1   :  { %1483 = vrot.lane.b32.xlu0 %v1409_v34, %s3209_s30 }
 0x7b5   :  { %1509 = vrot.lane.b32.xlu0 %v1473_v42, %s3207_s24 }
 0x7b9   :  { %1481 = vrot.lane.b32.xlu0 %v1408_v10, %s3209_s30 }
 0x7bd   :  { %1507 = vrot.lane.b32.xlu0 %v1472_v28, %s3207_s24 }
 0x7bf   :  { %1532 = vrot.lane.b32.xlu1 %v1411_v11, %s3209_s30 }
 0x7c3   :  { %1479 = vrot.lane.b32.xlu1 %v1407_v25, %s3209_s30 }
 0x81f   :  { %v1555_v29 = vpop.permute.xlu0 %1554 }
 0x823   :  { %v1484_v36 = vpop.permute.xlu0 %1483 }
 0x824   :  { %1492 = vst.msk [vmem:[%s5493_s17 + $0x11] sm:$0x3] %vm1491_vm14, %v1484_v36  ;;  %1495 = vst.msk [vmem:[%s5493_s17 + $0x29] sm:$0x3] %vm1491_vm14, %v1484_v36 }
 0x825   :  { %1498 = vst.msk [vmem:[%s5493_s17 + $0x41] sm:$0x3] %vm1491_vm14, %v1484_v36  ;;  %1501 = vst.msk [vmem:[%s5493_s17 + $0x59] sm:$0x3] %vm1491_vm14, %v1484_v36  ;;  %vm1488_vm14 = vcmask 15368  }
 0x826   :  { %2790 = vst.msk [vmem:[%s5493_s17 + $0x5f] sm:$0xfc] %vm1536_vm0, %v1484_v36  ;;  %2793 = vst.msk [vmem:[%s5493_s17 + $0x77] sm:$0xfc] %vm1536_vm0, %v1484_v36 }
 0x827   :  { %2796 = vst.msk [vmem:[%s5493_s17 + $0x8f] sm:$0xfc] %vm1536_vm0, %v1484_v36  ;;  %2799 = vst.msk [vmem:[%s5493_s17 + $0xa7] sm:$0xfc] %vm1536_vm0, %v1484_v36  ;;  %v1510_v35 = vpop.permute.xlu0 %1509  ;;  %vm1514_vm0 = vcmask 154768  }
 0x828   :  { %1518 = vst.msk [vmem:[%s5493_s17 + $0x11] sm:$0x3] %vm1517_vm10, %v1510_v35  ;;  %1521 = vst.msk [vmem:[%s5493_s17 + $0x29] sm:$0x3] %vm1517_vm10, %v1510_v35 }
 0x829   :  { %1524 = vst.msk [vmem:[%s5493_s17 + $0x41] sm:$0x3] %vm1517_vm10, %v1510_v35  ;;  %1527 = vst.msk [vmem:[%s5493_s17 + $0x59] sm:$0x3] %vm1517_vm10, %v1510_v35  ;;  %vm1561_vm10 = vcmask 150672  }
 0x82a   :  { %2802 = vst.msk [vmem:[%s5493_s17 + $0x5f] sm:$0xfc] %vm1558_vm2, %v1510_v35  ;;  %2805 = vst.msk [vmem:[%s5493_s17 + $0x77] sm:$0xfc] %vm1558_vm2, %v1510_v35 }
 0x82b   :  { %2808 = vst.msk [vmem:[%s5493_s17 + $0x8f] sm:$0xfc] %vm1558_vm2, %v1510_v35  ;;  %2811 = vst.msk [vmem:[%s5493_s17 + $0xa7] sm:$0xfc] %vm1558_vm2, %v1510_v35  ;;  %v1482_v38 = vpop.permute.xlu0 %1481  ;;  %vm1539_vm2 = vcmask 11272  }
 0x82c   :  { %1490 = vst.msk [vmem:[%s5493_s17 + $0x9] sm:$0xff] %vm1488_vm14, %v1482_v38  ;;  %1494 = vst.msk [vmem:[%s5493_s17 + $0x21] sm:$0xff] %vm1488_vm14, %v1482_v38 }
 0x82d   :  { %1497 = vst.msk [vmem:[%s5493_s17 + $0x39] sm:$0xff] %vm1488_vm14, %v1482_v38  ;;  %1500 = vst.msk [vmem:[%s5493_s17 + $0x51] sm:$0xff] %vm1488_vm14, %v1482_v38 }
 0x82f   :  { %v1508_v43 = vpop.permute.xlu0 %1507 }
 0x830   :  { %1516 = vst.msk [vmem:[%s5493_s17 + $0x9] sm:$0xff] %vm1514_vm0, %v1508_v43  ;;  %1520 = vst.msk [vmem:[%s5493_s17 + $0x21] sm:$0xff] %vm1514_vm0, %v1508_v43 }
 0x831   :  { %1523 = vst.msk [vmem:[%s5493_s17 + $0x39] sm:$0xff] %vm1514_vm0, %v1508_v43  ;;  %1526 = vst.msk [vmem:[%s5493_s17 + $0x51] sm:$0xff] %vm1514_vm0, %v1508_v43  ;;  %v2815_v55 = vld [vmem:[%s5493_s17 + $0x79] sm:$0x7]  ;;  %v2814_v59 = vld [vmem:[%s5493_s17 + $0x61] sm:$0x7] }
 0x832   :  { %v2816_v6 = vld [vmem:[%s5493_s17 + $0x91] sm:$0x7]  ;;  %v1648_v53 = vrot.slane %v2815_v55, 5  ;;  %v2817_v57 = vld [vmem:[%s5493_s17 + $0xa9] sm:$0x7] }
 0x833   :  { %v1651_v2 = vrot.slane %v2816_v6, 2  ;;  %v1654_v13 = vrot.slane %v2817_v57, 7 }
 0x834   :  { %v1656_v5 = vsel %vm282_vm3, %v2814_v59, %v1648_v53 }
 0x835   :  { %v4687_v7 = vsel %vm284_vm5, %v1656_v5, %v1651_v2  ;;  %v1658_v10 = vsel %vm286_vm4, %v1651_v2, %v1654_v13 }
 0x836   :  { %v1677_v54 = vrot.slane %v4687_v7, 4  ;;  %v1678_v28 = vrot.slane %v1658_v10, 4 }
 0x837   :  { %v1447_v15 = vpop.xlane.xlu1 %1446  ;;  %v1589_v26 = vld [vmem:[%s5493_s17 + $0x28] sm:$0x7]  ;;  %v1588_v42 = vld [vmem:[%s5493_s17 + $0x10] sm:$0x7] }
 0x838   :  { %v1466_v16 = vadd.f32 %v4501_v63, %v1447_v15  ;;  %v1590_v9 = vld [vmem:[%s5493_s17 + $0x40] sm:$0x7]  ;;  %v1593_v52 = vrot.slane %v1589_v26, 5  ;;  %v1591_v34 = vld [vmem:[%s5493_s17 + $0x58] sm:$0x7]  ;;  %v1679_v25 = vsel %vm306_vm6, %v1677_v54, %v1678_v28  ;;  %v1355_v26 = vadd.f32 %v4467_v45, %v4473_v19 }
 0x839   :  { %v1596_v12 = vrot.slane %v1590_v9, 2  ;;  %v1599_v41 = vrot.slane %v1591_v34, 7 }
 0x83a   :  { %v1471_v39 = vmax.f32 %v1466_v16, 0.0  ;;  %v1601_v32 = vsel %vm282_vm3, %v1588_v42, %v1593_v52 }
 0x83b   :  { %v1533_v21 = vpop.permute.xlu1 %1532  ;;  %v1602_v49 = vsel %vm284_vm5, %v1601_v32, %v1596_v12  ;;  %v1603_v11 = vsel %vm286_vm4, %v1596_v12, %v1599_v41 }
 0x83c   :  { %2792 = vst.msk [vmem:[%s5493_s17 + $0x6f] sm:$0xf] %vm1539_vm2, %v1533_v21  ;;  %2795 = vst.msk [vmem:[%s5493_s17 + $0x87] sm:$0xf] %vm1539_vm2, %v1533_v21  ;;  %1505 = vrot.lane.b32.xlu0 %v1471_v39, %s3207_s24  ;;  %v4703_v20 = vrot.slane %v1602_v49, 4 }
 0x83d   :  { %2798 = vst.msk [vmem:[%s5493_s17 + $0x9f] sm:$0xf] %vm1539_vm2, %v1533_v21  ;;  %2801 = vst.msk [vmem:[%s5493_s17 + $0xb7] sm:$0xf] %vm1539_vm2, %v1533_v21 }
 0x83e   :  { %2804 = vst.msk [vmem:[%s5493_s17 + $0x6f] sm:$0xf] %vm1561_vm10, %v1555_v29  ;;  %2807 = vst.msk [vmem:[%s5493_s17 + $0x87] sm:$0xf] %vm1561_vm10, %v1555_v29 }
 0x83f   :  { %2810 = vst.msk [vmem:[%s5493_s17 + $0x9f] sm:$0xf] %vm1561_vm10, %v1555_v29  ;;  %2813 = vst.msk [vmem:[%s5493_s17 + $0xb7] sm:$0xf] %vm1561_vm10, %v1555_v29  ;;  %v1480_v0 = vpop.permute.xlu1 %1479  ;;  %v1624_v29 = vrot.slane %v1603_v11, 4 }
 0x840   :  { %1489 = vst.msk [vmem:[%s5493_s17 + $0x1] sm:$0xff] %vm1488_vm14, %v1480_v0  ;;  %1493 = vst.msk [vmem:[%s5493_s17 + $0x19] sm:$0xff] %vm1488_vm14, %v1480_v0 }
 0x841   :  { %1496 = vst.msk [vmem:[%s5493_s17 + $0x31] sm:$0xff] %vm1488_vm14, %v1480_v0  ;;  %1499 = vst.msk [vmem:[%s5493_s17 + $0x49] sm:$0xff] %vm1488_vm14, %v1480_v0  ;;  %v4712_v36 = vsel %vm306_vm6, %v4703_v20, %v1624_v29 }
 0x845   :  { %v2819_v48 = vld [vmem:[%s5493_s17 + $0x88] sm:$0x7]  ;;  %v2818_v61 = vld [vmem:[%s5493_s17 + $0x70] sm:$0x7] }
 0x846   :  { %v2820_v46 = vld [vmem:[%s5493_s17 + $0xa0] sm:$0x7]  ;;  %v2821_v23 = vld [vmem:[%s5493_s17 + $0xb8] sm:$0x7]  ;;  %v1664_v18 = vrot.slane %v2819_v48, 5 }
 0x847   :  { %v1667_v27 = vrot.slane %v2820_v46, 2  ;;  %v1670_v47 = vrot.slane %v2821_v23, 7 }
 0x848   :  { %v1672_v51 = vsel %vm282_vm3, %v2818_v61, %v1664_v18 }
 0x849   :  { %v1674_v60 = vsel %vm286_vm4, %v1667_v27, %v1670_v47  ;;  %v1673_v50 = vsel %vm284_vm5, %v1672_v51, %v1667_v27 }
 0x84a   :  { %1698 = vrot.lane.b32.xlu0 %v1674_v60, %s3204_s16  ;;  %v1693_v44 = vrot.slane %v1674_v60, 4  ;;  %v4667_v17 = vrot.slane %v1673_v50, 4 }
 0x84c   :  { %v1694_v3 = vsel %vm306_vm6, %v4667_v17, %v1693_v44 }
 0x84d   :  { %1703 = vrot.lane.b32.xlu1 %v1694_v3, %s3205_s28 }
 0x84e   :  { %1696 = vrot.lane.b32.xlu0 %v1673_v50, %s3204_s16 }
 0x851   :  { %1701 = vrot.lane.b32.xlu1 %v4667_v17, %s3205_s28 }
 0x852   :  { %1685 = vrot.lane.b32.xlu0 %v4687_v7, %s3205_s28 }
 0x855   :  { %1687 = vrot.lane.b32.xlu1 %v1658_v10, %s3205_s28 }
 0x856   :  { %1680 = vrot.lane.b32.xlu0 %v1677_v54, %s3204_s16 }
 0x859   :  { %1682 = vrot.lane.b32.xlu1 %v1679_v25, %s3204_s16 }
 0x85a   :  { %1634 = vrot.lane.b32.xlu0 %v4703_v20, %s3205_s28 }
 0x85d   :  { %1636 = vrot.lane.b32.xlu1 %v4712_v36, %s3205_s28 }
 0x85e   :  { %1628 = vrot.lane.b32.xlu0 %v1602_v49, %s3204_s16 }
 0x861   :  { %1630 = vrot.lane.b32.xlu1 %v1603_v11, %s3204_s16 }
 0x862   :  { %1722 = vrot.lane.b32.xlu0 %v1694_v3, %s3207_s24 }
 0x8ae   :  { %v1506_v35 = vpop.permute.xlu0 %1505 }
 0x8af   :  { %1515 = vst.msk [vmem:[%s5493_s17 + $0x1] sm:$0xff] %vm1514_vm0, %v1506_v35  ;;  %1519 = vst.msk [vmem:[%s5493_s17 + $0x19] sm:$0xff] %vm1514_vm0, %v1506_v35 }
 0x8b0   :  { %1522 = vst.msk [vmem:[%s5493_s17 + $0x31] sm:$0xff] %vm1514_vm0, %v1506_v35  ;;  %1525 = vst.msk [vmem:[%s5493_s17 + $0x49] sm:$0xff] %vm1514_vm0, %v1506_v35 }
 0x8b6   :  { %v1573_v0 = vld [vmem:[%s5493_s17 + $0x19] sm:$0x7]  ;;  %v1572_v47 = vld [vmem:[%s5493_s17 + $0x1] sm:$0x7] }
 0x8b7   :  { %v1574_v38 = vld [vmem:[%s5493_s17 + $0x31] sm:$0x7]  ;;  %v1575_v43 = vld [vmem:[%s5493_s17 + $0x49] sm:$0x7]  ;;  %v1577_v23 = vrot.slane %v1573_v0, 5 }
 0x8b8   :  { %v1580_v15 = vrot.slane %v1574_v38, 2  ;;  %v1583_v16 = vrot.slane %v1575_v43, 7 }
 0x8b9   :  { %v1585_v48 = vsel %vm282_vm3, %v1572_v47, %v1577_v23  ;;  %vm5511_vm3 = vcmask 48128  }
 0x8ba   :  { %v4741_v39 = vsel %vm286_vm4, %v1580_v15, %v1583_v16  ;;  %v4757_v60 = vsel %vm284_vm5, %v1585_v48, %v1580_v15  ;;  %v3146_v48 = vld [vmem:[#allocation6 + $0x8] sm:$0xff]  ;;  %vm5512_vm4 = vcmask 72704  }
 0x8bb   :  { %1617 = vrot.lane.b32.xlu1 %v4741_v39, %s3205_s28  ;;  %v1607_v44 = vrot.slane %v4741_v39, 4  ;;  %v1606_v6 = vrot.slane %v4757_v60, 4  ;;  %vm5518_vm2 = vmmov %vm5512_vm4 }
 0x8bc   :  { %v1699_v21 = vpop.permute.xlu0 %1698 }
 0x8bd   :  { %v1608_v50 = vsel %vm306_vm6, %v1606_v6, %v1607_v44 }
 0x8bf   :  { %v1704_v27 = vpop.permute.xlu1 %1703 }
 0x8c0   :  { %v1697_v46 = vpop.permute.xlu0 %1696  ;;  %1728 = vrot.lane.b32.xlu0 %v1704_v27, %s3207_s24 }
 0x8c1   :  { %1724 = vrot.lane.b32.xlu1 %v1697_v46, %s3207_s24 }
 0x8c3   :  { %v1702_v55 = vpop.permute.xlu1 %1701 }
 0x8c4   :  { %v1708_v18 = vsel %vm306_vm6, %v1699_v21, %v1702_v55  ;;  %v1686_v53 = vpop.permute.xlu0 %1685  ;;  %v3147_v55 = vld [vmem:[#allocation8] sm:$0xff] }
 0x8c5   :  { %1726 = vrot.lane.b32.xlu1 %v1708_v18, %s3207_s24 }
 0x8c7   :  { %v1688_v61 = vpop.permute.xlu1 %1687 }
 0x8c8   :  { %v1707_v51 = vsel %vm306_vm6, %v1688_v61, %v4667_v17  ;;  %v1681_v59 = vpop.permute.xlu0 %1680  ;;  %v1366_v17 = vmax.f32 %v1355_v26, 0.0 }
 0x8c9   :  { %1720 = vrot.lane.b32.xlu0 %v1707_v51, %s3207_s24  ;;  %1615 = vrot.lane.b32.xlu1 %v4757_v60, %s3205_s28  ;;  %v1706_v2 = vsel %vm306_vm6, %v1658_v10, %v1681_v59  ;;  %s3226_s28 = smov 115  }
 0x8ca   :  { %v1423_v3 = vmul.f32 %v4471_v8, %v1366_v17  ;;  %v1377_v45 = vmul.f32 %v4485_v33, %v1366_v17 }
 0x8cb   :  { %v1683_v57 = vpop.permute.xlu1 %1682 }
 0x8cc   :  { %v1389_v19 = vsel %vm1379_vm15, %v1377_v45, 0.0  ;;  %v1635_v5 = vpop.permute.xlu0 %1634  ;;  %v3148_v45 = vld [vmem:[#allocation8 + $0x8] sm:$0xff] }
 0x8cd   :  { %1611 = vrot.lane.b32.xlu1 %v1608_v50, %s3204_s16  ;;  %1718 = vrot.lane.b32.xlu0 %v1686_v53, %s3207_s24  ;;  %v1962_v53 = vld [vmem:[%s5493_s17 + $0x50] sm:$0xff] }
 0x8cf   :  { %v1637_v9 = vpop.permute.xlu1 %1636 }
 0x8d0   :  { %v1629_v52 = vpop.permute.xlu0 %1628 }
 0x8d1   :  { %1609 = vrot.lane.b32.xlu1 %v1606_v6, %s3204_s16  ;;  %1716 = vrot.lane.b32.xlu0 %v1683_v57, %s3207_s24  ;;  %v4807_v6 = vld [vmem:[%s5493_s17 + $0x8] sm:$0xff] }
 0x8d3   :  { %v1631_v13 = vpop.permute.xlu1 %1630 }
 0x8d4   :  { %v1723_v42 = vpop.permute.xlu0 %1722  ;;  %v1642_v10 = vsel %vm306_vm6, %v1631_v13, %v1635_v5 }
 0x8d5   :  { %1712 = vrot.lane.b32.xlu1 %v4687_v7, %s3207_s24  ;;  %1714 = vrot.lane.b32.xlu0 %v1706_v2, %s3207_s24  ;;  %v1744_v11 = vsel %vm441_vm8, %v4712_v36, %v1723_v42 }
 0x8d9   :  { %1436 = vrot.lane.b32.xlu0 %v1423_v3, %s3222_s7 }
 0x8f9   :  { %1390 = vadd.xlane.f32.xlu1 %v1389_v19 }
 0x92d   :  { %v1618_v34 = vpop.permute.xlu1 %1617 }
 0x92e   :  { %v1641_v25 = vsel %vm306_vm6, %v1618_v34, %v4703_v20 }
 0x932   :  { %v1729_v32 = vpop.permute.xlu0 %1728 }
 0x933   :  { %v1725_v12 = vpop.permute.xlu1 %1724  ;;  %v1747_v7 = vsel %vm441_vm8, %v1637_v9, %v1729_v32 }
 0x934   :  { %3032 = vmatprep.subr.mxu1 %v1747_v7  ;;  %v1745_v54 = vsel %vm441_vm8, %v1629_v52, %v1725_v12 }
 0x935   :  { %3033 = vmatpush3.msra.mxu1 %v1747_v7 }
 0x937   :  { %v1727_v41 = vpop.permute.xlu1 %1726 }
 0x938   :  { %v1746_v33 = vsel %vm441_vm8, %v1642_v10, %v1727_v41 }
 0x939   :  { %3034 = vmatprep.subr.mxu1 %v1746_v33 }
 0x93a   :  { %3035 = vmatpush3.msra.mxu1 %v1746_v33 }
 0x93b   :  { %v1616_v49 = vpop.permute.xlu1 %1615  ;;  %3036 = vmatprep.subr.mxu1 %v1745_v54  ;;  %v1721_v28 = vpop.permute.xlu0 %1720 }
 0x93c   :  { %3037 = vmatpush3.msra.mxu1 %v1745_v54  ;;  %v1743_v29 = vsel %vm441_vm8, %v1641_v25, %v1721_v28 }
 0x93d   :  { %3038 = vmatprep.subr.mxu1 %v1744_v11 }
 0x93e   :  { %3039 = vmatpush3.msra.mxu1 %v1744_v11 }
 0x93f   :  { %v1612_v35 = vpop.permute.xlu1 %1611  ;;  %3040 = vmatprep.subr.mxu1 %v1743_v29  ;;  %v1719_v38 = vpop.permute.xlu0 %1718 }
 0x940   :  { %3041 = vmatpush3.msra.mxu1 %v1743_v29  ;;  %v1742_v43 = vsel %vm441_vm8, %v1616_v49, %v1719_v38 }
 0x941   :  { %3042 = vmatprep.subr.mxu1 %v1742_v43 }
 0x942   :  { %3043 = vmatpush3.msra.mxu1 %v1742_v43 }
 0x943   :  { %v1610_v15 = vpop.permute.xlu1 %1609  ;;  %v1717_v16 = vpop.permute.xlu0 %1716 }
 0x944   :  { %v1741_v21 = vsel %vm441_vm8, %v1612_v35, %v1717_v16  ;;  %v1640_v20 = vsel %vm306_vm6, %v4741_v39, %v1610_v15  ;;  %vm5513_vm6 = vmmov %vm5511_vm3 }
 0x945   :  { %3044 = vmatprep.subr.mxu1 %v1741_v21 }
 0x946   :  { %3045 = vmatpush3.msra.mxu1 %v1741_v21 }
 0x947   :  { %v1713_v36 = vpop.permute.xlu1 %1712  ;;  %v1715_v0 = vpop.permute.xlu0 %1714 }
 0x948   :  { %v1740_v46 = vsel %vm441_vm8, %v1640_v20, %v1715_v0  ;;  %v1739_v23 = vsel %vm441_vm8, %v4757_v60, %v1713_v36  ;;  %vm5514_vm8 = vmmov %vm5512_vm4 }
 0x949   :  { %3046 = vmatprep.subr.mxu1 %v1740_v46 }
 0x94a   :  { %3047 = vmatpush3.msra.mxu1 %v1740_v46 }
 0x94b   :  { %3048 = vmatprep.subr.mxu1 %v1739_v23  ;;  %v1437_v27 = vpop.permute.xlu0 %1436 }
 0x94c   :  { %3049 = vmatpush3.msra.mxu1 %v1739_v23  ;;  %v1454_v47 = vsel %vm1379_vm15, %v1437_v27, 0.0 }
 0x94d   :  { %3051 = vmatmul.mubr.msk.f32.vlgmr.msra.gmra.mxu1 %vm461_vm7, %v3146_v48  ;;  %1455 = vadd.xlane.f32.xlu0 %v1454_v47 }
 0x94e   :  { %3057 = vmatprep.mubr.msk.f32.mxu1 %vm555_vm9, %v3147_v55 }
 0x982   :  { %v1391_v39 = vpop.xlane.xlu1 %1390 }
 0x983   :  { %v1405_v18 = vadd.f32 %v4504_v1, %v1391_v39  ;;  %v4814_v1 = vld [vmem:[%s5493_s17 + $0x20] sm:$0xff] }
 0x985   :  { %v1410_v61 = vmax.f32 %v1405_v18, 0.0 }
 0x987   :  { %1530 = vrot.lane.b32.xlu1 %v1410_v61, %s3209_s30 }
 0x9d6   :  { %v1456_v44 = vpop.xlane.xlu0 %1455 }
 0x9d7   :  { %v1469_v60 = vadd.f32 %v4501_v63, %v1456_v44  ;;  %v4821_v63 = vld [vmem:[%s5493_s17 + $0x38] sm:$0xff] }
 0x9d9   :  { %v1474_v51 = vmax.f32 %v1469_v60, 0.0 }
 0x9db   :  { %1552 = vrot.lane.b32.xlu0 %v1474_v51, %s3207_s24  ;;  %s3223_s24 = smov 5  }
 0x9df   :  { %1969 = vrot.lane.b32.xlu0 %v4807_v6, %s3204_s16 }
 0x9e3   :  { %1981 = vrot.lane.b32.xlu0 %v4814_v1, %s3203_s1 }
 0x9e7   :  { %1993 = vrot.lane.b32.xlu0 %v4821_v63, %s3223_s24 }
 0x9eb   :  { %2005 = vrot.lane.b32.xlu0 %v1962_v53, %s3200_s15 }
 0x9f9   :  { %v1531_v50 = vpop.permute.xlu1 %1530 }
 0x9fa   :  { %2791 = vst.msk [vmem:[%s5493_s17 + $0x67] sm:$0xff] %vm1488_vm14, %v1531_v50  ;;  %2794 = vst.msk [vmem:[%s5493_s17 + $0x7f] sm:$0xff] %vm1488_vm14, %v1531_v50 }
 0x9fb   :  { %2797 = vst.msk [vmem:[%s5493_s17 + $0x97] sm:$0xff] %vm1488_vm14, %v1531_v50  ;;  %2800 = vst.msk [vmem:[%s5493_s17 + $0xaf] sm:$0xff] %vm1488_vm14, %v1531_v50 }
 0x9fc   :  { %vm5516_vm14 = vmmov %vm5512_vm4 }
 0xa0d   :  { %v3052_v26 = vpop.f32.mrf.mxu1 }
 0xa0e   :  { %v1820_v57 = vadd.f32 %v3052_v26, %v3819_v22 }
 0xa0f   :  { %v1814_v59 = vpop.f32.mrf.mxu1 }
 0xa10   :  { %v1824_v17 = vmax.f32 %v1820_v57, 0.0  ;;  %v1815_v2 = vadd.f32 %v1814_v59, %v3822_v24 }
 0xa12   :  { %v1823_v3 = vmax.f32 %v1815_v2, 0.0  ;;  %3053 = vmatprep.subr.mxu1 %v1824_v17 }
 0xa13   :  { %3054 = vmatpush3.msra.mxu1 %v1824_v17 }
 0xa14   :  { %3055 = vmatprep.subr.mxu1 %v1823_v3 }
 0xa15   :  { %3056 = vmatpush3.msra.mxu1 %v1823_v3 }
 0xa16   :  { %3058 = vmatmul.mubr.msk.f32.vlgmr.msra.gmra.mxu1 %vm555_vm9, %v3148_v45  ;;  %3093 = vmatprep.subr.mxu1 %v3202_v4 }
 0xa17   :  { %3094 = vmatpush3.msra.mxu1 %v4414_v56  ;;  %3097 = vmatprep.mubr.msk.f32.mxu1 %vm3221_vm1, %v3202_v4 }
 0xa18   :  { %3095 = vmatprep.subr.mxu1 %v3202_v4 }
 0xa19   :  { %3096 = vmatpush3.msra.mxu1 %v4421_v14 }
 0xa4d   :  { %v1553_v22 = vpop.permute.xlu0 %1552 }
 0xa4e   :  { %2803 = vst.msk [vmem:[%s5493_s17 + $0x67] sm:$0xff] %vm1514_vm0, %v1553_v22  ;;  %2806 = vst.msk [vmem:[%s5493_s17 + $0x7f] sm:$0xff] %vm1514_vm0, %v1553_v22 }
 0xa4f   :  { %2809 = vst.msk [vmem:[%s5493_s17 + $0x97] sm:$0xff] %vm1514_vm0, %v1553_v22  ;;  %2812 = vst.msk [vmem:[%s5493_s17 + $0xaf] sm:$0xff] %vm1514_vm0, %v1553_v22 }
 0xa50   :  { %vm5517_vm0 = vmmov %vm5511_vm3 }
 0xa51   :  { %v4909_v43 = vpop.permute.xlu0 %1969  ;;  %vm5519_vm10 = vmmov %vm5517_vm0 }
 0xa55   :  { %v2835_v35 = vld [vmem:[%s5493_s17 + $0x68] sm:$0xff]  ;;  %v4911_v15 = vpop.permute.xlu0 %1981 }
 0xa56   :  { %v2844_v38 = vld [vmem:[%s5493_s17 + $0xb0] sm:$0xff] }
 0xa59   :  { %v4913_v16 = vpop.permute.xlu0 %1993 }
 0xa5d   :  { %v4915_v21 = vpop.permute.xlu0 %2005 }
 0xad6   :  { %v3059_v24 = vpop.f32.mrf.mxu1 }
 0xad7   :  { %v1897_v56 = vadd.f32 %v3059_v24, %v3909_v31 }
 0xad8   :  { %v1891_v14 = vpop.f32.mrf.mxu1 }
 0xad9   :  { %v1901_v19 = vmax.f32 %v1897_v56, 0.0  ;;  %v1892_v5 = vadd.f32 %v1891_v14, %v3907_v30 }
 0xadb   :  { %v1912_v9 = vmul.f32 %v1901_v19, %v3913_v37  ;;  %v1900_v52 = vmax.f32 %v1892_v5, 0.0 }
 0xadd   :  { %v1913_v13 = vsel %vm645_vm11, %v1912_v9, 0.0  ;;  %v1902_v34 = vmul.f32 %v1900_v52, %v3916_v40 }
 0xade   :  { %v1914_v42 = vrot.slane %v1913_v13, 4 }
 0xadf   :  { %v1903_v12 = vsel %vm645_vm11, %v1902_v34, 0.0 }
 0xae0   :  { %v1915_v32 = vadd.f32 %v1914_v42, %v1913_v13  ;;  %v1904_v7 = vrot.slane %v1903_v12, 4 }
 0xae2   :  { %v1916_v10 = vrot.slane %v1915_v32, 2  ;;  %v1905_v41 = vadd.f32 %v1904_v7, %v1903_v12 }
 0xae4   :  { %v1917_v33 = vadd.f32 %v1916_v10, %v1915_v32  ;;  %v1906_v31 = vrot.slane %v1905_v41, 2 }
 0xae6   :  { %v1918_v54 = vrot.slane %v1917_v33, 1  ;;  %v1907_v49 = vadd.f32 %v1906_v31, %v1905_v41 }
 0xae8   :  { %v1908_v28 = vrot.slane %v1907_v49, 1  ;;  %v1919_v30 = vadd.f32 %v1918_v54, %v1917_v33 }
 0xaea   :  { %v1920_v37 = vadd.f32 %v1919_v30, %v3921_v58  ;;  %v1909_v11 = vadd.f32 %v1908_v28, %v1907_v49  ;;  %v2838_v58 = vld [vmem:[%s5493_s17 + $0x80] sm:$0xff] }
 0xaec   :  { %v1921_v25 = vmax.f32 %v1920_v37, 0.0  ;;  %v1910_v29 = vadd.f32 %v1909_v11, %v3923_v62  ;;  %v2841_v62 = vld [vmem:[%s5493_s17 + $0x98] sm:$0xff] }
 0xaee   :  { %1931 = vrot.lane.b32.xlu1 %v1921_v25, %s3209_s30  ;;  %1945 = vrot.lane.b32.xlu0 %v1921_v25, %s3214_s3  ;;  %v1911_v40 = vmax.f32 %v1910_v29, 0.0 }
 0xaf2   :  { %2050 = vrot.lane.b32.xlu1 %v1962_v53, %s3224_s18  ;;  %1923 = vrot.lane.b32.xlu0 %v1911_v40, %s3209_s30  ;;  %s3227_s30 = smov 118  }
 0xaf6   :  { %2023 = vrot.lane.b32.xlu0 %v4807_v6, %s3225_s14  ;;  %2169 = vrot.lane.b32.xlu1 %v2835_v35, %s3204_s16 }
 0xafa   :  { %2032 = vrot.lane.b32.xlu0 %v4814_v1, %s3226_s28  ;;  %2181 = vrot.lane.b32.xlu1 %v2838_v58, %s3203_s1 }
 0xafe   :  { %2041 = vrot.lane.b32.xlu0 %v4821_v63, %s3227_s30  ;;  %2223 = vrot.lane.b32.xlu1 %v2835_v35, %s3225_s14 }
 0xb02   :  { %2193 = vrot.lane.b32.xlu0 %v2841_v62, %s3223_s24  ;;  %2232 = vrot.lane.b32.xlu1 %v2838_v58, %s3226_s28 }
 0xb06   :  { %2205 = vrot.lane.b32.xlu0 %v2844_v38, %s3200_s15  ;;  %1938 = vrot.lane.b32.xlu1 %v1911_v40, %s3214_s3 }
 0xb0a   :  { %2241 = vrot.lane.b32.xlu0 %v2841_v62, %s3227_s30  ;;  %2250 = vrot.lane.b32.xlu1 %v2844_v38, %s3224_s18 }
 0xb60   :  { %v1932_v20 = vpop.permute.xlu1 %1931  ;;  %v1946_v36 = vpop.permute.xlu0 %1945 }
 0xb61   :  { %1934 = vst.msk [vmem:[%s5493_s17 + $0x13] sm:$0x1] %vm692_vm12, %v1932_v20  ;;  %1935 = vst.msk [vmem:[%s5493_s17 + $0x2b] sm:$0x1] %vm692_vm12, %v1932_v20 }
 0xb62   :  { %1936 = vst.msk [vmem:[%s5493_s17 + $0x43] sm:$0x1] %vm692_vm12, %v1932_v20  ;;  %1937 = vst.msk [vmem:[%s5493_s17 + $0x5b] sm:$0x1] %vm692_vm12, %v1932_v20 }
 0xb63   :  { %2830 = vst.msk [vmem:[%s5493_s17 + $0x73] sm:$0x1] %vm692_vm12, %v1946_v36  ;;  %2831 = vst.msk [vmem:[%s5493_s17 + $0x8b] sm:$0x1] %vm692_vm12, %v1946_v36 }
 0xb64   :  { %2832 = vst.msk [vmem:[%s5493_s17 + $0xa3] sm:$0x1] %vm692_vm12, %v1946_v36  ;;  %2833 = vst.msk [vmem:[%s5493_s17 + $0xbb] sm:$0x1] %vm692_vm12, %v1946_v36  ;;  %v4949_v0 = vpop.permute.xlu1 %2050  ;;  %v1924_v46 = vpop.permute.xlu0 %1923 }
 0xb65   :  { %1926 = vst.msk [vmem:[%s5493_s17] sm:$0x1] %vm692_vm12, %v1924_v46  ;;  %1927 = vst.msk [vmem:[%s5493_s17 + $0x18] sm:$0x1] %vm692_vm12, %v1924_v46 }
 0xb66   :  { %1928 = vst.msk [vmem:[%s5493_s17 + $0x30] sm:$0x1] %vm692_vm12, %v1924_v46  ;;  %1929 = vst.msk [vmem:[%s5493_s17 + $0x48] sm:$0x1] %vm692_vm12, %v1924_v46 }
 0xb68   :  { %v2170_v23 = vpop.permute.xlu1 %2169  ;;  %v4967_v27 = vpop.permute.xlu0 %2023  ;;  %v1957_v47 = vld [vmem:[%s5493_s17 + $0x28] sm:$0xf]  ;;  %v1954_v48 = vld [vmem:[%s5493_s17 + $0x10] sm:$0xf] }
 0xb69   :  { %1983 = vrot.lane.b32.xlu0 %v1957_v47, %s3203_s1  ;;  %1971 = vrot.lane.b32.xlu1 %v1954_v48, %s3204_s16  ;;  %v1963_v18 = vld [vmem:[%s5493_s17 + $0x58] sm:$0xf]  ;;  %v1960_v61 = vld [vmem:[%s5493_s17 + $0x40] sm:$0xf] }
 0xb6a   :  { %v2839_v26 = vld [vmem:[%s5493_s17 + $0x88] sm:$0xf]  ;;  %v2836_v57 = vld [vmem:[%s5493_s17 + $0x70] sm:$0xf] }
 0xb6b   :  { %v2845_v17 = vld [vmem:[%s5493_s17 + $0xb8] sm:$0xf]  ;;  %v2842_v2 = vld [vmem:[%s5493_s17 + $0xa0] sm:$0xf] }
 0xb6c   :  { %v2182_v55 = vpop.permute.xlu1 %2181  ;;  %v2033_v39 = vpop.permute.xlu0 %2032  ;;  %v1952_v45 = vld [vmem:[%s5493_s17] sm:$0xff]  ;;  %v1955_v24 = vld [vmem:[%s5493_s17 + $0x18] sm:$0xff] }
 0xb6d   :  { %v2213_v44 = vsel %vm779_vm13, %v2170_v23, %v2182_v55  ;;  %2007 = vrot.lane.b32.xlu0 %v1963_v18, %s3200_s15  ;;  %1995 = vrot.lane.b32.xlu1 %v1960_v61, %s3223_s24  ;;  %v1961_v3 = vld [vmem:[%s5493_s17 + $0x48] sm:$0xff]  ;;  %v1958_v14 = vld [vmem:[%s5493_s17 + $0x30] sm:$0xff]  ;;  %v2058_v9 = vsel %vm779_vm13, %v4967_v27, %v2033_v39 }
 0xb70   :  { %v2224_v60 = vpop.permute.xlu1 %2223  ;;  %v2042_v51 = vpop.permute.xlu0 %2041 }
 0xb71   :  { %2034 = vrot.lane.b32.xlu0 %v1957_v47, %s3226_s28  ;;  %2025 = vrot.lane.b32.xlu1 %v1954_v48, %s3225_s14  ;;  %v2061_v52 = vsel %vm5513_vm6, %v2058_v9, %v2042_v51  ;;  %vm5522_vm6 = vmmov %vm5518_vm2  ;;  %v2013_v9 = vsel %vm779_vm13, %v4909_v43, %v4911_v15 }
 0xb72   :  { %v5076_v42 = vsel %vm5514_vm8, %v2061_v52, %v4949_v0  ;;  %vm5523_vm8 = vcmask 1046528  }
 0xb73   :  { %v2110_v47 = vrot.slane %v5076_v42, 1 }
 0xb74   :  { %v2233_v6 = vpop.permute.xlu1 %2232  ;;  %v2194_v1 = vpop.permute.xlu0 %2193 }
 0xb75   :  { %v2216_v63 = vsel %vm5511_vm3, %v2213_v44, %v2194_v1  ;;  %2052 = vrot.lane.b32.xlu0 %v1963_v18, %s3224_s18  ;;  %2043 = vrot.lane.b32.xlu1 %v1960_v61, %s3227_s30  ;;  %v2258_v34 = vsel %vm779_vm13, %v2224_v60, %v2233_v6 }
 0xb78   :  { %v1939_v53 = vpop.permute.xlu1 %1938  ;;  %v2206_v50 = vpop.permute.xlu0 %2205 }
 0xb79   :  { %2826 = vst.msk [vmem:[%s5493_s17 + $0x60] sm:$0x1] %vm692_vm12, %v1939_v53  ;;  %2827 = vst.msk [vmem:[%s5493_s17 + $0x78] sm:$0x1] %vm692_vm12, %v1939_v53  ;;  %v5014_v59 = vsel %vm5512_vm4, %v2216_v63, %v2206_v50  ;;  %2183 = vrot.lane.b32.xlu0 %v2839_v26, %s3203_s1  ;;  %2171 = vrot.lane.b32.xlu1 %v2836_v57, %s3204_s16 }
 0xb7a   :  { %2828 = vst.msk [vmem:[%s5493_s17 + $0x90] sm:$0x1] %vm692_vm12, %v1939_v53  ;;  %2829 = vst.msk [vmem:[%s5493_s17 + $0xa8] sm:$0x1] %vm692_vm12, %v1939_v53  ;;  %v2270_v61 = vrot.slane %v5014_v59, 1 }
 0xb7b   :  { %vm5515_vm12 = vmmov %vm5511_vm3 }
 0xb7c   :  { %v2242_v13 = vpop.permute.xlu0 %2241  ;;  %v2251_v12 = vpop.permute.xlu1 %2250  ;;  %vm5520_vm3 = vmmov %vm5518_vm2 }
 0xb7d   :  { %2207 = vrot.lane.b32.xlu0 %v2845_v17, %s3200_s15  ;;  %2195 = vrot.lane.b32.xlu1 %v2842_v2, %s3223_s24  ;;  %v2261_v32 = vsel %vm5515_vm12, %v2258_v34, %v2242_v13  ;;  %vm5521_vm4 = vmmov %vm5517_vm0 }
 0xb7e   :  { %v5082_v7 = vsel %vm5516_vm14, %v2261_v32, %v2251_v12  ;;  %vm5524_vm12 = vmmov %vm5523_vm8 }
 0xb7f   :  { %vm5525_vm14 = vmmov %vm5517_vm0 }
 0xb80   :  { %v2834_v22 = vld [vmem:[%s5493_s17 + $0x60] sm:$0xff]  ;;  %v2837_v56 = vld [vmem:[%s5493_s17 + $0x78] sm:$0xff] }
 0xb81   :  { %2234 = vrot.lane.b32.xlu0 %v2839_v26, %s3226_s28  ;;  %2225 = vrot.lane.b32.xlu1 %v2836_v57, %s3225_s14  ;;  %v2843_v19 = vld [vmem:[%s5493_s17 + $0xa8] sm:$0xff]  ;;  %v2840_v5 = vld [vmem:[%s5493_s17 + $0x90] sm:$0xff] }
 0xb85   :  { %2048 = vrot.lane.b32.xlu0 %v1961_v3, %s3224_s18  ;;  %1967 = vrot.lane.b32.xlu1 %v1952_v45, %s3204_s16 }
 0xb89   :  { %2167 = vrot.lane.b32.xlu0 %v2834_v22, %s3204_s16  ;;  %1979 = vrot.lane.b32.xlu1 %v1955_v24, %s3203_s1 }
 0xb8d   :  { %2179 = vrot.lane.b32.xlu0 %v2837_v56, %s3203_s1  ;;  %1991 = vrot.lane.b32.xlu1 %v1958_v14, %s3223_s24 }
 0xb91   :  { %2221 = vrot.lane.b32.xlu0 %v2834_v22, %s3225_s14  ;;  %2003 = vrot.lane.b32.xlu1 %v1961_v3, %s3200_s15 }
 0xb95   :  { %2230 = vrot.lane.b32.xlu0 %v2837_v56, %s3226_s28  ;;  %2021 = vrot.lane.b32.xlu1 %v1952_v45, %s3225_s14 }
 0xb99   :  { %2248 = vrot.lane.b32.xlu0 %v2843_v19, %s3224_s18  ;;  %2030 = vrot.lane.b32.xlu1 %v1955_v24, %s3226_s28 }
 0xb9d   :  { %2252 = vrot.lane.b32.xlu0 %v2845_v17, %s3224_s18  ;;  %2039 = vrot.lane.b32.xlu1 %v1958_v14, %s3227_s30 }
 0xba1   :  { %2191 = vrot.lane.b32.xlu1 %v2840_v5, %s3223_s24 }
 0xba5   :  { %2203 = vrot.lane.b32.xlu1 %v2843_v19, %s3200_s15 }
 0xba9   :  { %2239 = vrot.lane.b32.xlu1 %v2840_v5, %s3227_s30 }
 0xbad   :  { %2243 = vrot.lane.b32.xlu1 %v2842_v2, %s3227_s30 }
 0xbb1   :  { %2102 = vrot.lane.b32.xlu1 %v5076_v42, %s3216_s27 }
 0xbb5   :  { %2302 = vrot.lane.b32.xlu1 %v5082_v7, %s3216_s27 }
 0xbdb   :  { %v1972_v10 = vpop.permute.xlu1 %1971  ;;  %v1984_v41 = vpop.permute.xlu0 %1983 }
 0xbdc   :  { %v2014_v33 = vsel %vm779_vm13, %v1972_v10, %v1984_v41 }
 0xbdf   :  { %v1996_v31 = vpop.permute.xlu1 %1995  ;;  %v2008_v54 = vpop.permute.xlu0 %2007 }
 0xbe0   :  { %v2017_v49 = vsel %vm5517_vm0, %v2014_v33, %v1996_v31  ;;  %vm5526_vm0 = vmmov %vm5518_vm2 }
 0xbe1   :  { %v5089_v28 = vsel %vm5518_vm2, %v2017_v49, %v2008_v54  ;;  %vm5527_vm2 = vmmov %vm5521_vm4 }
 0xbe2   :  { %v2086_v30 = vrot.slane %v5089_v28, 2  ;;  %v2072_v14 = vrot.slane %v5089_v28, 1  ;;  %v2016_v13 = vsel %vm5527_vm2, %v2013_v9, %v4913_v16 }
 0xbe3   :  { %v2026_v37 = vpop.permute.xlu1 %2025  ;;  %v2035_v11 = vpop.permute.xlu0 %2034 }
 0xbe4   :  { %2092 = vrot.lane.b32.xlu0 %v2086_v30, %s3217_s19  ;;  %v2059_v25 = vsel %vm779_vm13, %v2026_v37, %v2035_v11 }
 0xbe7   :  { %v2044_v29 = vpop.permute.xlu1 %2043  ;;  %v2053_v40 = vpop.permute.xlu0 %2052 }
 0xbe8   :  { %v2062_v35 = vsel %vm5519_vm10, %v2059_v25, %v2044_v29  ;;  %vm5528_vm10 = vmmov %vm5526_vm0  ;;  %v2310_v25 = vrot.slane %v5082_v7, 1 }
 0xbe9   :  { %v5098_v58 = vsel %vm5520_vm3, %v2062_v35, %v2053_v40  ;;  %v5140_v32 = vsel %vm5528_vm10, %v2016_v13, %v4915_v21  ;;  %vm5529_vm3 = vmmov %vm5527_vm2 }
 0xbea   :  { %v2112_v62 = vrot.slane %v5098_v58, 1  ;;  %2104 = vrot.lane.b32.xlu1 %v5098_v58, %s3216_s27  ;;  %v2126_v36 = vrot.slane %v5098_v58, 2  ;;  %v2070_v33 = vrot.slane %v5140_v32, 1  ;;  %v2084_v40 = vrot.slane %v5140_v32, 2  ;;  %vm5537_vm10 = vmmov %vm5529_vm3 }
 0xbeb   :  { %v2172_v38 = vpop.permute.xlu1 %2171  ;;  %v2184_v20 = vpop.permute.xlu0 %2183 }
 0xbec   :  { %2118 = vrot.lane.b32.xlu0 %v2112_v62, %s3218_s21  ;;  %v2214_v0 = vsel %vm779_vm13, %v2172_v38, %v2184_v20  ;;  %v2113_v18 = vsel %vm5523_vm8, %v2110_v47, %v2112_v62  ;;  %vm5532_vm8 = vmmov %vm5527_vm2  ;;  %v2087_v38 = vsel %vm284_vm5, %v2084_v40, %v2086_v30  ;;  %v2124_v20 = vrot.slane %v5076_v42, 2 }
 0xbef   :  { %v2196_v46 = vpop.permute.xlu1 %2195  ;;  %v2208_v23 = vpop.permute.xlu0 %2207 }
 0xbf0   :  { %v2217_v27 = vsel %vm5521_vm4, %v2214_v0, %v2196_v46  ;;  %2132 = vrot.lane.b32.xlu0 %v2126_v36, %s3219_s22  ;;  %vm5530_vm4 = vmmov %vm5526_vm0 }
 0xbf1   :  { %v5112_v48 = vsel %vm5522_vm6, %v2217_v27, %v2208_v23  ;;  %vm5531_vm6 = vmmov %vm5527_vm2  ;;  %v2127_v27 = vsel %vm284_vm5, %v2124_v20, %v2126_v36 }
 0xbf2   :  { %v2272_v55 = vrot.slane %v5112_v48, 1  ;;  %v2286_v23 = vrot.slane %v5112_v48, 2 }
 0xbf3   :  { %v2226_v39 = vpop.permute.xlu1 %2225  ;;  %v2235_v44 = vpop.permute.xlu0 %2234 }
 0xbf4   :  { %2116 = vrot.lane.b32.xlu0 %v2113_v18, %s3218_s21  ;;  %v2273_v51 = vsel %vm5524_vm12, %v2270_v61, %v2272_v55  ;;  %v2259_v43 = vsel %vm779_vm13, %v2226_v39, %v2235_v44  ;;  %vm5533_vm12 = vmmov %vm5526_vm0  ;;  %v2284_v39 = vrot.slane %v5014_v59, 2 }
 0xbf6   :  { %v2287_v58 = vsel %vm284_vm5, %v2284_v39, %v2286_v23 }
 0xbf7   :  { %v1968_v60 = vpop.permute.xlu1 %1967  ;;  %v2049_v1 = vpop.permute.xlu0 %2048 }
 0xbf8   :  { %2276 = vrot.lane.b32.xlu0 %v2273_v51, %s3220_s2 }
 0xbfb   :  { %v1980_v6 = vpop.permute.xlu1 %1979  ;;  %v2168_v53 = vpop.permute.xlu0 %2167 }
 0xbfc   :  { %v2012_v15 = vsel %vm779_vm13, %v1968_v60, %v1980_v6 }
 0xbff   :  { %v1992_v63 = vpop.permute.xlu1 %1991  ;;  %v2180_v57 = vpop.permute.xlu0 %2179 }
 0xc00   :  { %v2015_v31 = vsel %vm5531_vm6, %v2012_v15, %v1992_v63  ;;  %v2212_v30 = vsel %vm779_vm13, %v2168_v53, %v2180_v57 }
 0xc03   :  { %v2004_v50 = vpop.permute.xlu1 %2003  ;;  %v2222_v2 = vpop.permute.xlu0 %2221 }
 0xc04   :  { %v5151_v21 = vsel %vm5533_vm12, %v2015_v31, %v2004_v50  ;;  %v2324_v50 = vrot.slane %v5082_v7, 2  ;;  %vm5543_vm12 = vcmask 195584  }
 0xc05   :  { %v2083_v35 = vrot.slane %v5151_v21, 2  ;;  %v2069_v51 = vrot.slane %v5151_v21, 1 }
 0xc07   :  { %v2022_v26 = vpop.permute.xlu1 %2021  ;;  %v2231_v19 = vpop.permute.xlu0 %2230  ;;  %v2085_v46 = vsel %vm284_vm5, %v2083_v35, %v2084_v40 }
 0xc08   :  { %v2257_v34 = vsel %vm779_vm13, %v2222_v2, %v2231_v19 }
 0xc0b   :  { %v2031_v17 = vpop.permute.xlu1 %2030  ;;  %v2249_v52 = vpop.permute.xlu0 %2248 }
 0xc0c   :  { %v2057_v3 = vsel %vm779_vm13, %v2022_v26, %v2031_v17 }
 0xc0f   :  { %v2040_v45 = vpop.permute.xlu1 %2039  ;;  %v2253_v54 = vpop.permute.xlu0 %2252 }
 0xc10   :  { %v2060_v22 = vsel %vm5525_vm14, %v2057_v3, %v2040_v45  ;;  %vm5534_vm14 = vmmov %vm5526_vm0 }
 0xc11   :  { %v2063_v24 = vsel %vm5526_vm0, %v2060_v22, %v2049_v1  ;;  %vm5535_vm0 = vcmask 1046528  }
 0xc12   :  { %2100 = vrot.lane.b32.xlu1 %v2063_v24, %s3216_s27  ;;  %v2073_v11 = vsel %vm5535_vm0, %v2070_v33, %v2072_v14  ;;  %vm5536_vm2 = vmmov %vm5535_vm0  ;;  %v2109_v0 = vrot.slane %v2063_v24, 1  ;;  %v2123_v18 = vrot.slane %v2063_v24, 2 }
 0xc13   :  { %v2192_v56 = vpop.permute.xlu1 %2191  ;;  %vm5539_vm13 = vmmov %vm5535_vm0 }
 0xc14   :  { %v2215_v44 = vsel %vm5537_vm10, %v2212_v30, %v2192_v56  ;;  %v2125_v1 = vsel %vm284_vm5, %v2123_v18, %v2124_v20  ;;  %v2071_v42 = vsel %vm5539_vm13, %v2069_v51, %v2070_v33  ;;  %vm5540_vm6 = vmmov %vm5535_vm0  ;;  %vm5547_vm10 = vcmask 392192  }
 0xc15   :  { %vm5550_vm13 = vmmov %vm5547_vm10 }
 0xc16   :  { %2078 = vrot.lane.b32.xlu1 %v2072_v14, %s3220_s2 }
 0xc17   :  { %v2204_v5 = vpop.permute.xlu1 %2203 }
 0xc18   :  { %v5181_v6 = vsel %vm5530_vm4, %v2215_v44, %v2204_v5 }
 0xc19   :  { %v2269_v36 = vrot.slane %v5181_v6, 1 }
 0xc1b   :  { %v2240_v12 = vpop.permute.xlu1 %2239  ;;  %v2271_v63 = vsel %vm5540_vm6, %v2269_v36, %v2270_v61 }
 0xc1c   :  { %v2260_v10 = vsel %vm5529_vm3, %v2257_v34, %v2240_v12  ;;  %vm5538_vm3 = vmmov %vm5535_vm0 }
 0xc1d   :  { %v2263_v41 = vsel %vm5530_vm4, %v2260_v10, %v2249_v52  ;;  %v2111_v60 = vsel %vm5538_vm3, %v2109_v0, %v2110_v47  ;;  %v2283_v47 = vrot.slane %v5181_v6, 2  ;;  %vm5548_vm3 = vcmask 490496  }
 0xc1e   :  { %2300 = vrot.lane.b32.xlu1 %v2263_v41, %s3216_s27  ;;  %v2323_v53 = vrot.slane %v2263_v41, 2  ;;  %v2309_v26 = vrot.slane %v2263_v41, 1 }
 0xc1f   :  { %v2244_v16 = vpop.permute.xlu1 %2243  ;;  %v2285_v57 = vsel %vm284_vm5, %v2283_v47, %v2284_v39 }
 0xc20   :  { %v2262_v49 = vsel %vm5532_vm8, %v2259_v43, %v2244_v16  ;;  %v2325_v17 = vsel %vm284_vm5, %v2323_v53, %v2324_v50  ;;  %vm5541_vm8 = vmmov %vm5535_vm0 }
 0xc21   :  { %v2265_v37 = vsel %vm5534_vm14, %v2262_v49, %v2253_v54  ;;  %v2311_v61 = vsel %vm5541_vm8, %v2309_v26, %v2310_v25  ;;  %vm5545_vm0 = vmmov %vm5543_vm12 }
 0xc22   :  { %v2312_v29 = vrot.slane %v2265_v37, 1  ;;  %2076 = vrot.lane.b32.xlu1 %v2073_v11, %s3220_s2  ;;  %v2326_v2 = vrot.slane %v2265_v37, 2  ;;  %vm5549_vm4 = vmmov %vm5545_vm0 }
 0xc23   :  { %v2103_v7 = vpop.permute.xlu1 %2102 }
 0xc24   :  { %v2313_v62 = vsel %vm5536_vm2, %v2310_v25, %v2312_v29 }
 0xc25   :  { %2316 = vrot.lane.b32.xlu0 %v2313_v62, %s3218_s21 }
 0xc26   :  { %2090 = vrot.lane.b32.xlu1 %v2087_v38, %s3217_s19 }
 0xc27   :  { %v2303_v45 = vpop.permute.xlu1 %2302 }
 0xc29   :  { %2088 = vrot.lane.b32.xlu0 %v2085_v46, %s3217_s19 }
 0xc2a   :  { %2130 = vrot.lane.b32.xlu1 %v2127_v27, %s3219_s22 }
 0xc2d   :  { %2114 = vrot.lane.b32.xlu0 %v2111_v60, %s3218_s21 }
 0xc2e   :  { %2290 = vrot.lane.b32.xlu1 %v2287_v58, %s3217_s19 }
 0xc31   :  { %2128 = vrot.lane.b32.xlu0 %v2125_v1, %s3219_s22 }
 0xc32   :  { %2074 = vrot.lane.b32.xlu1 %v2071_v42, %s3220_s2 }
 0xc35   :  { %2274 = vrot.lane.b32.xlu0 %v2271_v63, %s3220_s2 }
 0xc36   :  { %2278 = vrot.lane.b32.xlu1 %v2272_v55, %s3220_s2  ;;  %v2327_v55 = vsel %vm284_vm5, %v2324_v50, %v2326_v2  ;;  %vm5542_vm5 = vcmask 97280  }
 0xc37   :  { %vm5544_vm14 = vmmov %vm5542_vm5 }
 0xc38   :  { %vm5546_vm2 = vmmov %vm5542_vm5 }
 0xc39   :  { %2288 = vrot.lane.b32.xlu0 %v2285_v57, %s3217_s19  ;;  %vm5551_vm6 = vmmov %vm5546_vm2 }
 0xc3a   :  { %2328 = vrot.lane.b32.xlu1 %v2325_v17, %s3219_s22  ;;  %vm5552_vm8 = vmmov %vm5546_vm2 }
 0xc3d   :  { %2314 = vrot.lane.b32.xlu0 %v2311_v61, %s3218_s21 }
 0xc3e   :  { %2292 = vrot.lane.b32.xlu1 %v2286_v23, %s3217_s19 }
 0xc41   :  { %2330 = vrot.lane.b32.xlu0 %v2327_v55, %s3219_s22 }
 0xc42   :  { %2318 = vrot.lane.b32.xlu1 %v2312_v29, %s3218_s21 }
 0xc45   :  { %2304 = vrot.lane.b32.xlu0 %v2265_v37, %s3216_s27 }
 0xc49   :  { %2332 = vrot.lane.b32.xlu0 %v2326_v2, %s3219_s22 }
 0xc56   :  { %v2093_v3 = vpop.permute.xlu0 %2092 }
 0xc5c   :  { %v2105_v24 = vpop.permute.xlu1 %2104 }
 0xc5e   :  { %v2119_v22 = vpop.permute.xlu0 %2118 }
 0xc62   :  { %v2133_v14 = vpop.permute.xlu0 %2132 }
 0xc66   :  { %v2117_v5 = vpop.permute.xlu0 %2116 }
 0xc6a   :  { %v2277_v52 = vpop.permute.xlu0 %2276 }
 0xc6b   :  { %v2338_v0 = vsel %vm5552_vm8, %v5014_v59, %v2277_v52 }
 0xc84   :  { %v2101_v56 = vpop.permute.xlu1 %2100 }
 0xc88   :  { %v2079_v19 = vpop.permute.xlu1 %2078 }
 0xc89   :  { %v2139_v11 = vsel %vm5546_vm2, %v5089_v28, %v2079_v19 }
 0xc8a   :  { %v2142_v38 = vsel %vm5549_vm4, %v2139_v11, %v2093_v3 }
 0xc8b   :  { %v2145_v23 = vsel %vm645_vm11, %v2142_v38, %v2105_v24 }
 0xc90   :  { %v2301_v9 = vpop.permute.xlu1 %2300 }
 0xc94   :  { %v2077_v13 = vpop.permute.xlu1 %2076 }
 0xc95   :  { %v2138_v15 = vsel %vm5542_vm5, %v5140_v32, %v2077_v13  ;;  %vm5553_vm5 = vmmov %vm5545_vm0 }
 0xc97   :  { %v2317_v34 = vpop.permute.xlu0 %2316 }
 0xc98   :  { %v2091_v12 = vpop.permute.xlu1 %2090 }
 0xc99   :  { %v2141_v31 = vsel %vm5543_vm12, %v2138_v15, %v2091_v12  ;;  %vm5554_vm12 = vmmov %vm5548_vm3 }
 0xc9a   :  { %v2144_v25 = vsel %vm645_vm11, %v2141_v31, %v2103_v7 }
 0xc9b   :  { %v2089_v10 = vpop.permute.xlu0 %2088  ;;  %v2147_v20 = vsel %vm5550_vm13, %v2144_v25, %v2117_v5 }
 0xc9c   :  { %v2131_v41 = vpop.permute.xlu1 %2130 }
 0xc9d   :  { %v2150_v27 = vsel %vm5554_vm12, %v2147_v20, %v2131_v41 }
 0xc9f   :  { %v2115_v33 = vpop.permute.xlu0 %2114 }
 0xca0   :  { %v2291_v43 = vpop.permute.xlu1 %2290 }
 0xca3   :  { %v2129_v16 = vpop.permute.xlu0 %2128 }
 0xca4   :  { %v2075_v54 = vpop.permute.xlu1 %2074 }
 0xca5   :  { %v2137_v49 = vsel %vm5544_vm14, %v5151_v21, %v2075_v54  ;;  %vm5555_vm14 = vmmov %vm5545_vm0 }
 0xca6   :  { %v2140_v37 = vsel %vm5545_vm0, %v2137_v49, %v2089_v10  ;;  %v2341_v39 = vsel %vm5555_vm14, %v2338_v0, %v2291_v43  ;;  %vm5556_vm0 = vmmov %vm5547_vm10 }
 0xca7   :  { %v2143_v29 = vsel %vm645_vm11, %v2140_v37, %v2101_v56  ;;  %v2275_v40 = vpop.permute.xlu0 %2274  ;;  %v2344_v60 = vsel %vm645_vm11, %v2341_v39, %v2303_v45  ;;  %vm5557_vm2 = vmmov %vm5556_vm0  ;;  %v3149_v56 = vld [vmem:[%s5488_s10] ss:$0 sm:$0xff] }
 0xca8   :  { %v2146_v35 = vsel %vm5547_vm10, %v2143_v29, %v2115_v33  ;;  %v2279_v32 = vpop.permute.xlu1 %2278  ;;  %v2337_v21 = vsel %vm5551_vm6, %v5181_v6, %v2275_v40  ;;  %v2148_v51 = vsel %vm5557_vm2, %v2145_v23, %v2119_v22  ;;  %vm5558_vm10 = vmmov %vm5548_vm3  ;;  %vm5562_vm6 = vcmask 1041408   ;;  %v3150_v29 = vld [vmem:[%s5490_s12] ss:$0 sm:$0xff] }
 0xca9   :  { %v2149_v62 = vsel %vm5548_vm3, %v2146_v35, %v2129_v16  ;;  %vm5559_vm3 = vmmov %vm5556_vm0  ;;  %v2339_v26 = vsel %vm5552_vm8, %v5112_v48, %v2279_v32 }
 0xcaa   :  { %3079 = vmatmul.mubr.msk.f32.vlgmr.msra.gmra.mxu0 %vm461_vm7, %v2149_v62  ;;  %v2347_v36 = vsel %vm5559_vm3, %v2344_v60, %v2317_v34  ;;  %vm5560_vm4 = vmmov %vm5558_vm10  ;;  %vm2686_vm3 = vcmask 162968  }
 0xcab   :  { %v2289_v28 = vpop.permute.xlu0 %2288  ;;  %3081 = vmatprep.mubr.msk.f32.mxu0 %vm3221_vm1, %v3202_v4  ;;  %v2151_v42 = vsel %vm5560_vm4, %v2148_v51, %v2133_v14  ;;  %vm5561_vm13 = vmmov %vm5560_vm4 }
 0xcac   :  { %v2340_v46 = vsel %vm5553_vm5, %v2337_v21, %v2289_v28  ;;  %v2329_v30 = vpop.permute.xlu1 %2328  ;;  %vm5563_vm12 = vmmov %vm5562_vm6 }
 0xcad   :  { %v2343_v18 = vsel %vm645_vm11, %v2340_v46, %v2301_v9  ;;  %vm5564_vm14 = vmmov %vm5556_vm0 }
 0xcae   :  { %3082 = vmatmul.mubr.msk.f32.gmra.mxu0 %vm461_vm7, %v2150_v27  ;;  %vm5566_vm2 = vmmov %vm5562_vm6 }
 0xcaf   :  { %v2315_v44 = vpop.permute.xlu0 %2314  ;;  %3084 = vmatprep.mubr.msk.f32.mxu0 %vm3221_vm1, %v3202_v4 }
 0xcb0   :  { %v2346_v59 = vsel %vm5556_vm0, %v2343_v18, %v2315_v44  ;;  %v2293_v47 = vpop.permute.xlu1 %2292  ;;  %vm5565_vm0 = vmmov %vm5560_vm4  ;;  %vm2689_vm4 = vcmask 156824  }
 0xcb1   :  { %v2349_v6 = vsel %vm5558_vm10, %v2346_v59, %v2329_v30  ;;  %v2342_v57 = vsel %vm5553_vm5, %v2339_v26, %v2293_v47  ;;  %vm2703_vm10 = vcmask 3072  }
 0xcb2   :  { %v2355_v58 = vrot.slane %v2349_v6, 6 }
 0xcb3   :  { %v2331_v1 = vpop.permute.xlu0 %2330 }
 0xcb4   :  { %v2350_v63 = vsel %vm5561_vm13, %v2347_v36, %v2331_v1  ;;  %v2361_v53 = vsel %vm5562_vm6, %v2151_v42, %v2355_v58  ;;  %v2319_v55 = vpop.permute.xlu1 %2318  ;;  %vm2722_vm13 = vcmask 162970   ;;  %vm2725_vm6 = vcmask 158872  }
 0xcb5   :  { %v2356_v50 = vrot.slane %v2350_v63, 6  ;;  %3085 = vmatmul.mubr.msk.f32.gmra.mxu0 %vm461_vm7, %v2361_v53 }
 0xcb6   :  { %3087 = vmatprep.mubr.msk.f32.mxu0 %vm3221_vm1, %v3202_v4 }
 0xcb7   :  { %v2305_v17 = vpop.permute.xlu0 %2304  ;;  %v2357_v2 = vsel %vm5563_vm12, %v2355_v58, %v2356_v50 }
 0xcb8   :  { %v2345_v61 = vsel %vm645_vm11, %v2342_v57, %v2305_v17  ;;  %v3151_v17 = vld [vmem:[%s5491_s13] ss:$0 sm:$0xff]  ;;  %s3228_s13 = smov 19   ;;  %vm2660_vm11 = vcmask 7168  }
 0xcb9   :  { %3088 = vmatmul.mubr.msk.f32.gmra.mxu0 %vm461_vm7, %v2357_v2  ;;  %v2348_v7 = vsel %vm5564_vm14, %v2345_v61, %v2319_v55 }
 0xcba   :  { %3090 = vmatprep.mubr.msk.f32.mxu0 %vm3221_vm1, %v3202_v4 }
 0xcbb   :  { %v2333_v3 = vpop.permute.xlu0 %2332 }
 0xcbc   :  { %v2351_v48 = vsel %vm5565_vm0, %v2348_v7, %v2333_v3 }
 0xcbd   :  { %v2358_v45 = vrot.slane %v2351_v48, 6 }
 0xcbf   :  { %v2359_v22 = vsel %vm5566_vm2, %v2356_v50, %v2358_v45 }
 0xcc0   :  { %3091 = vmatmul.mubr.msk.f32.gmra.mxu0 %vm461_vm7, %v2359_v22  ;;  %vm5567_vm7 = vcmask 60416  }
 0xd6a   :  { %v2441_v24 = vpop.f32.mrf.mxu0 }
 0xd6b   :  { %v2442_v14 = vadd.f32 %v3149_v56, %v2441_v24 }
 0xd6c   :  { %v3080_v19 = vpop.f32.mrf.mxu0 }
 0xd6d   :  { %v2465_v5 = vmax.f32 %v2442_v14, 0.0 }
 0xd6e   :  { %v2446_v9 = vpop.f32.mrf.mxu0 }
 0xd6f   :  { %v2447_v52 = vadd.f32 %v3149_v56, %v2446_v9  ;;  %3098 = vmatmul.mubr.msk.f32.vlgmr.msra.gmra.mxu1 %vm555_vm9, %v2465_v5  ;;  %v3152_v9 = vld [vmem:[#allocation5] ss:$0 sm:$0xff] }
 0xd70   :  { %v3083_v13 = vpop.f32.mrf.mxu0  ;;  %3100 = vmatprep.mubr.msk.f32.mxu1 %vm3221_vm1, %v3202_v4 }
 0xd71   :  { %v2466_v34 = vmax.f32 %v2447_v52, 0.0 }
 0xd73   :  { %3101 = vmatmul.mubr.msk.f32.gmra.mxu1 %vm555_vm9, %v2466_v34 }
 0xd74   :  { %3103 = vmatprep.mubr.msk.f32.mxu1 %vm3221_vm1, %v3202_v4 }
 0xd75   :  { %v2451_v12 = vpop.f32.mrf.mxu0 }
 0xd76   :  { %v2452_v10 = vadd.f32 %v3149_v56, %v2451_v12 }
 0xd77   :  { %v3086_v41 = vpop.f32.mrf.mxu0 }
 0xd78   :  { %v2467_v33 = vmax.f32 %v2452_v10, 0.0 }
 0xd79   :  { %v2456_v43 = vpop.f32.mrf.mxu0 }
 0xd7a   :  { %v2457_v15 = vadd.f32 %v3149_v56, %v2456_v43  ;;  %3104 = vmatmul.mubr.msk.f32.gmra.mxu1 %vm555_vm9, %v2467_v33 }
 0xd7b   :  { %v3089_v16 = vpop.f32.mrf.mxu0  ;;  %3106 = vmatprep.mubr.msk.f32.mxu1 %vm3221_vm1, %v3202_v4 }
 0xd7c   :  { %v2468_v31 = vmax.f32 %v2457_v15, 0.0 }
 0xd7e   :  { %3107 = vmatmul.mubr.msk.f32.gmra.mxu1 %vm555_vm9, %v2468_v31 }
 0xd7f   :  { %3109 = vmatprep.mubr.msk.f32.mxu1 %vm3221_vm1, %v3202_v4  ;;  %vm2700_vm1 = vcmask 7170  }
 0xd80   :  { %v2461_v54 = vpop.f32.mrf.mxu0 }
 0xd81   :  { %v2462_v49 = vadd.f32 %v3149_v56, %v2461_v54 }
 0xd82   :  { %v3092_v37 = vpop.f32.mrf.mxu0 }
 0xd83   :  { %v2469_v11 = vmax.f32 %v2462_v49, 0.0  ;;  %v3153_v49 = vld [vmem:[#allocation4] ss:$0 sm:$0xff] }
 0xd85   :  { %3110 = vmatmul.mubr.msk.f32.gmra.mxu1 %vm555_vm9, %v2469_v11  ;;  %vm5568_vm9 = vmmov %vm5567_vm7 }
 0xe2f   :  { %v2551_v25 = vpop.f32.mrf.mxu1 }
 0xe30   :  { %v2552_v40 = vadd.f32 %v3150_v29, %v2551_v25 }
 0xe31   :  { %v3099_v35 = vpop.f32.mrf.mxu1 }
 0xe32   :  { %v2575_v32 = vmax.f32 %v2552_v40, 0.0 }
 0xe33   :  { %v2556_v62 = vpop.f32.mrf.mxu1 }
 0xe34   :  { %v2610_v38 = vmul.f32 %v2575_v32, %v4471_v8  ;;  %v2557_v20 = vadd.f32 %v3150_v29, %v2556_v62 }
 0xe35   :  { %v3102_v21 = vpop.f32.mrf.mxu1 }
 0xe36   :  { %v2576_v4 = vmax.f32 %v2557_v20, 0.0  ;;  %2620 = vrot.lane.b32.xlu1 %v2610_v38, %s3222_s7 }
 0xe38   :  { %v2611_v28 = vmul.f32 %v2576_v4, %v4471_v8  ;;  %v2581_v3 = vmul.f32 %v3151_v17, %v2576_v4 }
 0xe3a   :  { %2622 = vrot.lane.b32.xlu0 %v2611_v28, %s3222_s7  ;;  %v2561_v0 = vpop.f32.mrf.mxu1  ;;  %v2588_v56 = vsel %vm1379_vm15, %v2581_v3, 0.0 }
 0xe3b   :  { %v2562_v46 = vadd.f32 %v3150_v29, %v2561_v0 }
 0xe3c   :  { %v3105_v23 = vpop.f32.mrf.mxu1 }
 0xe3d   :  { %v2577_v27 = vmax.f32 %v2562_v46, 0.0 }
 0xe3e   :  { %v2566_v39 = vpop.f32.mrf.mxu1 }
 0xe3f   :  { %v2612_v30 = vmul.f32 %v2577_v27, %v4471_v8  ;;  %v2567_v18 = vadd.f32 %v3150_v29, %v2566_v39  ;;  %v2582_v61 = vmul.f32 %v3151_v17, %v2577_v27 }
 0xe40   :  { %v3108_v44 = vpop.f32.mrf.mxu1 }
 0xe41   :  { %v2578_v60 = vmax.f32 %v2567_v18, 0.0  ;;  %2624 = vrot.lane.b32.xlu1 %v2612_v30, %s3222_s7  ;;  %v2591_v22 = vsel %vm1379_vm15, %v2582_v61, 0.0 }
 0xe43   :  { %v2613_v59 = vmul.f32 %v2578_v60, %v4471_v8  ;;  %v2583_v24 = vmul.f32 %v3151_v17, %v2578_v60 }
 0xe45   :  { %2626 = vrot.lane.b32.xlu0 %v2613_v59, %s3222_s7  ;;  %v2571_v51 = vpop.f32.mrf.mxu1  ;;  %v2594_v19 = vsel %vm1379_vm15, %v2583_v24, 0.0 }
 0xe46   :  { %v2572_v6 = vadd.f32 %v3150_v29, %v2571_v51 }
 0xe47   :  { %v3111_v58 = vpop.f32.mrf.mxu1 }
 0xe48   :  { %v2579_v36 = vmax.f32 %v2572_v6, 0.0 }
 0xe4a   :  { %v2614_v1 = vmul.f32 %v2579_v36, %v4471_v8  ;;  %v2580_v8 = vmul.f32 %v3151_v17, %v2575_v32  ;;  %v2584_v45 = vmul.f32 %v3151_v17, %v2579_v36 }
 0xe4c   :  { %2628 = vrot.lane.b32.xlu1 %v2614_v1, %s3222_s7  ;;  %v2585_v55 = vsel %vm1379_vm15, %v2580_v8, 0.0  ;;  %v2597_v14 = vsel %vm5568_vm9, %v2584_v45, 0.0 }
 0xea8   :  { %v2621_v42 = vpop.permute.xlu1 %2620 }
 0xea9   :  { %v2635_v47 = vsel %vm1379_vm15, %v2621_v42, 0.0 }
 0xeaa   :  { %2636 = vadd.xlane.f32.xlu0 %v2635_v47 }
 0xeac   :  { %v2623_v63 = vpop.permute.xlu0 %2622 }
 0xead   :  { %v2638_v53 = vsel %vm1379_vm15, %v2623_v63, 0.0 }
 0xeae   :  { %2639 = vadd.xlane.f32.xlu1 %v2638_v53 }
 0xeb3   :  { %v2625_v50 = vpop.permute.xlu1 %2624 }
 0xeb4   :  { %v2641_v26 = vsel %vm1379_vm15, %v2625_v50, 0.0 }
 0xeb5   :  { %2642 = vadd.xlane.f32.xlu0 %v2641_v26 }
 0xeb7   :  { %v2627_v57 = vpop.permute.xlu0 %2626 }
 0xeb8   :  { %v2644_v2 = vsel %vm1379_vm15, %v2627_v57, 0.0  ;;  %vm2663_vm15 = vcmask 1024  }
 0xeb9   :  { %2645 = vadd.xlane.f32.xlu0 %v2644_v2 }
 0xebd   :  { %2586 = vadd.xlane.f32.xlu0 %v2585_v55 }
 0xebe   :  { %v2629_v7 = vpop.permute.xlu1 %2628 }
 0xebf   :  { %v2647_v48 = vsel %vm5567_vm7, %v2629_v7, 0.0 }
 0xec0   :  { %2648 = vadd.xlane.f32.xlu1 %v2647_v48 }
 0xec1   :  { %2592 = vadd.xlane.f32.xlu0 %v2591_v22 }
 0xec4   :  { %2589 = vadd.xlane.f32.xlu1 %v2588_v56 }
 0xec5   :  { %2598 = vadd.xlane.f32.xlu0 %v2597_v14 }
 0xec8   :  { %2595 = vadd.xlane.f32.xlu1 %v2594_v19 }
 0xf33   :  { %v2637_v5 = vpop.xlane.xlu0 %2636 }
 0xf34   :  { %v2650_v52 = vadd.f32 %v3152_v9, %v2637_v5 }
 0xf36   :  { %v2655_v13 = vmax.f32 %v2650_v52, 0.0 }
 0xf37   :  { %v2640_v34 = vpop.xlane.xlu1 %2639 }
 0xf38   :  { %v2651_v12 = vadd.f32 %v3152_v9, %v2640_v34  ;;  %2677 = vrot.lane.b32.xlu1 %v2655_v13, %s3228_s13 }
 0xf3a   :  { %v2656_v10 = vmax.f32 %v2651_v12, 0.0 }
 0xf3c   :  { %2679 = vrot.lane.b32.xlu0 %v2656_v10, %s3228_s13 }
 0xf3e   :  { %v2643_v41 = vpop.xlane.xlu0 %2642 }
 0xf3f   :  { %v2652_v33 = vadd.f32 %v3152_v9, %v2643_v41 }
 0xf41   :  { %v2657_v43 = vmax.f32 %v2652_v33, 0.0 }
 0xf42   :  { %v2646_v15 = vpop.xlane.xlu0 %2645 }
 0xf43   :  { %v2653_v16 = vadd.f32 %v3152_v9, %v2646_v15  ;;  %2681 = vrot.lane.b32.xlu1 %v2657_v43, %s3228_s13 }
 0xf45   :  { %v2658_v31 = vmax.f32 %v2653_v16, 0.0 }
 0xf46   :  { %v2587_v54 = vpop.xlane.xlu0 %2586 }
 0xf47   :  { %v2600_v37 = vadd.f32 %v3153_v49, %v2587_v54  ;;  %2716 = vrot.lane.b32.xlu1 %v2658_v31, %s3228_s13 }
 0xf49   :  { %v2605_v11 = vmax.f32 %v2600_v37, 0.0  ;;  %v2649_v25 = vpop.xlane.xlu1 %2648 }
 0xf4a   :  { %v2654_v29 = vadd.f32 %v3152_v9, %v2649_v25  ;;  %v2593_v40 = vpop.xlane.xlu0 %2592 }
 0xf4b   :  { %v2602_v35 = vadd.f32 %v3153_v49, %v2593_v40  ;;  %2661 = vst.msk [vmem:[%s5493_s17 + $0x1] sm:$0xff] %vm2660_vm11, %v2605_v11  ;;  %2665 = vst.msk [vmem:[%s5493_s17 + $0x19] sm:$0xff] %vm2660_vm11, %v2605_v11 }
 0xf4c   :  { %2668 = vst.msk [vmem:[%s5493_s17 + $0x31] sm:$0xff] %vm2660_vm11, %v2605_v11  ;;  %2671 = vst.msk [vmem:[%s5493_s17 + $0x49] sm:$0xff] %vm2660_vm11, %v2605_v11  ;;  %v2659_v32 = vmax.f32 %v2654_v29, 0.0 }
 0xf4d   :  { %v2607_v62 = vmax.f32 %v2602_v35, 0.0  ;;  %v2590_v38 = vpop.xlane.xlu1 %2589 }
 0xf4e   :  { %v2601_v20 = vadd.f32 %v3153_v49, %v2590_v38  ;;  %2718 = vrot.lane.b32.xlu0 %v2659_v32, %s3228_s13  ;;  %v2599_v21 = vpop.xlane.xlu0 %2598 }
 0xf4f   :  { %2664 = vst.msk [vmem:[%s5493_s17 + $0x11] sm:$0x3] %vm2663_vm15, %v2607_v62  ;;  %2667 = vst.msk [vmem:[%s5493_s17 + $0x29] sm:$0x3] %vm2663_vm15, %v2607_v62  ;;  %v2604_v4 = vadd.f32 %v3153_v49, %v2599_v21 }
 0xf50   :  { %2670 = vst.msk [vmem:[%s5493_s17 + $0x41] sm:$0x3] %vm2663_vm15, %v2607_v62  ;;  %2673 = vst.msk [vmem:[%s5493_s17 + $0x59] sm:$0x3] %vm2663_vm15, %v2607_v62  ;;  %v2606_v28 = vmax.f32 %v2601_v20, 0.0 }
 0xf51   :  { %2856 = vst.msk [vmem:[%s5493_s17 + $0x5f] sm:$0xfc] %vm2700_vm1, %v2607_v62  ;;  %2859 = vst.msk [vmem:[%s5493_s17 + $0x77] sm:$0xfc] %vm2700_vm1, %v2607_v62  ;;  %v2609_v0 = vmax.f32 %v2604_v4, 0.0  ;;  %v2596_v46 = vpop.xlane.xlu1 %2595 }
 0xf52   :  { %2862 = vst.msk [vmem:[%s5493_s17 + $0x8f] sm:$0xfc] %vm2700_vm1, %v2607_v62  ;;  %2865 = vst.msk [vmem:[%s5493_s17 + $0xa7] sm:$0xfc] %vm2700_vm1, %v2607_v62  ;;  %v2603_v23 = vadd.f32 %v3153_v49, %v2596_v46 }
 0xf53   :  { %2662 = vst.msk [vmem:[%s5493_s17 + $0x9] sm:$0xff] %vm2660_vm11, %v2606_v28  ;;  %2666 = vst.msk [vmem:[%s5493_s17 + $0x21] sm:$0xff] %vm2660_vm11, %v2606_v28 }
 0xf54   :  { %2669 = vst.msk [vmem:[%s5493_s17 + $0x39] sm:$0xff] %vm2660_vm11, %v2606_v28  ;;  %2672 = vst.msk [vmem:[%s5493_s17 + $0x51] sm:$0xff] %vm2660_vm11, %v2606_v28  ;;  %v2608_v27 = vmax.f32 %v2603_v23, 0.0 }
 0xf55   :  { %2858 = vst.msk [vmem:[%s5493_s17 + $0x6f] sm:$0xf] %vm2703_vm10, %v2609_v0  ;;  %2861 = vst.msk [vmem:[%s5493_s17 + $0x87] sm:$0xf] %vm2703_vm10, %v2609_v0 }
 0xf56   :  { %2864 = vst.msk [vmem:[%s5493_s17 + $0x9f] sm:$0xf] %vm2703_vm10, %v2609_v0  ;;  %2867 = vst.msk [vmem:[%s5493_s17 + $0xb7] sm:$0xf] %vm2703_vm10, %v2609_v0 }
 0xf57   :  { %2857 = vst.msk [vmem:[%s5493_s17 + $0x67] sm:$0xff] %vm2660_vm11, %v2608_v27  ;;  %2860 = vst.msk [vmem:[%s5493_s17 + $0x7f] sm:$0xff] %vm2660_vm11, %v2608_v27 }
 0xf58   :  { %2863 = vst.msk [vmem:[%s5493_s17 + $0x97] sm:$0xff] %vm2660_vm11, %v2608_v27  ;;  %2866 = vst.msk [vmem:[%s5493_s17 + $0xaf] sm:$0xff] %vm2660_vm11, %v2608_v27 }
 0xfaa   :  { %v2678_v39 = vpop.permute.xlu1 %2677 }
 0xfab   :  { %2687 = vst.msk [vmem:[%s5493_s17 + $0x1] sm:$0xff] %vm2686_vm3, %v2678_v39  ;;  %2691 = vst.msk [vmem:[%s5493_s17 + $0x19] sm:$0xff] %vm2686_vm3, %v2678_v39 }
 0xfac   :  { %2694 = vst.msk [vmem:[%s5493_s17 + $0x31] sm:$0xff] %vm2686_vm3, %v2678_v39  ;;  %2697 = vst.msk [vmem:[%s5493_s17 + $0x49] sm:$0xff] %vm2686_vm3, %v2678_v39 }
 0xfae   :  { %v2680_v30 = vpop.permute.xlu0 %2679 }
 0xfaf   :  { %2688 = vst.msk [vmem:[%s5493_s17 + $0x9] sm:$0xff] %vm2686_vm3, %v2680_v30  ;;  %2692 = vst.msk [vmem:[%s5493_s17 + $0x21] sm:$0xff] %vm2686_vm3, %v2680_v30 }
 0xfb0   :  { %2695 = vst.msk [vmem:[%s5493_s17 + $0x39] sm:$0xff] %vm2686_vm3, %v2680_v30  ;;  %2698 = vst.msk [vmem:[%s5493_s17 + $0x51] sm:$0xff] %vm2686_vm3, %v2680_v30 }
 0xfb5   :  { %v2682_v18 = vpop.permute.xlu1 %2681 }
 0xfb6   :  { %2690 = vst.msk [vmem:[%s5493_s17 + $0x11] sm:$0x3] %vm2689_vm4, %v2682_v18  ;;  %2693 = vst.msk [vmem:[%s5493_s17 + $0x29] sm:$0x3] %vm2689_vm4, %v2682_v18 }
 0xfb7   :  { %2696 = vst.msk [vmem:[%s5493_s17 + $0x41] sm:$0x3] %vm2689_vm4, %v2682_v18  ;;  %2699 = vst.msk [vmem:[%s5493_s17 + $0x59] sm:$0x3] %vm2689_vm4, %v2682_v18 }
 0xfb8   :  { %2868 = vst.msk [vmem:[%s5493_s17 + $0x5f] sm:$0xfc] %vm2722_vm13, %v2682_v18  ;;  %2871 = vst.msk [vmem:[%s5493_s17 + $0x77] sm:$0xfc] %vm2722_vm13, %v2682_v18 }
 0xfb9   :  { %2874 = vst.msk [vmem:[%s5493_s17 + $0x8f] sm:$0xfc] %vm2722_vm13, %v2682_v18  ;;  %2877 = vst.msk [vmem:[%s5493_s17 + $0xa7] sm:$0xfc] %vm2722_vm13, %v2682_v18  ;;  %v2717_v44 = vpop.permute.xlu1 %2716 }
 0xfba   :  { %2869 = vst.msk [vmem:[%s5493_s17 + $0x67] sm:$0xff] %vm2686_vm3, %v2717_v44  ;;  %2872 = vst.msk [vmem:[%s5493_s17 + $0x7f] sm:$0xff] %vm2686_vm3, %v2717_v44 }
 0xfbb   :  { %2875 = vst.msk [vmem:[%s5493_s17 + $0x97] sm:$0xff] %vm2686_vm3, %v2717_v44  ;;  %2878 = vst.msk [vmem:[%s5493_s17 + $0xaf] sm:$0xff] %vm2686_vm3, %v2717_v44 }
 0xfc0   :  { %v2719_v60 = vpop.permute.xlu0 %2718 }
 0xfc1   :  { %2870 = vst.msk [vmem:[%s5493_s17 + $0x6f] sm:$0xf] %vm2725_vm6, %v2719_v60  ;;  %2873 = vst.msk [vmem:[%s5493_s17 + $0x87] sm:$0xf] %vm2725_vm6, %v2719_v60 }
 0xfc2   :  { %2876 = vst.msk [vmem:[%s5493_s17 + $0x9f] sm:$0xf] %vm2725_vm6, %v2719_v60  ;;  %2879 = vst.msk [vmem:[%s5493_s17 + $0xb7] sm:$0xf] %vm2725_vm6, %v2719_v60 }
 0xfc3   :  { %2740 = vsyncpa [#allocation7], 1 }
 0xfc4   :  { %2741 = vsyncpa [#allocation9], 1 }

</bundles_post_ra>
